<compile_context>
chip_gen: v5e
topology: v5e:2x2
jax: 0.10.0
libtpu: 0.0.40
codegen_flags: <defaults>
</compile_context>

<pallas_src>
import functools
import numpy as np
import jax
import jax.numpy as jnp
from jax.experimental import pallas as pl
from jax.experimental.pallas import tpu as pltpu


OUT_LANES = 128  # lane-dense fused output slab width -> single unmasked store


def _round_up(n, m):
    return -(-int(n) // int(m)) * int(m)


# ---------------------------------------------------------------------------
# Parameter packing: every weight matrix / bias row of a sub-network goes into
# ONE contiguous buffer (row-stacked, zero-padded to a common lane width,
# per-matrix rows padded to a multiple of 8 so static in-kernel slices stay
# sublane-aligned).  One packed buffer => one DMA descriptor per pallas_call.
# ---------------------------------------------------------------------------
def _pack_rows(mats, row_align=8):
    mats = [jnp.asarray(m, jnp.float32) for m in mats]
    mats = [m.reshape(1, -1) if m.ndim == 1 else m for m in mats]
    max_c = max(int(m.shape[1]) for m in mats)
    offs, blocks, row = [], [], 0
    for m in mats:
        r, c = int(m.shape[0]), int(m.shape[1])
        rp = _round_up(r, row_align)
        offs.append((row, r, c))
        blocks.append(jnp.pad(m, ((0, rp - r), (0, max_c - c))))
        row += rp
    return jnp.concatenate(blocks, axis=0), tuple(offs)


# ---------------------------------------------------------------------------
# Parameter initialization (deterministic, torch-like), then packing.
# ---------------------------------------------------------------------------
def _linear_init(key, fan_in, fan_out):
    k1, k2 = jax.random.split(key)
    bound = 1.0 / np.sqrt(fan_in)
    w = jax.random.uniform(k1, (fan_in, fan_out), jnp.float32, -bound, bound)
    b = jax.random.uniform(k2, (fan_out,), jnp.float32, -bound, bound)
    return w, b


def init_ffw(key, d_in, d_hid, d_out, n_layers):
    # Reconstruction of create_feedforward_layers: Linear/ReLU stack.
    dims = [d_in] + [d_hid] * (n_layers - 1) + [d_out]
    ws, bs = [], []
    for k, a, b_ in zip(jax.random.split(key, len(dims) - 1), dims[:-1], dims[1:]):
        w, b = _linear_init(k, a, b_)
        ws.append(w)
        bs.append(b)
    return ws, bs


def init_masked(key, d_in, d_hid, d_emb, n_inner):
    # Reconstruction of create_masked_layers: per-feature block-diagonal
    # ("masked") Linear/ReLU stack producing a d_emb embedding per feature.
    # TODO(synk): at large d_in re-implement as per-feature batched matmuls
    # instead of a dense kron-masked matrix (fine at d_in=4).
    per = [1] + [d_hid] * max(int(n_inner), 1) + [d_emb]
    ws, bs = [], []
    for k, a, b_ in zip(jax.random.split(key, len(per) - 1), per[:-1], per[1:]):
        w, b = _linear_init(k, d_in * a, d_in * b_)
        mask = jnp.kron(jnp.eye(d_in, dtype=jnp.float32),
                        jnp.ones((a, b_), jnp.float32))
        ws.append(w * mask)
        bs.append(b)
    return ws, bs


def init_model_params(key, d_in, d_clusters, d_hid, d_emb, n_layers, beta):
    assert n_layers >= 2 and d_clusters >= 2, "heads assume n_layers>=2, K>=2"
    ks = jax.random.split(key, 10)
    simplex_w, simplex_b = init_ffw(ks[0], d_in, d_hid, d_clusters, n_layers)
    ploc_w, ploc_b = init_ffw(ks[1], d_in + d_emb, d_hid, 1, n_layers)
    pscl_w, pscl_b = init_ffw(ks[2], d_in + d_emb, d_hid, 1, n_layers)
    pred_emb = jax.random.normal(ks[3], (d_clusters, d_emb), jnp.float32)
    pred_bias = jax.random.normal(ks[4], (1,), jnp.float32)
    placeholder = jnp.zeros((d_in, d_emb), jnp.float32)
    emb_w, emb_b = init_masked(ks[5], d_in, d_hid, d_emb, n_layers - 2)
    loc_w, loc_b = init_ffw(ks[6], d_emb, d_hid, d_in, n_layers)
    w_comb = _linear_init(ks[7], d_in, 1)[0]          # Linear(d_in, 1, bias=False)
    # combine_loc reformulated: out[b, e] = sum_d x_emb[b, d, e] * w_comb[d]
    #   == x_emb_flat @ kron(w_comb, I_emb)  -> the original transpose/reshape
    # dance becomes one in-kernel matmul.
    w_comb_blk = jnp.kron(w_comb, jnp.eye(d_emb, dtype=jnp.float32))

    n_emb, n_loc, n_ffw = len(emb_w), len(loc_w), n_layers
    K = d_clusters

    # Compile-time constant 0/1 expansion matrix for the missingness mask:
    #   (m @ rep)[b, d*d_emb + e] == m[b, d]   (no runtime iota/compare)
    rep = np.kron(np.eye(d_in, dtype=np.float32),
                  np.ones((1, d_emb), np.float32))

    # Compile-time one-hot rows used to scatter the narrow result columns into
    # the lane-dense (rows, OUT_LANES) output slab with broadcast-multiplies.
    out_used = d_in + 3 * K + 1
    assert out_used <= OUT_LANES
    scatter = np.eye(_round_up(out_used, 8), OUT_LANES, dtype=np.float32)

    shap_w_mats = emb_w + [w_comb_blk] + loc_w + [jnp.asarray(rep),
                                                  jnp.asarray(scatter)]
    shap_w, sw_offs = _pack_rows(shap_w_mats)
    shap_b, sb_offs = _pack_rows(emb_b + [placeholder.reshape(1, -1)] + loc_b)

    # First layer of each predictive head split into an 8-row-aligned phi-block
    # (rows 0:d_in) and embedding-block (rows d_in:d_in+d_emb) so no in-kernel
    # slice straddles the 8-sublane tile boundary.
    head_w_mats = (simplex_w
                   + [ploc_w[0][:d_in], ploc_w[0][d_in:]] + ploc_w[1:]
                   + [pscl_w[0][:d_in], pscl_w[0][d_in:]] + pscl_w[1:]
                   + [pred_emb])
    head_w, hw_offs = _pack_rows(head_w_mats)
    head_b, hb_offs = _pack_rows(simplex_b + ploc_b + pscl_b
                                 + [pred_bias.reshape(1, 1)])

    params = {"shap_w": shap_w, "shap_b": shap_b,
              "head_w": head_w, "head_b": head_b,
              "beta": jnp.array([np.log(beta)], jnp.float32)}
    meta = {
        "d_in": d_in, "d_emb": d_emb, "d_hid": d_hid, "K": K,
        "n_emb": n_emb, "n_loc": n_loc, "n_ffw": n_ffw,
        "sw_offs": sw_offs, "sb_offs": sb_offs,
        "hw_offs": hw_offs, "hb_offs": hb_offs,
        # shap_w / shap_b entry indices
        "sw_comb": n_emb, "sw_loc0": n_emb + 1,
        "sw_rep": n_emb + 1 + n_loc, "sw_scatter": n_emb + 2 + n_loc,
        "sb_placeholder": n_emb, "sb_loc0": n_emb + 1,
        # head_w entry indices
        "hw_ploc_phi": n_ffw, "hw_ploc_emb": n_ffw + 1,
        "hw_ploc_tail": n_ffw + 2,
        "hw_pscl_phi": 2 * n_ffw + 1, "hw_pscl_emb": 2 * n_ffw + 2,
        "hw_pscl_tail": 2 * n_ffw + 3, "hw_pred_emb": 3 * n_ffw + 2,
        # head_b entry indices
        "hb_ploc": n_ffw, "hb_pscl": 2 * n_ffw, "hb_pred_bias": 3 * n_ffw,
        # fused output slab column layout
        "out_lanes": OUT_LANES, "out_used": out_used,
        "col_phi": 0, "col_logpc": d_in, "col_loc": d_in + K,
        "col_scale": d_in + 2 * K, "col_pred": d_in + 3 * K,
    }
    return params, meta


# ---------------------------------------------------------------------------
# The single fused Pallas kernel for the whole forward hot path.
# ---------------------------------------------------------------------------
def _fused_model_kernel(meta, x_ref, m_ref, sw_ref, sb_ref, hw_ref, hb_ref,
                        out_ref):
    d_in, d_emb, K = meta["d_in"], meta["d_emb"], meta["K"]
    n_emb, n_loc, n_ffw = meta["n_emb"], meta["n_loc"], meta["n_ffw"]
    sw, sb = meta["sw_offs"], meta["sb_offs"]
    hw, hb = meta["hw_offs"], meta["hb_offs"]

    def wslab(ref, offs, i, rows=None):
        r0, r, c = offs[i]
        rr = r if rows is None else rows
        return ref[r0:r0 + rr, 0:c]

    relu = lambda v: jnp.maximum(v, 0.0)
    softplus = lambda v: jnp.maximum(v, 0.0) + jnp.log(1.0 + jnp.exp(-jnp.abs(v)))
    mm = lambda a, b: jnp.dot(a, b, preferred_element_type=jnp.float32)

    x = x_ref[...]
    m = m_ref[...]

    # ---- ShapleyNet: masked embedding -> placeholder blend -> combine -> loc
    h = x
    for i in range(n_emb):
        h = mm(h, wslab(sw_ref, sw, i)) + wslab(sb_ref, sb, i)
        if i < n_emb - 1:
            h = relu(h)
    # expand m (rows, d_in) -> (rows, d_in*d_emb) via packed 0/1 constant matrix
    m_exp = mm(m, wslab(sw_ref, sw, meta["sw_rep"]))
    ph = wslab(sb_ref, sb, meta["sb_placeholder"])      # flattened placeholder
    h = h * m_exp + ph * (1.0 - m_exp)
    h = mm(h, wslab(sw_ref, sw, meta["sw_comb"]))        # combine_loc (bias-free)
    for i in range(n_loc):
        h = mm(h, wslab(sw_ref, sw, meta["sw_loc0"] + i)) \
            + wslab(sb_ref, sb, meta["sb_loc0"] + i)
        if i < n_loc - 1:
            h = relu(h)
    phi = h                                              # (rows, d_in)

    # ---- simplex net + log-softmax over K (explicit small-K column arithmetic
    #      kept on purpose: conservative, known-good lowering at width 3) ----
    h = phi
    for i in range(n_ffw):
        h = mm(h, wslab(hw_ref, hw, i)) + wslab(hb_ref, hb, i)
        if i < n_ffw - 1:
            h = relu(h)
    mx = h[:, 0:1]
    for k in range(1, K):
        mx = jnp.maximum(mx, h[:, k:k + 1])
    sh = h - mx
    den = jnp.exp(sh[:, 0:1])
    for k in range(1, K):
        den = den + jnp.exp(sh[:, k:k + 1])
    logpc = sh - jnp.log(den)
    pc = jnp.exp(logpc)

    # ---- predictive heads (loc + scale fused; first layer split phi/emb so
    #      the (phi, cluster-emb) concat / repeat is never materialized) ----
    emb8 = wslab(hw_ref, hw, meta["hw_pred_emb"], rows=8)   # (8, d_emb), rows>=K are zero
    pred_bias = wslab(hb_ref, hb, meta["hb_pred_bias"])     # (1, 1)
    f_x = phi[:, 0:1]
    for j in range(1, d_in):
        f_x = f_x + phi[:, j:j + 1]
    f_x = f_x + softplus(pred_bias)

    phi_loc = mm(phi, wslab(hw_ref, hw, meta["hw_ploc_phi"]))
    emb_loc = mm(emb8, wslab(hw_ref, hw, meta["hw_ploc_emb"]))
    phi_scl = mm(phi, wslab(hw_ref, hw, meta["hw_pscl_phi"]))
    emb_scl = mm(emb8, wslab(hw_ref, hw, meta["hw_pscl_emb"]))
    b1_loc = wslab(hb_ref, hb, meta["hb_ploc"])
    b1_scl = wslab(hb_ref, hb, meta["hb_pscl"])
    loc_tail = [(wslab(hw_ref, hw, meta["hw_ploc_tail"] + j),
                 wslab(hb_ref, hb, meta["hb_ploc"] + 1 + j))
                for j in range(n_ffw - 1)]
    scl_tail = [(wslab(hw_ref, hw, meta["hw_pscl_tail"] + j),
                 wslab(hb_ref, hb, meta["hb_pscl"] + 1 + j))
                for j in range(n_ffw - 1)]

    def tail(v, layers):
        for j, (w, b) in enumerate(layers):
            v = mm(v, w) + b
            if j < len(layers) - 1:
                v = relu(v)
        return v

    # Accumulate all K loc/scale columns in registers (no per-column masked
    # stores); the one store happens on the fused slab below.
    partial = jnp.zeros_like(f_x)
    loc_cols, scale_cols = [], []
    for k in range(K):
        hs = phi_scl + emb_scl[k:k + 1, :] + b1_scl
        if n_ffw > 1:
            hs = relu(hs)
        scale_cols.append(softplus(tail(hs, scl_tail)) + 1e-10)
        if k < K - 1:        # raw last loc column is overwritten by the model
            hl = phi_loc + emb_loc[k:k + 1, :] + b1_loc
            if n_ffw > 1:
                hl = relu(hl)
            lc = tail(hl, loc_tail)
            loc_cols.append(lc)
            partial = partial + lc * pc[:, k:k + 1]
    # last loc column chosen so that sum_k loc_k * p(c=k|x) == f_x exactly;
    # clamp the (possibly underflowing) last-cluster probability before divide.
    pc_last = jnp.maximum(pc[:, K - 1:K], 1e-10)
    loc_cols.append((f_x - partial) / pc_last)
    # prediction == f_x algebraically; store it directly (no cancellation path)

    # ---- assemble the lane-dense (rows, OUT_LANES) output slab in registers
    #      via one-hot broadcast-multiplies, then ONE unmasked store ----------
    cols = ([phi[:, j:j + 1] for j in range(d_in)]
            + [logpc[:, k:k + 1] for k in range(K)]
            + loc_cols + scale_cols + [f_x])
    sct_r0, _, sct_c = sw[meta["sw_scatter"]]

    def one_hot_row(j):
        return sw_ref[sct_r0 + j:sct_r0 + j + 1, 0:sct_c]   # (1, OUT_LANES)

    slab = cols[0] * one_hot_row(0)
    for j in range(1, meta["out_used"]):
        slab = slab + cols[j] * one_hot_row(j)
    out_ref[...] = slab


def fused_model_call(params, meta, x_all, m_all, row_tile=256):
    """One fused pallas_call producing a lane-dense (rows, 128) output slab.

    Small batches run as a single row block; once the row count passes
    2*row_tile a "parallel" 1-D row grid kicks in so the x/m DMAs pipeline
    with compute and v7x's second TensorCore is used.
    """
    N, d_in = x_all.shape
    if N < 2 * row_tile:
        row_tile = _round_up(N, 8)
    Np = _round_up(N, row_tile)
    x_all = x_all.astype(jnp.float32)
    m_all = m_all.astype(jnp.float32)
    if Np != N:
        x_all = jnp.pad(x_all, ((0, Np - N), (0, 0)))
        m_all = jnp.pad(m_all, ((0, Np - N), (0, 0)), constant_values=1.0)

    kern = functools.partial(_fused_model_kernel, meta)
    row_spec = lambda w: pl.BlockSpec((row_tile, w), lambda i: (i, 0))
    full_spec = lambda a: pl.BlockSpec(a.shape, lambda i: (0, 0))

    out = pl.pallas_call(
        kern,
        grid=(Np // row_tile,),
        in_specs=[row_spec(d_in), row_spec(d_in),
                  full_spec(params["shap_w"]), full_spec(params["shap_b"]),
                  full_spec(params["head_w"]), full_spec(params["head_b"])],
        out_specs=row_spec(meta["out_lanes"]),
        out_shape=jax.ShapeDtypeStruct((Np, meta["out_lanes"]), jnp.float32),
        compiler_params=pltpu.CompilerParams(dimension_semantics=("parallel",)),
    )(x_all, m_all, params["shap_w"], params["shap_b"],
      params["head_w"], params["head_b"])
    return out[:N]


# ---------------------------------------------------------------------------
# Full model forward (losses / sampling glue stay in plain JAX).
# ---------------------------------------------------------------------------
def make_forward(meta, sample_size=1):
    ss = 2 * sample_size
    d_in, K = meta["d_in"], meta["K"]
    c_phi, c_lpc, c_loc, c_scl, c_prd = (meta["col_phi"], meta["col_logpc"],
                                         meta["col_loc"], meta["col_scale"],
                                         meta["col_pred"])

    @jax.jit
    def model_forward(params, key, x, y, c):
        B, _ = x.shape
        # eval-mode missingness indicator: all features observed
        m = jnp.ones((B, d_in), dtype=bool)

        # ---- Shapley coalition sampling (pure JAX: RNG / argsort / gathers) --
        # TODO(synk): sampling, Normal logpdf/cdf and logsumexp glue have no
        # clean Pallas equivalent at this size; left in XLA.  Profile the glue
        # vs. the pallas_call before moving the repeats into the kernel.
        k1, k2 = jax.random.split(key)
        feature_idx_init = jax.random.randint(k1, (B,), 0, d_in)
        feature_idx = jnp.repeat(feature_idx_init, ss, axis=0)[:, None]
        m_rep = jnp.repeat(m, ss, axis=0)
        perm = jnp.argsort(jax.random.uniform(k2, (ss * B, d_in)), axis=-1)
        arange = jnp.arange(d_in)[None, :]
        pos = jnp.argmax((perm == feature_idx).astype(jnp.float32), axis=-1)[:, None]
        pointer = arange <= pos
        inv_perm = jnp.argsort(perm, axis=-1)
        missing1 = jnp.take_along_axis(pointer, inv_perm, axis=1)
        missing2 = jnp.where(arange == feature_idx, False, missing1)
        missing = jnp.concatenate([missing1 & m_rep, missing2 & m_rep], axis=0)
        x_rep = jnp.concatenate([jnp.repeat(x, ss, axis=0)] * 2, axis=0)

        # ---- ONE fused Pallas call: main batch + all Shapley coalitions -----
        x_all = jnp.concatenate([x, x_rep], axis=0)
        m_all = jnp.concatenate([m, missing], axis=0)
        out = fused_model_call(params, meta, x_all, m_all)

        phi = out[:B, c_phi:c_phi + d_in]
        logpc_x = out[:B, c_lpc:c_lpc + K]
        loc2d = out[:B, c_loc:c_loc + K]
        scale2d = out[:B, c_scl:c_scl + K]
        predictions = out[:B, c_prd]
        pred_shap = out[B:, c_prd]

        phi_mean = predictions - predictions.mean() - phi.sum(-1)
        phi_mean = (phi_mean ** 2).mean(0)

        yk, ck = y[:, None], c[:, None]
        logpdf = jax.scipy.stats.norm.logpdf(yk, loc=loc2d, scale=scale2d)
        cdf = jax.scipy.stats.norm.cdf(yk, loc=loc2d, scale=scale2d)
        logjoint = ck * (logpc_x + logpdf) \
            + (1.0 - ck) * (logpc_x + jnp.log(1.0 - cdf + 1e-10))
        lse = jax.scipy.special.logsumexp(logjoint, axis=-1, keepdims=True)
        posterior = jnp.exp(jax.lax.stop_gradient(logjoint - lse))
        q_function = jnp.sum(posterior * logjoint, axis=-1)
        loglikelihood = jax.scipy.special.logsumexp(logjoint, axis=-1)

        half = ss * B
        p1, p2 = pred_shap[:half], pred_shap[half:]
        shapley_loc = (p1 - p2).reshape(B, ss)
        s1 = shapley_loc[:, : ss // 2].mean(-1)
        s2 = shapley_loc[:, ss // 2:].mean(-1)
        phi_sel = jnp.take_along_axis(phi, feature_idx_init[:, None], axis=1)[:, 0]

        beta = jnp.exp(params["beta"])
        delta_red = s2 - phi_sel
        delta_blue = s1 - phi_sel
        proxy_kld = beta * (delta_blue * delta_red) \
            + beta * (delta_blue ** 2 + delta_red ** 2) / 2.0

        loss = jnp.mean(q_function - proxy_kld, axis=0)
        loglikelihood = jnp.mean(loglikelihood, axis=0)
        proxy_kld_m = jnp.mean(proxy_kld, axis=0)
        return loglikelihood, loss, jnp.sqrt(phi_mean), proxy_kld_m

    return model_forward


# ---------------------------------------------------------------------------
if __name__ == "__main__":
    d_in, d_clusters, d_hid, d_emb, n_layers = 4, 3, 32, 8, 3
    B = 8
    key = jax.random.PRNGKey(0)
    kp, kx, ky, kc, kr = jax.random.split(key, 5)

    params, meta = init_model_params(kp, d_in, d_clusters, d_hid, d_emb,
                                     n_layers, beta=1.0)
    forward = make_forward(meta)

    x = jax.random.normal(kx, (B, d_in), jnp.float32)
    y = jax.random.uniform(ky, (B,), jnp.float32, 0.1, 5.0)
    c = (jax.random.uniform(kc, (B,)) > 0.5).astype(jnp.float32)

    out = forward(params, kr, x, y, c)
    jax.block_until_ready(out)
    print("KERNEL_OK")
</pallas_src>

<mosaic_0001>
module attributes {stable_mosaic.version = 11 : i64} {
  func.func @_fused_model_kernel(%arg0: i32, %arg1: memref<40x4xf32, #tpu.memory_space<vmem>>, %arg2: memref<40x4xf32, #tpu.memory_space<vmem>>, %arg3: memref<264x128xf32, #tpu.memory_space<vmem>>, %arg4: memref<48x128xf32, #tpu.memory_space<vmem>>, %arg5: memref<240x32xf32, #tpu.memory_space<vmem>>, %arg6: memref<80x32xf32, #tpu.memory_space<vmem>>, %arg7: memref<40x128xf32, #tpu.memory_space<vmem>>) attributes {dimension_semantics = [#tpu.dimension_semantics<parallel>], iteration_bounds = array<i64: 1>, scalar_prefetch = 0 : i64, scratch_operands = 0 : i64, tpu.core_type = #tpu.core_type<tc>, window_params = [{transform_indices = @transform_0, window_bounds = array<i64: 40, 4>}, {transform_indices = @transform_1, window_bounds = array<i64: 40, 4>}, {pipeline_mode = #tpu.pipeline_mode<synchronous>, transform_indices = @transform_2, window_bounds = array<i64: 264, 128>}, {pipeline_mode = #tpu.pipeline_mode<synchronous>, transform_indices = @transform_3, window_bounds = array<i64: 48, 128>}, {pipeline_mode = #tpu.pipeline_mode<synchronous>, transform_indices = @transform_4, window_bounds = array<i64: 240, 32>}, {pipeline_mode = #tpu.pipeline_mode<synchronous>, transform_indices = @transform_5, window_bounds = array<i64: 80, 32>}, {transform_indices = @transform_6, window_bounds = array<i64: 40, 128>}]} {
    %c0 = arith.constant 0 : index
    %c0_0 = arith.constant 0 : index
    %0 = vector.load %arg1[%c0, %c0_0] : memref<40x4xf32, #tpu.memory_space<vmem>>, vector<40x4xf32>
    %c0_1 = arith.constant 0 : index
    %c0_2 = arith.constant 0 : index
    %1 = vector.load %arg2[%c0_1, %c0_2] : memref<40x4xf32, #tpu.memory_space<vmem>>, vector<40x4xf32>
    %c0_3 = arith.constant 0 : index
    %c0_4 = arith.constant 0 : index
    %2 = vector.load %arg3[%c0_3, %c0_4] : memref<264x128xf32, #tpu.memory_space<vmem>>, vector<4x128xf32>
    %cst = arith.constant dense<0.000000e+00> : vector<40x128xf32>
    %3 = tpu.matmul %0, %2, %cst {dimension_numbers = #tpu.dot_dimension_numbers<[1], [0], [0], [1], [0, 0, 1, 1], [], []>} : vector<40x4xf32>, vector<4x128xf32>, vector<40x128xf32> -> vector<40x128xf32>
    %c0_5 = arith.constant 0 : index
    %c0_6 = arith.constant 0 : index
    %4 = vector.load %arg4[%c0_5, %c0_6] : memref<48x128xf32, #tpu.memory_space<vmem>>, vector<1x128xf32>
    %5 = vector.broadcast %4 : vector<1x128xf32> to vector<40x128xf32>
    %6 = arith.addf %3, %5 : vector<40x128xf32>
    %cst_7 = arith.constant 0.000000e+00 : f32
    %7 = vector.broadcast %cst_7 : f32 to vector<40x128xf32>
    %8 = arith.maximumf %6, %7 : vector<40x128xf32>
    %c8 = arith.constant 8 : index
    %c0_8 = arith.constant 0 : index
    %9 = vector.load %arg3[%c8, %c0_8] : memref<264x128xf32, #tpu.memory_space<vmem>>, vector<128x32xf32>
    %cst_9 = arith.constant dense<0.000000e+00> : vector<40x32xf32>
    %10 = tpu.matmul %8, %9, %cst_9 {dimension_numbers = #tpu.dot_dimension_numbers<[1], [0], [0], [1], [0, 0, 1, 1], [], []>} : vector<40x128xf32>, vector<128x32xf32>, vector<40x32xf32> -> vector<40x32xf32>
    %c8_10 = arith.constant 8 : index
    %c0_11 = arith.constant 0 : index
    %11 = vector.load %arg4[%c8_10, %c0_11] : memref<48x128xf32, #tpu.memory_space<vmem>>, vector<1x32xf32>
    %12 = vector.broadcast %11 : vector<1x32xf32> to vector<40x32xf32>
    %13 = arith.addf %10, %12 : vector<40x32xf32>
    %c240 = arith.constant 240 : index
    %c0_12 = arith.constant 0 : index
    %14 = vector.load %arg3[%c240, %c0_12] : memref<264x128xf32, #tpu.memory_space<vmem>>, vector<4x32xf32>
    %cst_13 = arith.constant dense<0.000000e+00> : vector<40x32xf32>
    %15 = tpu.matmul %1, %14, %cst_13 {dimension_numbers = #tpu.dot_dimension_numbers<[1], [0], [0], [1], [0, 0, 1, 1], [], []>} : vector<40x4xf32>, vector<4x32xf32>, vector<40x32xf32> -> vector<40x32xf32>
    %c16 = arith.constant 16 : index
    %c0_14 = arith.constant 0 : index
    %16 = vector.load %arg4[%c16, %c0_14] : memref<48x128xf32, #tpu.memory_space<vmem>>, vector<1x32xf32>
    %17 = arith.mulf %13, %15 : vector<40x32xf32>
    %cst_15 = arith.constant 1.000000e+00 : f32
    %18 = vector.broadcast %cst_15 : f32 to vector<40x32xf32>
    %19 = arith.subf %18, %15 : vector<40x32xf32>
    %20 = vector.broadcast %16 : vector<1x32xf32> to vector<40x32xf32>
    %21 = arith.mulf %20, %19 : vector<40x32xf32>
    %22 = arith.addf %17, %21 : vector<40x32xf32>
    %c136 = arith.constant 136 : index
    %c0_16 = arith.constant 0 : index
    %23 = vector.load %arg3[%c136, %c0_16] : memref<264x128xf32, #tpu.memory_space<vmem>>, vector<32x8xf32>
    %cst_17 = arith.constant dense<0.000000e+00> : vector<40x8xf32>
    %24 = tpu.matmul %22, %23, %cst_17 {dimension_numbers = #tpu.dot_dimension_numbers<[1], [0], [0], [1], [0, 0, 1, 1], [], []>} : vector<40x32xf32>, vector<32x8xf32>, vector<40x8xf32> -> vector<40x8xf32>
    %c168 = arith.constant 168 : index
    %c0_18 = arith.constant 0 : index
    %25 = vector.load %arg3[%c168, %c0_18] : memref<264x128xf32, #tpu.memory_space<vmem>>, vector<8x32xf32>
    %cst_19 = arith.constant dense<0.000000e+00> : vector<40x32xf32>
    %26 = tpu.matmul %24, %25, %cst_19 {dimension_numbers = #tpu.dot_dimension_numbers<[1], [0], [0], [1], [0, 0, 1, 1], [], []>} : vector<40x8xf32>, vector<8x32xf32>, vector<40x32xf32> -> vector<40x32xf32>
    %c24 = arith.constant 24 : index
    %c0_20 = arith.constant 0 : index
    %27 = vector.load %arg4[%c24, %c0_20] : memref<48x128xf32, #tpu.memory_space<vmem>>, vector<1x32xf32>
    %28 = vector.broadcast %27 : vector<1x32xf32> to vector<40x32xf32>
    %29 = arith.addf %26, %28 : vector<40x32xf32>
    %cst_21 = arith.constant 0.000000e+00 : f32
    %30 = vector.broadcast %cst_21 : f32 to vector<40x32xf32>
    %31 = arith.maximumf %29, %30 : vector<40x32xf32>
    %c176 = arith.constant 176 : index
    %c0_22 = arith.constant 0 : index
    %32 = vector.load %arg3[%c176, %c0_22] : memref<264x128xf32, #tpu.memory_space<vmem>>, vector<32x32xf32>
    %cst_23 = arith.constant dense<0.000000e+00> : vector<40x32xf32>
    %33 = tpu.matmul %31, %32, %cst_23 {dimension_numbers = #tpu.dot_dimension_numbers<[1], [0], [0], [1], [0, 0, 1, 1], [], []>} : vector<40x32xf32>, vector<32x32xf32>, vector<40x32xf32> -> vector<40x32xf32>
    %c32 = arith.constant 32 : index
    %c0_24 = arith.constant 0 : index
    %34 = vector.load %arg4[%c32, %c0_24] : memref<48x128xf32, #tpu.memory_space<vmem>>, vector<1x32xf32>
    %35 = vector.broadcast %34 : vector<1x32xf32> to vector<40x32xf32>
    %36 = arith.addf %33, %35 : vector<40x32xf32>
    %cst_25 = arith.constant 0.000000e+00 : f32
    %37 = vector.broadcast %cst_25 : f32 to vector<40x32xf32>
    %38 = arith.maximumf %36, %37 : vector<40x32xf32>
    %c208 = arith.constant 208 : index
    %c0_26 = arith.constant 0 : index
    %39 = vector.load %arg3[%c208, %c0_26] : memref<264x128xf32, #tpu.memory_space<vmem>>, vector<32x4xf32>
    %cst_27 = arith.constant dense<0.000000e+00> : vector<40x4xf32>
    %40 = tpu.matmul %38, %39, %cst_27 {dimension_numbers = #tpu.dot_dimension_numbers<[1], [0], [0], [1], [0, 0, 1, 1], [], []>} : vector<40x32xf32>, vector<32x4xf32>, vector<40x4xf32> -> vector<40x4xf32>
    %c40 = arith.constant 40 : index
    %c0_28 = arith.constant 0 : index
    %41 = vector.load %arg4[%c40, %c0_28] : memref<48x128xf32, #tpu.memory_space<vmem>>, vector<1x4xf32>
    %42 = vector.broadcast %41 : vector<1x4xf32> to vector<40x4xf32>
    %43 = arith.addf %40, %42 : vector<40x4xf32>
    %c0_29 = arith.constant 0 : index
    %c0_30 = arith.constant 0 : index
    %44 = vector.load %arg5[%c0_29, %c0_30] : memref<240x32xf32, #tpu.memory_space<vmem>>, vector<4x32xf32>
    %cst_31 = arith.constant dense<0.000000e+00> : vector<40x32xf32>
    %45 = tpu.matmul %43, %44, %cst_31 {dimension_numbers = #tpu.dot_dimension_numbers<[1], [0], [0], [1], [0, 0, 1, 1], [], []>} : vector<40x4xf32>, vector<4x32xf32>, vector<40x32xf32> -> vector<40x32xf32>
    %c0_32 = arith.constant 0 : index
    %c0_33 = arith.constant 0 : index
    %46 = vector.load %arg6[%c0_32, %c0_33] : memref<80x32xf32, #tpu.memory_space<vmem>>, vector<1x32xf32>
    %47 = vector.broadcast %46 : vector<1x32xf32> to vector<40x32xf32>
    %48 = arith.addf %45, %47 : vector<40x32xf32>
    %cst_34 = arith.constant 0.000000e+00 : f32
    %49 = vector.broadcast %cst_34 : f32 to vector<40x32xf32>
    %50 = arith.maximumf %48, %49 : vector<40x32xf32>
    %c8_35 = arith.constant 8 : index
    %c0_36 = arith.constant 0 : index
    %51 = vector.load %arg5[%c8_35, %c0_36] : memref<240x32xf32, #tpu.memory_space<vmem>>, vector<32x32xf32>
    %cst_37 = arith.constant dense<0.000000e+00> : vector<40x32xf32>
    %52 = tpu.matmul %50, %51, %cst_37 {dimension_numbers = #tpu.dot_dimension_numbers<[1], [0], [0], [1], [0, 0, 1, 1], [], []>} : vector<40x32xf32>, vector<32x32xf32>, vector<40x32xf32> -> vector<40x32xf32>
    %c8_38 = arith.constant 8 : index
    %c0_39 = arith.constant 0 : index
    %53 = vector.load %arg6[%c8_38, %c0_39] : memref<80x32xf32, #tpu.memory_space<vmem>>, vector<1x32xf32>
    %54 = vector.broadcast %53 : vector<1x32xf32> to vector<40x32xf32>
    %55 = arith.addf %52, %54 : vector<40x32xf32>
    %cst_40 = arith.constant 0.000000e+00 : f32
    %56 = vector.broadcast %cst_40 : f32 to vector<40x32xf32>
    %57 = arith.maximumf %55, %56 : vector<40x32xf32>
    %c40_41 = arith.constant 40 : index
    %c0_42 = arith.constant 0 : index
    %58 = vector.load %arg5[%c40_41, %c0_42] : memref<240x32xf32, #tpu.memory_space<vmem>>, vector<32x3xf32>
    %cst_43 = arith.constant dense<0.000000e+00> : vector<40x3xf32>
    %59 = tpu.matmul %57, %58, %cst_43 {dimension_numbers = #tpu.dot_dimension_numbers<[1], [0], [0], [1], [0, 0, 1, 1], [], []>} : vector<40x32xf32>, vector<32x3xf32>, vector<40x3xf32> -> vector<40x3xf32>
    %c16_44 = arith.constant 16 : index
    %c0_45 = arith.constant 0 : index
    %60 = vector.load %arg6[%c16_44, %c0_45] : memref<80x32xf32, #tpu.memory_space<vmem>>, vector<1x3xf32>
    %61 = vector.broadcast %60 : vector<1x3xf32> to vector<40x3xf32>
    %62 = arith.addf %59, %61 : vector<40x3xf32>
    %63 = vector.extract_strided_slice %62 {offsets = [0, 0], sizes = [40, 1], strides = [1, 1]} : vector<40x3xf32> to vector<40x1xf32>
    %64 = vector.extract_strided_slice %62 {offsets = [0, 1], sizes = [40, 1], strides = [1, 1]} : vector<40x3xf32> to vector<40x1xf32>
    %65 = arith.maximumf %63, %64 : vector<40x1xf32>
    %66 = vector.extract_strided_slice %62 {offsets = [0, 2], sizes = [40, 1], strides = [1, 1]} : vector<40x3xf32> to vector<40x1xf32>
    %67 = arith.maximumf %65, %66 : vector<40x1xf32>
    %68 = vector.broadcast %67 : vector<40x1xf32> to vector<40x3xf32>
    %69 = arith.subf %62, %68 : vector<40x3xf32>
    %70 = vector.extract_strided_slice %69 {offsets = [0, 0], sizes = [40, 1], strides = [1, 1]} : vector<40x3xf32> to vector<40x1xf32>
    %71 = math.exp %70 : vector<40x1xf32>
    %72 = vector.extract_strided_slice %69 {offsets = [0, 1], sizes = [40, 1], strides = [1, 1]} : vector<40x3xf32> to vector<40x1xf32>
    %73 = math.exp %72 : vector<40x1xf32>
    %74 = arith.addf %71, %73 : vector<40x1xf32>
    %75 = vector.extract_strided_slice %69 {offsets = [0, 2], sizes = [40, 1], strides = [1, 1]} : vector<40x3xf32> to vector<40x1xf32>
    %76 = math.exp %75 : vector<40x1xf32>
    %77 = arith.addf %74, %76 : vector<40x1xf32>
    %78 = math.log %77 : vector<40x1xf32>
    %79 = vector.broadcast %78 : vector<40x1xf32> to vector<40x3xf32>
    %80 = arith.subf %69, %79 : vector<40x3xf32>
    %81 = math.exp %80 : vector<40x3xf32>
    %c232 = arith.constant 232 : index
    %c0_46 = arith.constant 0 : index
    %82 = vector.load %arg5[%c232, %c0_46] : memref<240x32xf32, #tpu.memory_space<vmem>>, vector<8x8xf32>
    %c72 = arith.constant 72 : index
    %c0_47 = arith.constant 0 : index
    %83 = vector.load %arg6[%c72, %c0_47] : memref<80x32xf32, #tpu.memory_space<vmem>>, vector<1x1xf32>
    %84 = vector.extract_strided_slice %43 {offsets = [0, 0], sizes = [40, 1], strides = [1, 1]} : vector<40x4xf32> to vector<40x1xf32>
    %85 = vector.extract_strided_slice %43 {offsets = [0, 1], sizes = [40, 1], strides = [1, 1]} : vector<40x4xf32> to vector<40x1xf32>
    %86 = arith.addf %84, %85 : vector<40x1xf32>
    %87 = vector.extract_strided_slice %43 {offsets = [0, 2], sizes = [40, 1], strides = [1, 1]} : vector<40x4xf32> to vector<40x1xf32>
    %88 = arith.addf %86, %87 : vector<40x1xf32>
    %89 = vector.extract_strided_slice %43 {offsets = [0, 3], sizes = [40, 1], strides = [1, 1]} : vector<40x4xf32> to vector<40x1xf32>
    %90 = arith.addf %88, %89 : vector<40x1xf32>
    %cst_48 = arith.constant 0.000000e+00 : f32
    %91 = vector.broadcast %cst_48 : f32 to vector<1x1xf32>
    %92 = arith.maximumf %83, %91 : vector<1x1xf32>
    %93 = math.absf %83 : vector<1x1xf32>
    %cst_49 = arith.constant 0.000000e+00 : f32
    %94 = vector.broadcast %cst_49 : f32 to vector<1x1xf32>
    %95 = arith.subf %94, %93 : vector<1x1xf32>
    %96 = math.exp %95 : vector<1x1xf32>
    %cst_50 = arith.constant 1.000000e+00 : f32
    %97 = vector.broadcast %cst_50 : f32 to vector<1x1xf32>
    %98 = arith.addf %97, %96 : vector<1x1xf32>
    %99 = math.log %98 : vector<1x1xf32>
    %100 = arith.addf %92, %99 : vector<1x1xf32>
    %101 = vector.broadcast %100 : vector<1x1xf32> to vector<40x1xf32>
    %102 = arith.addf %90, %101 : vector<40x1xf32>
    %c72_51 = arith.constant 72 : index
    %c0_52 = arith.constant 0 : index
    %103 = vector.load %arg5[%c72_51, %c0_52] : memref<240x32xf32, #tpu.memory_space<vmem>>, vector<4x32xf32>
    %cst_53 = arith.constant dense<0.000000e+00> : vector<40x32xf32>
    %104 = tpu.matmul %43, %103, %cst_53 {dimension_numbers = #tpu.dot_dimension_numbers<[1], [0], [0], [1], [0, 0, 1, 1], [], []>} : vector<40x4xf32>, vector<4x32xf32>, vector<40x32xf32> -> vector<40x32xf32>
    %c80 = arith.constant 80 : index
    %c0_54 = arith.constant 0 : index
    %105 = vector.load %arg5[%c80, %c0_54] : memref<240x32xf32, #tpu.memory_space<vmem>>, vector<8x32xf32>
    %cst_55 = arith.constant dense<0.000000e+00> : vector<8x32xf32>
    %106 = tpu.matmul %82, %105, %cst_55 {dimension_numbers = #tpu.dot_dimension_numbers<[1], [0], [0], [1], [0, 0, 1, 1], [], []>} : vector<8x8xf32>, vector<8x32xf32>, vector<8x32xf32> -> vector<8x32xf32>
    %c152 = arith.constant 152 : index
    %c0_56 = arith.constant 0 : index
    %107 = vector.load %arg5[%c152, %c0_56] : memref<240x32xf32, #tpu.memory_space<vmem>>, vector<4x32xf32>
    %cst_57 = arith.constant dense<0.000000e+00> : vector<40x32xf32>
    %108 = tpu.matmul %43, %107, %cst_57 {dimension_numbers = #tpu.dot_dimension_numbers<[1], [0], [0], [1], [0, 0, 1, 1], [], []>} : vector<40x4xf32>, vector<4x32xf32>, vector<40x32xf32> -> vector<40x32xf32>
    %c160 = arith.constant 160 : index
    %c0_58 = arith.constant 0 : index
    %109 = vector.load %arg5[%c160, %c0_58] : memref<240x32xf32, #tpu.memory_space<vmem>>, vector<8x32xf32>
    %cst_59 = arith.constant dense<0.000000e+00> : vector<8x32xf32>
    %110 = tpu.matmul %82, %109, %cst_59 {dimension_numbers = #tpu.dot_dimension_numbers<[1], [0], [0], [1], [0, 0, 1, 1], [], []>} : vector<8x8xf32>, vector<8x32xf32>, vector<8x32xf32> -> vector<8x32xf32>
    %c24_60 = arith.constant 24 : index
    %c0_61 = arith.constant 0 : index
    %111 = vector.load %arg6[%c24_60, %c0_61] : memref<80x32xf32, #tpu.memory_space<vmem>>, vector<1x32xf32>
    %c48 = arith.constant 48 : index
    %c0_62 = arith.constant 0 : index
    %112 = vector.load %arg6[%c48, %c0_62] : memref<80x32xf32, #tpu.memory_space<vmem>>, vector<1x32xf32>
    %c88 = arith.constant 88 : index
    %c0_63 = arith.constant 0 : index
    %113 = vector.load %arg5[%c88, %c0_63] : memref<240x32xf32, #tpu.memory_space<vmem>>, vector<32x32xf32>
    %c32_64 = arith.constant 32 : index
    %c0_65 = arith.constant 0 : index
    %114 = vector.load %arg6[%c32_64, %c0_65] : memref<80x32xf32, #tpu.memory_space<vmem>>, vector<1x32xf32>
    %c120 = arith.constant 120 : index
    %c0_66 = arith.constant 0 : index
    %115 = vector.load %arg5[%c120, %c0_66] : memref<240x32xf32, #tpu.memory_space<vmem>>, vector<32x1xf32>
    %c40_67 = arith.constant 40 : index
    %c0_68 = arith.constant 0 : index
    %116 = vector.load %arg6[%c40_67, %c0_68] : memref<80x32xf32, #tpu.memory_space<vmem>>, vector<1x1xf32>
    %c168_69 = arith.constant 168 : index
    %c0_70 = arith.constant 0 : index
    %117 = vector.load %arg5[%c168_69, %c0_70] : memref<240x32xf32, #tpu.memory_space<vmem>>, vector<32x32xf32>
    %c56 = arith.constant 56 : index
    %c0_71 = arith.constant 0 : index
    %118 = vector.load %arg6[%c56, %c0_71] : memref<80x32xf32, #tpu.memory_space<vmem>>, vector<1x32xf32>
    %c200 = arith.constant 200 : index
    %c0_72 = arith.constant 0 : index
    %119 = vector.load %arg5[%c200, %c0_72] : memref<240x32xf32, #tpu.memory_space<vmem>>, vector<32x1xf32>
    %c64 = arith.constant 64 : index
    %c0_73 = arith.constant 0 : index
    %120 = vector.load %arg6[%c64, %c0_73] : memref<80x32xf32, #tpu.memory_space<vmem>>, vector<1x1xf32>
    %cst_74 = arith.constant 0.000000e+00 : f32
    %121 = vector.broadcast %cst_74 : f32 to vector<40x1xf32>
    %122 = vector.extract_strided_slice %110 {offsets = [0, 0], sizes = [1, 32], strides = [1, 1]} : vector<8x32xf32> to vector<1x32xf32>
    %123 = vector.broadcast %122 : vector<1x32xf32> to vector<40x32xf32>
    %124 = arith.addf %108, %123 : vector<40x32xf32>
    %125 = vector.broadcast %112 : vector<1x32xf32> to vector<40x32xf32>
    %126 = arith.addf %124, %125 : vector<40x32xf32>
    %cst_75 = arith.constant 0.000000e+00 : f32
    %127 = vector.broadcast %cst_75 : f32 to vector<40x32xf32>
    %128 = arith.maximumf %126, %127 : vector<40x32xf32>
    %cst_76 = arith.constant dense<0.000000e+00> : vector<40x32xf32>
    %129 = tpu.matmul %128, %117, %cst_76 {dimension_numbers = #tpu.dot_dimension_numbers<[1], [0], [0], [1], [0, 0, 1, 1], [], []>} : vector<40x32xf32>, vector<32x32xf32>, vector<40x32xf32> -> vector<40x32xf32>
    %130 = vector.broadcast %118 : vector<1x32xf32> to vector<40x32xf32>
    %131 = arith.addf %129, %130 : vector<40x32xf32>
    %cst_77 = arith.constant 0.000000e+00 : f32
    %132 = vector.broadcast %cst_77 : f32 to vector<40x32xf32>
    %133 = arith.maximumf %131, %132 : vector<40x32xf32>
    %cst_78 = arith.constant dense<0.000000e+00> : vector<40x1xf32>
    %134 = tpu.matmul %133, %119, %cst_78 {dimension_numbers = #tpu.dot_dimension_numbers<[1], [0], [0], [1], [0, 0, 1, 1], [], []>} : vector<40x32xf32>, vector<32x1xf32>, vector<40x1xf32> -> vector<40x1xf32>
    %135 = vector.broadcast %120 : vector<1x1xf32> to vector<40x1xf32>
    %136 = arith.addf %134, %135 : vector<40x1xf32>
    %cst_79 = arith.constant 0.000000e+00 : f32
    %137 = vector.broadcast %cst_79 : f32 to vector<40x1xf32>
    %138 = arith.maximumf %136, %137 : vector<40x1xf32>
    %139 = math.absf %136 : vector<40x1xf32>
    %cst_80 = arith.constant 0.000000e+00 : f32
    %140 = vector.broadcast %cst_80 : f32 to vector<40x1xf32>
    %141 = arith.subf %140, %139 : vector<40x1xf32>
    %142 = math.exp %141 : vector<40x1xf32>
    %cst_81 = arith.constant 1.000000e+00 : f32
    %143 = vector.broadcast %cst_81 : f32 to vector<40x1xf32>
    %144 = arith.addf %143, %142 : vector<40x1xf32>
    %145 = math.log %144 : vector<40x1xf32>
    %146 = arith.addf %138, %145 : vector<40x1xf32>
    %cst_82 = arith.constant 1.000000e-10 : f32
    %147 = vector.broadcast %cst_82 : f32 to vector<40x1xf32>
    %148 = arith.addf %146, %147 : vector<40x1xf32>
    %149 = vector.extract_strided_slice %106 {offsets = [0, 0], sizes = [1, 32], strides = [1, 1]} : vector<8x32xf32> to vector<1x32xf32>
    %150 = vector.broadcast %149 : vector<1x32xf32> to vector<40x32xf32>
    %151 = arith.addf %104, %150 : vector<40x32xf32>
    %152 = vector.broadcast %111 : vector<1x32xf32> to vector<40x32xf32>
    %153 = arith.addf %151, %152 : vector<40x32xf32>
    %cst_83 = arith.constant 0.000000e+00 : f32
    %154 = vector.broadcast %cst_83 : f32 to vector<40x32xf32>
    %155 = arith.maximumf %153, %154 : vector<40x32xf32>
    %cst_84 = arith.constant dense<0.000000e+00> : vector<40x32xf32>
    %156 = tpu.matmul %155, %113, %cst_84 {dimension_numbers = #tpu.dot_dimension_numbers<[1], [0], [0], [1], [0, 0, 1, 1], [], []>} : vector<40x32xf32>, vector<32x32xf32>, vector<40x32xf32> -> vector<40x32xf32>
    %157 = vector.broadcast %114 : vector<1x32xf32> to vector<40x32xf32>
    %158 = arith.addf %156, %157 : vector<40x32xf32>
    %cst_85 = arith.constant 0.000000e+00 : f32
    %159 = vector.broadcast %cst_85 : f32 to vector<40x32xf32>
    %160 = arith.maximumf %158, %159 : vector<40x32xf32>
    %cst_86 = arith.constant dense<0.000000e+00> : vector<40x1xf32>
    %161 = tpu.matmul %160, %115, %cst_86 {dimension_numbers = #tpu.dot_dimension_numbers<[1], [0], [0], [1], [0, 0, 1, 1], [], []>} : vector<40x32xf32>, vector<32x1xf32>, vector<40x1xf32> -> vector<40x1xf32>
    %162 = vector.broadcast %116 : vector<1x1xf32> to vector<40x1xf32>
    %163 = arith.addf %161, %162 : vector<40x1xf32>
    %164 = vector.extract_strided_slice %81 {offsets = [0, 0], sizes = [40, 1], strides = [1, 1]} : vector<40x3xf32> to vector<40x1xf32>
    %165 = arith.mulf %163, %164 : vector<40x1xf32>
    %166 = arith.addf %121, %165 : vector<40x1xf32>
    %167 = vector.extract_strided_slice %110 {offsets = [1, 0], sizes = [1, 32], strides = [1, 1]} : vector<8x32xf32> to vector<1x32xf32>
    %168 = vector.broadcast %167 : vector<1x32xf32> to vector<40x32xf32>
    %169 = arith.addf %108, %168 : vector<40x32xf32>
    %170 = vector.broadcast %112 : vector<1x32xf32> to vector<40x32xf32>
    %171 = arith.addf %169, %170 : vector<40x32xf32>
    %cst_87 = arith.constant 0.000000e+00 : f32
    %172 = vector.broadcast %cst_87 : f32 to vector<40x32xf32>
    %173 = arith.maximumf %171, %172 : vector<40x32xf32>
    %cst_88 = arith.constant dense<0.000000e+00> : vector<40x32xf32>
    %174 = tpu.matmul %173, %117, %cst_88 {dimension_numbers = #tpu.dot_dimension_numbers<[1], [0], [0], [1], [0, 0, 1, 1], [], []>} : vector<40x32xf32>, vector<32x32xf32>, vector<40x32xf32> -> vector<40x32xf32>
    %175 = vector.broadcast %118 : vector<1x32xf32> to vector<40x32xf32>
    %176 = arith.addf %174, %175 : vector<40x32xf32>
    %cst_89 = arith.constant 0.000000e+00 : f32
    %177 = vector.broadcast %cst_89 : f32 to vector<40x32xf32>
    %178 = arith.maximumf %176, %177 : vector<40x32xf32>
    %cst_90 = arith.constant dense<0.000000e+00> : vector<40x1xf32>
    %179 = tpu.matmul %178, %119, %cst_90 {dimension_numbers = #tpu.dot_dimension_numbers<[1], [0], [0], [1], [0, 0, 1, 1], [], []>} : vector<40x32xf32>, vector<32x1xf32>, vector<40x1xf32> -> vector<40x1xf32>
    %180 = vector.broadcast %120 : vector<1x1xf32> to vector<40x1xf32>
    %181 = arith.addf %179, %180 : vector<40x1xf32>
    %cst_91 = arith.constant 0.000000e+00 : f32
    %182 = vector.broadcast %cst_91 : f32 to vector<40x1xf32>
    %183 = arith.maximumf %181, %182 : vector<40x1xf32>
    %184 = math.absf %181 : vector<40x1xf32>
    %cst_92 = arith.constant 0.000000e+00 : f32
    %185 = vector.broadcast %cst_92 : f32 to vector<40x1xf32>
    %186 = arith.subf %185, %184 : vector<40x1xf32>
    %187 = math.exp %186 : vector<40x1xf32>
    %cst_93 = arith.constant 1.000000e+00 : f32
    %188 = vector.broadcast %cst_93 : f32 to vector<40x1xf32>
    %189 = arith.addf %188, %187 : vector<40x1xf32>
    %190 = math.log %189 : vector<40x1xf32>
    %191 = arith.addf %183, %190 : vector<40x1xf32>
    %cst_94 = arith.constant 1.000000e-10 : f32
    %192 = vector.broadcast %cst_94 : f32 to vector<40x1xf32>
    %193 = arith.addf %191, %192 : vector<40x1xf32>
    %194 = vector.extract_strided_slice %106 {offsets = [1, 0], sizes = [1, 32], strides = [1, 1]} : vector<8x32xf32> to vector<1x32xf32>
    %195 = vector.broadcast %194 : vector<1x32xf32> to vector<40x32xf32>
    %196 = arith.addf %104, %195 : vector<40x32xf32>
    %197 = vector.broadcast %111 : vector<1x32xf32> to vector<40x32xf32>
    %198 = arith.addf %196, %197 : vector<40x32xf32>
    %cst_95 = arith.constant 0.000000e+00 : f32
    %199 = vector.broadcast %cst_95 : f32 to vector<40x32xf32>
    %200 = arith.maximumf %198, %199 : vector<40x32xf32>
    %cst_96 = arith.constant dense<0.000000e+00> : vector<40x32xf32>
    %201 = tpu.matmul %200, %113, %cst_96 {dimension_numbers = #tpu.dot_dimension_numbers<[1], [0], [0], [1], [0, 0, 1, 1], [], []>} : vector<40x32xf32>, vector<32x32xf32>, vector<40x32xf32> -> vector<40x32xf32>
    %202 = vector.broadcast %114 : vector<1x32xf32> to vector<40x32xf32>
    %203 = arith.addf %201, %202 : vector<40x32xf32>
    %cst_97 = arith.constant 0.000000e+00 : f32
    %204 = vector.broadcast %cst_97 : f32 to vector<40x32xf32>
    %205 = arith.maximumf %203, %204 : vector<40x32xf32>
    %cst_98 = arith.constant dense<0.000000e+00> : vector<40x1xf32>
    %206 = tpu.matmul %205, %115, %cst_98 {dimension_numbers = #tpu.dot_dimension_numbers<[1], [0], [0], [1], [0, 0, 1, 1], [], []>} : vector<40x32xf32>, vector<32x1xf32>, vector<40x1xf32> -> vector<40x1xf32>
    %207 = vector.broadcast %116 : vector<1x1xf32> to vector<40x1xf32>
    %208 = arith.addf %206, %207 : vector<40x1xf32>
    %209 = vector.extract_strided_slice %81 {offsets = [0, 1], sizes = [40, 1], strides = [1, 1]} : vector<40x3xf32> to vector<40x1xf32>
    %210 = arith.mulf %208, %209 : vector<40x1xf32>
    %211 = arith.addf %166, %210 : vector<40x1xf32>
    %212 = vector.extract_strided_slice %110 {offsets = [2, 0], sizes = [1, 32], strides = [1, 1]} : vector<8x32xf32> to vector<1x32xf32>
    %213 = vector.broadcast %212 : vector<1x32xf32> to vector<40x32xf32>
    %214 = arith.addf %108, %213 : vector<40x32xf32>
    %215 = vector.broadcast %112 : vector<1x32xf32> to vector<40x32xf32>
    %216 = arith.addf %214, %215 : vector<40x32xf32>
    %cst_99 = arith.constant 0.000000e+00 : f32
    %217 = vector.broadcast %cst_99 : f32 to vector<40x32xf32>
    %218 = arith.maximumf %216, %217 : vector<40x32xf32>
    %cst_100 = arith.constant dense<0.000000e+00> : vector<40x32xf32>
    %219 = tpu.matmul %218, %117, %cst_100 {dimension_numbers = #tpu.dot_dimension_numbers<[1], [0], [0], [1], [0, 0, 1, 1], [], []>} : vector<40x32xf32>, vector<32x32xf32>, vector<40x32xf32> -> vector<40x32xf32>
    %220 = vector.broadcast %118 : vector<1x32xf32> to vector<40x32xf32>
    %221 = arith.addf %219, %220 : vector<40x32xf32>
    %cst_101 = arith.constant 0.000000e+00 : f32
    %222 = vector.broadcast %cst_101 : f32 to vector<40x32xf32>
    %223 = arith.maximumf %221, %222 : vector<40x32xf32>
    %cst_102 = arith.constant dense<0.000000e+00> : vector<40x1xf32>
    %224 = tpu.matmul %223, %119, %cst_102 {dimension_numbers = #tpu.dot_dimension_numbers<[1], [0], [0], [1], [0, 0, 1, 1], [], []>} : vector<40x32xf32>, vector<32x1xf32>, vector<40x1xf32> -> vector<40x1xf32>
    %225 = vector.broadcast %120 : vector<1x1xf32> to vector<40x1xf32>
    %226 = arith.addf %224, %225 : vector<40x1xf32>
    %cst_103 = arith.constant 0.000000e+00 : f32
    %227 = vector.broadcast %cst_103 : f32 to vector<40x1xf32>
    %228 = arith.maximumf %226, %227 : vector<40x1xf32>
    %229 = math.absf %226 : vector<40x1xf32>
    %cst_104 = arith.constant 0.000000e+00 : f32
    %230 = vector.broadcast %cst_104 : f32 to vector<40x1xf32>
    %231 = arith.subf %230, %229 : vector<40x1xf32>
    %232 = math.exp %231 : vector<40x1xf32>
    %cst_105 = arith.constant 1.000000e+00 : f32
    %233 = vector.broadcast %cst_105 : f32 to vector<40x1xf32>
    %234 = arith.addf %233, %232 : vector<40x1xf32>
    %235 = math.log %234 : vector<40x1xf32>
    %236 = arith.addf %228, %235 : vector<40x1xf32>
    %cst_106 = arith.constant 1.000000e-10 : f32
    %237 = vector.broadcast %cst_106 : f32 to vector<40x1xf32>
    %238 = arith.addf %236, %237 : vector<40x1xf32>
    %239 = vector.extract_strided_slice %81 {offsets = [0, 2], sizes = [40, 1], strides = [1, 1]} : vector<40x3xf32> to vector<40x1xf32>
    %cst_107 = arith.constant 1.000000e-10 : f32
    %240 = vector.broadcast %cst_107 : f32 to vector<40x1xf32>
    %241 = arith.maximumf %239, %240 : vector<40x1xf32>
    %242 = arith.subf %102, %211 : vector<40x1xf32>
    %243 = arith.divf %242, %241 : vector<40x1xf32>
    %244 = vector.extract_strided_slice %43 {offsets = [0, 0], sizes = [40, 1], strides = [1, 1]} : vector<40x4xf32> to vector<40x1xf32>
    %245 = vector.extract_strided_slice %43 {offsets = [0, 1], sizes = [40, 1], strides = [1, 1]} : vector<40x4xf32> to vector<40x1xf32>
    %246 = vector.extract_strided_slice %43 {offsets = [0, 2], sizes = [40, 1], strides = [1, 1]} : vector<40x4xf32> to vector<40x1xf32>
    %247 = vector.extract_strided_slice %43 {offsets = [0, 3], sizes = [40, 1], strides = [1, 1]} : vector<40x4xf32> to vector<40x1xf32>
    %248 = vector.extract_strided_slice %80 {offsets = [0, 0], sizes = [40, 1], strides = [1, 1]} : vector<40x3xf32> to vector<40x1xf32>
    %249 = vector.extract_strided_slice %80 {offsets = [0, 1], sizes = [40, 1], strides = [1, 1]} : vector<40x3xf32> to vector<40x1xf32>
    %250 = vector.extract_strided_slice %80 {offsets = [0, 2], sizes = [40, 1], strides = [1, 1]} : vector<40x3xf32> to vector<40x1xf32>
    %c248 = arith.constant 248 : index
    %c0_108 = arith.constant 0 : index
    %251 = vector.load %arg3[%c248, %c0_108] : memref<264x128xf32, #tpu.memory_space<vmem>>, vector<1x128xf32>
    %252 = vector.broadcast %244 : vector<40x1xf32> to vector<40x128xf32>
    %253 = vector.broadcast %251 : vector<1x128xf32> to vector<40x128xf32>
    %254 = arith.mulf %252, %253 : vector<40x128xf32>
    %c249 = arith.constant 249 : index
    %c0_109 = arith.constant 0 : index
    %255 = vector.load %arg3[%c249, %c0_109] : memref<264x128xf32, #tpu.memory_space<vmem>>, vector<1x128xf32>
    %256 = vector.broadcast %245 : vector<40x1xf32> to vector<40x128xf32>
    %257 = vector.broadcast %255 : vector<1x128xf32> to vector<40x128xf32>
    %258 = arith.mulf %256, %257 : vector<40x128xf32>
    %259 = arith.addf %254, %258 : vector<40x128xf32>
    %c250 = arith.constant 250 : index
    %c0_110 = arith.constant 0 : index
    %260 = vector.load %arg3[%c250, %c0_110] : memref<264x128xf32, #tpu.memory_space<vmem>>, vector<1x128xf32>
    %261 = vector.broadcast %246 : vector<40x1xf32> to vector<40x128xf32>
    %262 = vector.broadcast %260 : vector<1x128xf32> to vector<40x128xf32>
    %263 = arith.mulf %261, %262 : vector<40x128xf32>
    %264 = arith.addf %259, %263 : vector<40x128xf32>
    %c251 = arith.constant 251 : index
    %c0_111 = arith.constant 0 : index
    %265 = vector.load %arg3[%c251, %c0_111] : memref<264x128xf32, #tpu.memory_space<vmem>>, vector<1x128xf32>
    %266 = vector.broadcast %247 : vector<40x1xf32> to vector<40x128xf32>
    %267 = vector.broadcast %265 : vector<1x128xf32> to vector<40x128xf32>
    %268 = arith.mulf %266, %267 : vector<40x128xf32>
    %269 = arith.addf %264, %268 : vector<40x128xf32>
    %c252 = arith.constant 252 : index
    %c0_112 = arith.constant 0 : index
    %270 = vector.load %arg3[%c252, %c0_112] : memref<264x128xf32, #tpu.memory_space<vmem>>, vector<1x128xf32>
    %271 = vector.broadcast %248 : vector<40x1xf32> to vector<40x128xf32>
    %272 = vector.broadcast %270 : vector<1x128xf32> to vector<40x128xf32>
    %273 = arith.mulf %271, %272 : vector<40x128xf32>
    %274 = arith.addf %269, %273 : vector<40x128xf32>
    %c253 = arith.constant 253 : index
    %c0_113 = arith.constant 0 : index
    %275 = vector.load %arg3[%c253, %c0_113] : memref<264x128xf32, #tpu.memory_space<vmem>>, vector<1x128xf32>
    %276 = vector.broadcast %249 : vector<40x1xf32> to vector<40x128xf32>
    %277 = vector.broadcast %275 : vector<1x128xf32> to vector<40x128xf32>
    %278 = arith.mulf %276, %277 : vector<40x128xf32>
    %279 = arith.addf %274, %278 : vector<40x128xf32>
    %c254 = arith.constant 254 : index
    %c0_114 = arith.constant 0 : index
    %280 = vector.load %arg3[%c254, %c0_114] : memref<264x128xf32, #tpu.memory_space<vmem>>, vector<1x128xf32>
    %281 = vector.broadcast %250 : vector<40x1xf32> to vector<40x128xf32>
    %282 = vector.broadcast %280 : vector<1x128xf32> to vector<40x128xf32>
    %283 = arith.mulf %281, %282 : vector<40x128xf32>
    %284 = arith.addf %279, %283 : vector<40x128xf32>
    %c255 = arith.constant 255 : index
    %c0_115 = arith.constant 0 : index
    %285 = vector.load %arg3[%c255, %c0_115] : memref<264x128xf32, #tpu.memory_space<vmem>>, vector<1x128xf32>
    %286 = vector.broadcast %163 : vector<40x1xf32> to vector<40x128xf32>
    %287 = vector.broadcast %285 : vector<1x128xf32> to vector<40x128xf32>
    %288 = arith.mulf %286, %287 : vector<40x128xf32>
    %289 = arith.addf %284, %288 : vector<40x128xf32>
    %c256 = arith.constant 256 : index
    %c0_116 = arith.constant 0 : index
    %290 = vector.load %arg3[%c256, %c0_116] : memref<264x128xf32, #tpu.memory_space<vmem>>, vector<1x128xf32>
    %291 = vector.broadcast %208 : vector<40x1xf32> to vector<40x128xf32>
    %292 = vector.broadcast %290 : vector<1x128xf32> to vector<40x128xf32>
    %293 = arith.mulf %291, %292 : vector<40x128xf32>
    %294 = arith.addf %289, %293 : vector<40x128xf32>
    %c257 = arith.constant 257 : index
    %c0_117 = arith.constant 0 : index
    %295 = vector.load %arg3[%c257, %c0_117] : memref<264x128xf32, #tpu.memory_space<vmem>>, vector<1x128xf32>
    %296 = vector.broadcast %243 : vector<40x1xf32> to vector<40x128xf32>
    %297 = vector.broadcast %295 : vector<1x128xf32> to vector<40x128xf32>
    %298 = arith.mulf %296, %297 : vector<40x128xf32>
    %299 = arith.addf %294, %298 : vector<40x128xf32>
    %c258 = arith.constant 258 : index
    %c0_118 = arith.constant 0 : index
    %300 = vector.load %arg3[%c258, %c0_118] : memref<264x128xf32, #tpu.memory_space<vmem>>, vector<1x128xf32>
    %301 = vector.broadcast %148 : vector<40x1xf32> to vector<40x128xf32>
    %302 = vector.broadcast %300 : vector<1x128xf32> to vector<40x128xf32>
    %303 = arith.mulf %301, %302 : vector<40x128xf32>
    %304 = arith.addf %299, %303 : vector<40x128xf32>
    %c259 = arith.constant 259 : index
    %c0_119 = arith.constant 0 : index
    %305 = vector.load %arg3[%c259, %c0_119] : memref<264x128xf32, #tpu.memory_space<vmem>>, vector<1x128xf32>
    %306 = vector.broadcast %193 : vector<40x1xf32> to vector<40x128xf32>
    %307 = vector.broadcast %305 : vector<1x128xf32> to vector<40x128xf32>
    %308 = arith.mulf %306, %307 : vector<40x128xf32>
    %309 = arith.addf %304, %308 : vector<40x128xf32>
    %c260 = arith.constant 260 : index
    %c0_120 = arith.constant 0 : index
    %310 = vector.load %arg3[%c260, %c0_120] : memref<264x128xf32, #tpu.memory_space<vmem>>, vector<1x128xf32>
    %311 = vector.broadcast %238 : vector<40x1xf32> to vector<40x128xf32>
    %312 = vector.broadcast %310 : vector<1x128xf32> to vector<40x128xf32>
    %313 = arith.mulf %311, %312 : vector<40x128xf32>
    %314 = arith.addf %309, %313 : vector<40x128xf32>
    %c261 = arith.constant 261 : index
    %c0_121 = arith.constant 0 : index
    %315 = vector.load %arg3[%c261, %c0_121] : memref<264x128xf32, #tpu.memory_space<vmem>>, vector<1x128xf32>
    %316 = vector.broadcast %102 : vector<40x1xf32> to vector<40x128xf32>
    %317 = vector.broadcast %315 : vector<1x128xf32> to vector<40x128xf32>
    %318 = arith.mulf %316, %317 : vector<40x128xf32>
    %319 = arith.addf %314, %318 : vector<40x128xf32>
    %c0_122 = arith.constant 0 : index
    %c0_123 = arith.constant 0 : index
    %320 = vector.load %arg7[%c0_122, %c0_123] : memref<40x128xf32, #tpu.memory_space<vmem>>, vector<40x128xf32>
    tpu.vector_store %arg7[%c0_122, %c0_123], %319 {strides = array<i32>} : memref<40x128xf32, #tpu.memory_space<vmem>>, vector<40x128xf32>,
    return
  }
  func.func @transform_0(%arg0: i32) -> (i32, i32) {
    %c0_i32 = arith.constant 0 : i32
    %c0_i32_0 = arith.constant 0 : i32
    return %arg0, %c0_i32 : i32, i32
  }
  func.func @transform_1(%arg0: i32) -> (i32, i32) {
    %c0_i32 = arith.constant 0 : i32
    %c0_i32_0 = arith.constant 0 : i32
    return %arg0, %c0_i32 : i32, i32
  }
  func.func @transform_2(%arg0: i32) -> (i32, i32) {
    %c0_i32 = arith.constant 0 : i32
    %c0_i32_0 = arith.constant 0 : i32
    %c0_i32_1 = arith.constant 0 : i32
    return %c0_i32, %c0_i32_0 : i32, i32
  }
  func.func @transform_3(%arg0: i32) -> (i32, i32) {
    %c0_i32 = arith.constant 0 : i32
    %c0_i32_0 = arith.constant 0 : i32
    %c0_i32_1 = arith.constant 0 : i32
    return %c0_i32, %c0_i32_0 : i32, i32
  }
  func.func @transform_4(%arg0: i32) -> (i32, i32) {
    %c0_i32 = arith.constant 0 : i32
    %c0_i32_0 = arith.constant 0 : i32
    %c0_i32_1 = arith.constant 0 : i32
    return %c0_i32, %c0_i32_0 : i32, i32
  }
  func.func @transform_5(%arg0: i32) -> (i32, i32) {
    %c0_i32 = arith.constant 0 : i32
    %c0_i32_0 = arith.constant 0 : i32
    %c0_i32_1 = arith.constant 0 : i32
    return %c0_i32, %c0_i32_0 : i32, i32
  }
  func.func @transform_6(%arg0: i32) -> (i32, i32) {
    %c0_i32 = arith.constant 0 : i32
    %c0_i32_0 = arith.constant 0 : i32
    return %arg0, %c0_i32 : i32, i32
  }
}

</mosaic_0001>

<bundles_post_ra>
// kernel: eq.18
= control target key start
LH: loop header
LB: loop body
LE: loop exit
PB: predicated region body
PF: predicated region fallthrough
CT: control target
= control target key end

     0   :  { %s67_s10 = smov 14   ;;  %s68_s11 = smov 10   ;;  %vm3_vm0 = vcmask 15360   ;;  %vm9_vm1 = vcmask 130160   ;;  %vm15_vm2 = vcmask 113760   ;;  %vm21_vm3 = vcmask 97360   ;;  %s111_s0 = inlined_call_operand.vmem [shape: s32[8,2], index: 0, kind: input, shape index: {}]   ;;  %s112_s1 = inlined_call_operand.vmem [shape: s32[16], index: 1, kind: output, shape index: {}]  }
   0x1   :  { %v53_v0 = vld [vmem:[%s111_s0 + $0x7] sm:$0x1]   ;;  %v55_v1 = vld [vmem:[%s111_s0 + $0x5] sm:$0x1]   ;;  %v57_v2 = vld [vmem:[%s111_s0 + $0x3] sm:$0x1]  }
   0x2   :  { %7 = vrot.lane.b32.xlu0 %v53_v0, %s67_s10  ;;  %19 = vrot.lane.b32.xlu1 %v55_v1, %s68_s11  ;;  %s69_s14 = smov 6   ;;  %v54_v3 = vld [vmem:[%s111_s0 + $0x6] sm:$0x1]   ;;  %v56_v4 = vld [vmem:[%s111_s0 + $0x4] sm:$0x1]   ;;  %s70_s21 = smov 12  }
   0x3   :  { %31 = vrot.lane.b32.xlu2 %v57_v2, %s69_s14  ;;  %v58_v5 = vld [vmem:[%s111_s0 + $0x2] sm:$0x1]   ;;  %s71_s22 = smov 8   ;;  %s72_s23 = smov 4   ;;  %v59_v6 = vld [vmem:[%s111_s0 + $0x1] sm:$0x1]  }
   0x4   :  { %s73_s26 = smov 2   ;;  %v2_v7 = vld [vmem:[%s111_s0] sm:$0x1]   ;;  %vm27_vm4 = vcmask 80960   ;;  %vm33_vm5 = vcmask 64560   ;;  %vm39_vm6 = vcmask 48160  }
   0x5   :  { %4 = vst.msk [vmem:[#allocation0] sm:$0x1] %vm3_vm0, %v2_v7   ;;  %vm45_vm7 = vcmask 31760  }
   0xa   :  { %13 = vrot.lane.b32.xlu0 %v54_v3, %s70_s21  ;;  %25 = vrot.lane.b32.xlu1 %v56_v4, %s71_s22 }
   0xb   :  { %37 = vrot.lane.b32.xlu2 %v58_v5, %s72_s23 }
  0x12   :  { %43 = vrot.lane.b32.xlu0 %v59_v6, %s73_s26 }
  0x5d   :  { %v32_v8 = vpop.permute.xlu2 %31  }
  0x65   :  { %v38_v9 = vpop.permute.xlu2 %37  }
  0x74   :  { %v8_v10 = vpop.permute.xlu0 %7   ;;  %v20_v11 = vpop.permute.xlu1 %19  }
  0x75   :  { %10 = vst.msk [vmem:[#allocation0] sm:$0x1] %vm9_vm1, %v8_v10  }
  0x7c   :  { %v14_v12 = vpop.permute.xlu0 %13   ;;  %v26_v13 = vpop.permute.xlu1 %25  }
  0x7d   :  { %16 = vst.msk [vmem:[#allocation0] sm:$0x1] %vm15_vm2, %v14_v12  }
  0x7e   :  { %22 = vst.msk [vmem:[#allocation0] sm:$0x1] %vm21_vm3, %v20_v11  }
  0x7f   :  { %28 = vst.msk [vmem:[#allocation0] sm:$0x1] %vm27_vm4, %v26_v13  }
  0x80   :  { %34 = vst.msk [vmem:[#allocation0] sm:$0x1] %vm33_vm5, %v32_v8  }
  0x81   :  { %40 = vst.msk [vmem:[#allocation0] sm:$0x1] %vm39_vm6, %v38_v9  }
  0x84   :  { %v44_v14 = vpop.permute.xlu0 %43  }
  0x85   :  { %46 = vst.msk [vmem:[#allocation0] sm:$0x1] %vm45_vm7, %v44_v14  }
  0x8c   :  { %v49_v15 = vld [vmem:[#allocation0] sm:$0x1] }
  0x8d   :  { %52 = vst [vmem:[%s112_s1] sm:$0x1] %v49_v15 }

// kernel: model_forward.1
= control target key start
LH: loop header
LB: loop body
LE: loop exit
PB: predicated region body
PF: predicated region fallthrough
CT: control target
= control target key end

     0   :  { %vm52_vm0 = vcmask 1043456   ;;  %vm36_vm1 = vcmask 31744   ;;  %vm220_vm2 = vcmask 261120   ;;  %vm271_vm3 = vcmask 64512   ;;  %s2664_s19 = smov 125   ;;  %s2665_s20 = smov 126   ;;  %s3851_s2 = inlined_call_operand.vmem [shape: f32[264,128], index: 2, kind: input, shape index: {}]   ;;  %s3852_s0 = inlined_call_operand.vmem [shape: f32[40,4], index: 0, kind: input, shape index: {}]   ;;  %s3853_s1 = inlined_call_operand.vmem [shape: f32[40,4], index: 1, kind: input, shape index: {}]   ;;  %s3854_s3 = inlined_call_operand.vmem [shape: f32[48,128], index: 3, kind: input, shape index: {}]   ;;  %s3855_s4 = inlined_call_operand.vmem [shape: f32[240,32], index: 4, kind: input, shape index: {}]   ;;  %s3856_s5 = inlined_call_operand.vmem [shape: f32[80,32], index: 5, kind: input, shape index: {}]   ;;  %s3857_s6 = inlined_call_operand.vmem [shape: f32[40,128], index: 6, kind: output, shape index: {}]  }
   0x1   :  { %v33_v0 = vld [vmem:[%s3851_s2] sm:$0xf]  ;;  %v107_v3 = vld [vmem:[%s3851_s2 + $0x78] sm:$0xff]  ;;  %v106_v4 = vld [vmem:[%s3851_s2 + $0x70] sm:$0xff]  ;;  %s2666_s21 = smov 127  }
   0x2   :  { %v23_v1 = vld [vmem:[%s3852_s0] sm:$0xff]  ;;  %2368 = vmatpush.msk.msra.mxu0 %vm52_vm0, %v33_v0  ;;  %v24_v5 = vld [vmem:[%s3852_s0 + $0x8] sm:$0xff]  ;;  %v143_v7 = vld [vmem:[%s3851_s2 + $0xf0] sm:$0xf] }
   0x3   :  { %2369 = vmatmul.msk.f32.vlgmr.msra.gmra.mxu0 %vm36_vm1, %v23_v1  ;;  %v108_v2 = vld [vmem:[%s3851_s2 + $0x80] sm:$0xff]  ;;  %v105_v6 = vld [vmem:[%s3851_s2 + $0x68] sm:$0xff]  ;;  %2374 = vmatpush.msk.msra.mxu2 %vm52_vm0, %v143_v7  ;;  %v103_v10 = vld [vmem:[%s3851_s2 + $0x58] sm:$0xff] }
   0x4   :  { %111 = vmatpush.msra.mxu1 %v108_v2  ;;  %v28_v8 = vld [vmem:[%s3853_s1] sm:$0xff]  ;;  %v102_v11 = vld [vmem:[%s3851_s2 + $0x50] sm:$0xff]  ;;  %v101_v12 = vld [vmem:[%s3851_s2 + $0x48] sm:$0xff] }
   0x5   :  { %v104_v9 = vld [vmem:[%s3851_s2 + $0x60] sm:$0xff]  ;;  %2375 = vmatmul.msk.f32.vlgmr.msra.gmra.mxu2 %vm36_vm1, %v28_v8  ;;  %v25_v13 = vld [vmem:[%s3852_s0 + $0x10] sm:$0xff]  ;;  %v99_v15 = vld [vmem:[%s3851_s2 + $0x38] sm:$0xff] }
   0x6   :  { %112 = vmatpush.msra.mxu1 %v107_v3  ;;  %v100_v14 = vld [vmem:[%s3851_s2 + $0x40] sm:$0xff]  ;;  %v98_v16 = vld [vmem:[%s3851_s2 + $0x30] sm:$0xff]  ;;  %v97_v17 = vld [vmem:[%s3851_s2 + $0x28] sm:$0xff] }
   0x7   :  { %v26_v18 = vld [vmem:[%s3852_s0 + $0x18] sm:$0xff]  ;;  %v96_v19 = vld [vmem:[%s3851_s2 + $0x20] sm:$0xff]  ;;  %v94_v22 = vld [vmem:[%s3851_s2 + $0x10] sm:$0xff] }
   0x8   :  { %113 = vmatpush.msra.mxu1 %v106_v4  ;;  %v27_v20 = vld [vmem:[%s3852_s0 + $0x20] sm:$0xff]  ;;  %v95_v21 = vld [vmem:[%s3851_s2 + $0x18] sm:$0xff]  ;;  %v93_v23 = vld [vmem:[%s3851_s2 + $0x8] sm:$0xff] }
   0x9   :  { %v29_v24 = vld [vmem:[%s3853_s1 + $0x8] sm:$0xff]  ;;  %v30_v25 = vld [vmem:[%s3853_s1 + $0x10] sm:$0xff]  ;;  %v31_v26 = vld [vmem:[%s3853_s1 + $0x18] sm:$0xff] }
   0xa   :  { %114 = vmatpush.msra.mxu1 %v105_v6  ;;  %v2527_v27 = vld [vmem:[%s3854_s3] ss:$0 sm:$0xff]  ;;  %v218_v33 = vld [vmem:[%s3851_s2 + $0x98] sm:$0xff]  ;;  %v217_v34 = vld [vmem:[%s3851_s2 + $0x90] sm:$0xff] }
   0xb   :  { %2370 = vmatmul.msk.f32.gmra.mxu0 %vm36_vm1, %v24_v5  ;;  %v32_v28 = vld [vmem:[%s3853_s1 + $0x20] sm:$0xff]  ;;  %v216_v47 = vld [vmem:[%s3851_s2 + $0x88] sm:$0xff]  ;;  %v2529_v52 = vld [vmem:[%s3854_s3 + $0x10] ss:$0 sm:$0xff] }
   0xc   :  { %115 = vmatpush.msra.mxu1 %v104_v9  ;;  %v219_v32 = vld [vmem:[%s3851_s2 + $0xa0] sm:$0xff]  ;;  %v2528_v50 = vld [vmem:[%s3854_s3 + $0x8] ss:$0 sm:$0xff] }
   0xd   :  { %2376 = vmatmul.msk.f32.gmra.mxu2 %vm36_vm1, %v29_v24  ;;  %248 = vmatpush.msrb.mxu0 %v219_v32  ;;  %v268_v60 = vld [vmem:[%s3851_s2 + $0xa8] sm:$0xff]  ;;  %v326_v24 = vld [vmem:[%s3851_s2 + $0xc0] sm:$0xff] }
   0xe   :  { %116 = vmatpush.msra.mxu1 %v103_v10  ;;  %2480 = vmatpush.msra.mxu3 %v219_v32 }
   0xf   :  { %249 = vmatpush.msrb.mxu0 %v218_v33 }
  0x10   :  { %117 = vmatpush.msra.mxu1 %v102_v11  ;;  %2481 = vmatpush.msra.mxu3 %v218_v33 }
  0x11   :  { %250 = vmatpush.msrb.mxu0 %v217_v34 }
  0x12   :  { %118 = vmatpush.msra.mxu1 %v101_v12  ;;  %2482 = vmatpush.msra.mxu3 %v217_v34 }
  0x13   :  { %2371 = vmatmul.msk.f32.gmra.mxu0 %vm36_vm1, %v25_v13 }
  0x14   :  { %119 = vmatpush.msra.mxu1 %v100_v14  ;;  %251 = vmatpush.msrb.mxu0 %v216_v47 }
  0x15   :  { %2377 = vmatmul.msk.f32.gmra.mxu2 %vm36_vm1, %v30_v25  ;;  %2483 = vmatpush.msra.mxu3 %v216_v47  ;;  %v325_v25 = vld [vmem:[%s3851_s2 + $0xb8] sm:$0xff] }
  0x16   :  { %120 = vmatpush.msra.mxu1 %v99_v15  ;;  %302 = vmatpush.msra.mxu0 %v268_v60 }
  0x18   :  { %121 = vmatpush.msra.mxu1 %v98_v16 }
  0x1a   :  { %122 = vmatpush.msra.mxu1 %v97_v17 }
  0x1b   :  { %2372 = vmatmul.msk.f32.gmra.mxu0 %vm36_vm1, %v26_v18 }
  0x1c   :  { %123 = vmatpush.msra.mxu1 %v96_v19 }
  0x1d   :  { %2378 = vmatmul.msk.f32.gmra.mxu2 %vm36_vm1, %v31_v26  ;;  %v324_v26 = vld [vmem:[%s3851_s2 + $0xb0] sm:$0xff] }
  0x1e   :  { %124 = vmatpush.msra.mxu1 %v95_v21 }
  0x20   :  { %125 = vmatpush.msra.mxu1 %v94_v22 }
  0x22   :  { %126 = vmatpush.msra.mxu1 %v93_v23  ;;  %v327_v23 = vld [vmem:[%s3851_s2 + $0xc8] sm:$0xff] }
  0x23   :  { %2373 = vmatmul.msk.f32.gmra.mxu0 %vm36_vm1, %v27_v20  ;;  %357 = vmatpush.msrb.mxu2 %v327_v23  ;;  %v494_v23 = vld [vmem:[%s3855_s4 + $0x10] sm:$0xff] }
  0x25   :  { %2379 = vmatmul.msk.f32.gmra.mxu2 %vm36_vm1, %v32_v28 }
  0x26   :  { %358 = vmatpush.msrb.mxu2 %v326_v24  ;;  %v493_v24 = vld [vmem:[%s3855_s4 + $0x8] sm:$0xff] }
  0x28   :  { %359 = vmatpush.msrb.mxu2 %v325_v25  ;;  %v785_v25 = vld [vmem:[%s3856_s5 + $0x48] sm:$0x1] }
  0x2a   :  { %360 = vmatpush.msrb.mxu2 %v324_v26 }
  0x80   :  { %v73_v29 = vpop.f32.mrf.mxu0 }
  0x81   :  { %v74_v30 = vadd.f32 %v2527_v27, %v73_v29 }
  0x83   :  { %v88_v31 = vmax.f32 %v74_v30, 0.0 }
  0x85   :  { %127 = vmatmul.f32.vlgmr.msra.gmra.mxu1 %v88_v31  ;;  %v2530_v31 = vld [vmem:[%s3854_s3 + $0x18] ss:$0 sm:$0xff] }
  0x88   :  { %v76_v35 = vpop.f32.mrf.mxu0  ;;  %v179_v48 = vpop.f32.mrf.mxu2 }
  0x89   :  { %v77_v36 = vadd.f32 %v2527_v27, %v76_v35  ;;  %v200_v51 = vsub.f32 1.0, %v179_v48  ;;  %v385_v35 = vld [vmem:[%s3851_s2 + $0xe8] sm:$0xff] }
  0x8a   :  { %415 = vmatpush.msrb.mxu3 %v385_v35 }
  0x8b   :  { %v89_v37 = vmax.f32 %v77_v36, 0.0  ;;  %v206_v55 = vmul.f32 %v2529_v52, %v200_v51  ;;  %v384_v36 = vld [vmem:[%s3851_s2 + $0xe0] sm:$0xff] }
  0x8c   :  { %416 = vmatpush.msrb.mxu3 %v384_v36  ;;  %v2531_v51 = vld [vmem:[%s3854_s3 + $0x20] ss:$0 sm:$0xff] }
  0x8d   :  { %130 = vmatmul.f32.gmra.mxu1 %v89_v37  ;;  %v383_v37 = vld [vmem:[%s3851_s2 + $0xd8] sm:$0xff] }
  0x8e   :  { %417 = vmatpush.msrb.mxu3 %v383_v37  ;;  %v3003_v37 = vld [vmem:[%s3851_s2 + $0xf8] ss:$0 sm:$0xff] }
  0x90   :  { %v79_v38 = vpop.f32.mrf.mxu0  ;;  %v182_v49 = vpop.f32.mrf.mxu2 }
  0x91   :  { %v80_v39 = vadd.f32 %v2527_v27, %v79_v38  ;;  %v201_v58 = vsub.f32 1.0, %v182_v49 }
  0x93   :  { %v90_v40 = vmax.f32 %v80_v39, 0.0  ;;  %v207_v63 = vmul.f32 %v2529_v52, %v201_v58 }
  0x95   :  { %133 = vmatmul.f32.gmra.mxu1 %v90_v40 }
  0x98   :  { %v82_v41 = vpop.f32.mrf.mxu0  ;;  %v185_v59 = vpop.f32.mrf.mxu2 }
  0x99   :  { %v83_v42 = vadd.f32 %v2527_v27, %v82_v41  ;;  %v202_v2 = vsub.f32 1.0, %v185_v59 }
  0x9b   :  { %v91_v43 = vmax.f32 %v83_v42, 0.0  ;;  %v208_v6 = vmul.f32 %v2529_v52, %v202_v2 }
  0x9d   :  { %136 = vmatmul.f32.gmra.mxu1 %v91_v43 }
  0xa0   :  { %v85_v44 = vpop.f32.mrf.mxu0  ;;  %v188_v4 = vpop.f32.mrf.mxu2 }
  0xa1   :  { %v86_v45 = vadd.f32 %v2527_v27, %v85_v44  ;;  %v203_v9 = vsub.f32 1.0, %v188_v4 }
  0xa3   :  { %v92_v46 = vmax.f32 %v86_v45, 0.0  ;;  %v209_v12 = vmul.f32 %v2529_v52, %v203_v9 }
  0xa5   :  { %139 = vmatmul.f32.gmra.mxu1 %v92_v46 }
  0xa8   :  { %v191_v13 = vpop.f32.mrf.mxu2 }
  0xa9   :  { %v204_v16 = vsub.f32 1.0, %v191_v13 }
  0xab   :  { %v210_v19 = vmul.f32 %v2529_v52, %v204_v16 }
 0x102   :  { %v128_v53 = vpop.f32.mrf.mxu1 }
 0x103   :  { %v129_v54 = vadd.f32 %v2528_v50, %v128_v53 }
 0x105   :  { %v195_v56 = vmul.f32 %v179_v48, %v129_v54 }
 0x107   :  { %v211_v57 = vadd.f32 %v206_v55, %v195_v56  ;;  %v435_v55 = vld [vmem:[%s3855_s4] sm:$0xf] }
 0x108   :  { %2400 = vmatpush.msk.msrb.mxu1 %vm52_vm0, %v435_v55  ;;  %v846_v55 = vmax.f32 %v785_v25, 0.0 }
 0x109   :  { %2380 = vmatmul.msk.f32.vlgmr.msrb.gmra.mxu0 %vm220_vm2, %v211_v57 }
 0x10a   :  { %v131_v61 = vpop.f32.mrf.mxu1 }
 0x10b   :  { %v132_v62 = vadd.f32 %v2528_v50, %v131_v61 }
 0x10d   :  { %v196_v0 = vmul.f32 %v182_v49, %v132_v62 }
 0x10f   :  { %v212_v1 = vadd.f32 %v207_v63, %v196_v0 }
 0x111   :  { %2381 = vmatmul.msk.f32.vlgmr.msra.gmra.mxu3 %vm220_vm2, %v212_v1 }
 0x112   :  { %v134_v3 = vpop.f32.mrf.mxu1 }
 0x113   :  { %v135_v5 = vadd.f32 %v2528_v50, %v134_v3 }
 0x115   :  { %v197_v7 = vmul.f32 %v185_v59, %v135_v5  ;;  %v3858_v5 = vmov 1  }
 0x116   :  { %2492 = vset.pattern.permute.xlu1 %v3858_v5  ;;  %2495 = vset.pattern.permute.xlu0 %v3858_v5 }
 0x117   :  { %v213_v8 = vadd.f32 %v208_v6, %v197_v7  ;;  %v3859_v6 = vmov 0   ;;  %v2532_v7 = vld [vmem:[%s3854_s3 + $0x28] ss:$0 sm:$0xff] }
 0x118   :  { %2491 = vset.pattern.permute.xlu2 %v3859_v6 }
 0x119   :  { %2382 = vmatmul.msk.f32.gmra.mxu3 %vm220_vm2, %v213_v8 }
 0x11a   :  { %v137_v10 = vpop.f32.mrf.mxu1 }
 0x11b   :  { %v138_v11 = vadd.f32 %v2528_v50, %v137_v10  ;;  %v897_v10 = vld [vmem:[%s3855_s4 + $0x50] sm:$0xff] }
 0x11c   :  { %916 = vmatpush.msra.mxu1 %v897_v10 }
 0x11d   :  { %v198_v14 = vmul.f32 %v188_v4, %v138_v11  ;;  %v861_v4 = vld [vmem:[%s3855_s4 + $0x48] sm:$0xf] }
 0x11f   :  { %v214_v15 = vadd.f32 %v209_v12, %v198_v14 }
 0x121   :  { %2383 = vmatmul.msk.f32.gmra.mxu3 %vm220_vm2, %v214_v15 }
 0x122   :  { %v140_v17 = vpop.f32.mrf.mxu1 }
 0x123   :  { %v141_v18 = vadd.f32 %v2528_v50, %v140_v17  ;;  %v382_v50 = vld [vmem:[%s3851_s2 + $0xd0] sm:$0xff] }
 0x124   :  { %418 = vmatpush.msrb.mxu3 %v382_v50 }
 0x125   :  { %v199_v20 = vmul.f32 %v191_v13, %v141_v18  ;;  %v921_v13 = vld [vmem:[%s3855_s4 + $0x98] sm:$0xf] }
 0x126   :  { %2416 = vmatpush.msk.msra.mxu3 %vm52_vm0, %v861_v4 }
 0x127   :  { %v215_v21 = vadd.f32 %v210_v19, %v199_v20  ;;  %v2961_v20 = vld [vmem:[%s3855_s4 + $0xe8] sm:$0xff] }
 0x129   :  { %2384 = vmatmul.msk.f32.gmra.mxu3 %vm220_vm2, %v215_v21  ;;  %v496_v21 = vld [vmem:[%s3855_s4 + $0x20] sm:$0xff] }
 0x12a   :  { %526 = vmatpush.msrb.mxu0 %v496_v21 }
 0x186   :  { %v253_v22 = vpop.f32.mrf.mxu0 }
 0x187   :  { %2385 = vmatmul.msk.f32.vlgmr.msra.gmra.mxu0 %vm271_vm3, %v253_v22  ;;  %v495_v22 = vld [vmem:[%s3855_s4 + $0x18] sm:$0xff] }
 0x188   :  { %527 = vmatpush.msrb.mxu0 %v495_v22 }
 0x18a   :  { %528 = vmatpush.msrb.mxu0 %v494_v23  ;;  %v981_v23 = vld [vmem:[%s3855_s4 + $0x60] sm:$0xff] }
 0x18c   :  { %529 = vmatpush.msrb.mxu0 %v493_v24 }
 0x194   :  { %v256_v27 = vpop.f32.mrf.mxu3 }
 0x195   :  { %2386 = vmatmul.msk.f32.gmra.mxu0 %vm271_vm3, %v256_v27  ;;  %v847_v27 = vand.u32 2147483647, %v785_v25 }
 0x19c   :  { %v259_v28 = vpop.f32.mrf.mxu3 }
 0x19d   :  { %2387 = vmatmul.msk.f32.gmra.mxu0 %vm271_vm3, %v259_v28  ;;  %v848_v28 = vsub.f32 0.0, %v847_v27 }
 0x1a4   :  { %v262_v29 = vpop.f32.mrf.mxu3 }
 0x1a5   :  { %2388 = vmatmul.msk.f32.gmra.mxu0 %vm271_vm3, %v262_v29  ;;  %v849_v29 = vmul.f32 1.442695, %v848_v28 }
 0x1a7   :  { %2556 = vpow2.f32 %v849_v29 }
 0x1ac   :  { %v265_v30 = vpop.f32.mrf.mxu3 }
 0x1ad   :  { %2389 = vmatmul.msk.f32.gmra.mxu0 %vm271_vm3, %v265_v30 }
 0x204   :  { %v304_v32 = vpop.f32.mrf.mxu0 }
 0x205   :  { %v305_v33 = vadd.f32 %v2530_v31, %v304_v32 }
 0x207   :  { %v319_v34 = vmax.f32 %v305_v33, 0.0  ;;  %v2557_v33 = vpop.eup %2556 }
 0x209   :  { %2390 = vmatmul.msk.f32.vlgmr.msrb.gmra.mxu2 %vm220_vm2, %v319_v34 }
 0x212   :  { %v307_v38 = vpop.f32.mrf.mxu0 }
 0x213   :  { %v308_v39 = vadd.f32 %v2530_v31, %v307_v38 }
 0x215   :  { %v320_v40 = vmax.f32 %v308_v39, 0.0  ;;  %v851_v39 = vadd.f32 1.0, %v2557_v33 }
 0x217   :  { %2391 = vmatmul.msk.f32.gmra.mxu2 %vm220_vm2, %v320_v40  ;;  %v3010_v40 = vld [vmem:[%s3851_s2 + $0xf9] ss:$0 sm:$0xff]  ;;  %2558 = vlog2.f32 %v851_v39 }
 0x21a   :  { %v310_v41 = vpop.f32.mrf.mxu0 }
 0x21b   :  { %v311_v42 = vadd.f32 %v2530_v31, %v310_v41 }
 0x21d   :  { %v321_v43 = vmax.f32 %v311_v42, 0.0  ;;  %v3015_v42 = vld [vmem:[%s3856_s5] ss:$0 sm:$0xff] }
 0x21f   :  { %2392 = vmatmul.msk.f32.gmra.mxu2 %vm220_vm2, %v321_v43 }
 0x222   :  { %v313_v44 = vpop.f32.mrf.mxu0 }
 0x223   :  { %v314_v45 = vadd.f32 %v2530_v31, %v313_v44 }
 0x225   :  { %v322_v46 = vmax.f32 %v314_v45, 0.0 }
 0x227   :  { %2393 = vmatmul.msk.f32.gmra.mxu2 %vm220_vm2, %v322_v46 }
 0x22a   :  { %v316_v47 = vpop.f32.mrf.mxu0 }
 0x22b   :  { %v317_v48 = vadd.f32 %v2530_v31, %v316_v47 }
 0x22d   :  { %v323_v49 = vmax.f32 %v317_v48, 0.0 }
 0x22f   :  { %2394 = vmatmul.msk.f32.gmra.mxu2 %vm220_vm2, %v323_v49 }
 0x28c   :  { %v362_v52 = vpop.f32.mrf.mxu2 }
 0x28d   :  { %v363_v53 = vadd.f32 %v2531_v51, %v362_v52 }
 0x28f   :  { %v377_v54 = vmax.f32 %v363_v53, 0.0 }
 0x291   :  { %2395 = vmatmul.msk.f32.vlgmr.msrb.gmra.mxu3 %vm220_vm2, %v377_v54 }
 0x29a   :  { %v365_v56 = vpop.f32.mrf.mxu2 }
 0x29b   :  { %v366_v57 = vadd.f32 %v2531_v51, %v365_v56 }
 0x29d   :  { %v378_v58 = vmax.f32 %v366_v57, 0.0 }
 0x29f   :  { %2396 = vmatmul.msk.f32.gmra.mxu3 %vm220_vm2, %v378_v58 }
 0x2a2   :  { %v368_v59 = vpop.f32.mrf.mxu2 }
 0x2a3   :  { %v369_v60 = vadd.f32 %v2531_v51, %v368_v59 }
 0x2a5   :  { %v379_v61 = vmax.f32 %v369_v60, 0.0 }
 0x2a7   :  { %2397 = vmatmul.msk.f32.gmra.mxu3 %vm220_vm2, %v379_v61 }
 0x2aa   :  { %v371_v62 = vpop.f32.mrf.mxu2 }
 0x2ab   :  { %v372_v63 = vadd.f32 %v2531_v51, %v371_v62 }
 0x2ad   :  { %v380_v0 = vmax.f32 %v372_v63, 0.0 }
 0x2af   :  { %2398 = vmatmul.msk.f32.gmra.mxu3 %vm220_vm2, %v380_v0 }
 0x2b2   :  { %v374_v1 = vpop.f32.mrf.mxu2 }
 0x2b3   :  { %v375_v2 = vadd.f32 %v2531_v51, %v374_v1  ;;  %v2559_v51 = vpop.eup %2558 }
 0x2b4   :  { %v853_v56 = vmul.f32 0.6931472, %v2559_v51 }
 0x2b5   :  { %v381_v3 = vmax.f32 %v375_v2, 0.0 }
 0x2b6   :  { %v854_v60 = vadd.f32 %v853_v56, %v846_v55  ;;  %v2536_v55 = vld [vmem:[%s3856_s5 + $0x18] ss:$0 sm:$0xff] }
 0x2b7   :  { %2399 = vmatmul.msk.f32.gmra.mxu3 %vm220_vm2, %v381_v3 }
 0x2b8   :  { %v3030_v2 = vperm.slane %v854_v60, 0 }
 0x314   :  { %v420_v8 = vpop.f32.mrf.mxu3 }
 0x315   :  { %v2888_v9 = vadd.f32 %v2532_v7, %v420_v8  ;;  %v957_v8 = vld [vmem:[%s3855_s4 + $0xa0] sm:$0xff] }
 0x316   :  { %973 = vmatpush.msra.mxu0 %v957_v8 }
 0x317   :  { %826 = vrot.lane.b32.xlu2 %v2888_v9, %s2664_s19  ;;  %806 = vrot.lane.b32.xlu0 %v2888_v9, %s2665_s20 }
 0x318   :  { %786 = vrot.lane.b32.xlu1 %v2888_v9, %s2666_s21  ;;  %2401 = vmatmul.msk.f32.vlgmr.msrb.gmra.mxu1 %vm36_vm1, %v2888_v9 }
 0x319   :  { %2417 = vmatmul.msk.f32.vlgmr.msra.gmra.mxu3 %vm36_vm1, %v2888_v9  ;;  %2423 = vmatpush.msk.msrb.mxu1 %vm52_vm0, %v921_v13 }
 0x31f   :  { %1878 = vperm.xlu2 %2491, %v2888_v9  }
 0x320   :  { %1905 = vperm.xlu1 %2492, %v2888_v9  }
 0x322   :  { %v423_v11 = vpop.f32.mrf.mxu3 }
 0x323   :  { %v2905_v12 = vadd.f32 %v2532_v7, %v423_v11  ;;  %v983_v11 = vld [vmem:[%s3855_s4 + $0x70] sm:$0xff] }
 0x325   :  { %828 = vrot.lane.b32.xlu0 %v2905_v12, %s2664_s19  ;;  %2402 = vmatmul.msk.f32.gmra.mxu1 %vm36_vm1, %v2905_v12 }
 0x326   :  { %2418 = vmatmul.msk.f32.gmra.mxu3 %vm36_vm1, %v2905_v12 }
 0x327   :  { %788 = vrot.lane.b32.xlu2 %v2905_v12, %s2666_s21 }
 0x328   :  { %808 = vrot.lane.b32.xlu1 %v2905_v12, %s2665_s20  ;;  %2493 = vset.pattern.permute.xlu2 %v3858_v5 }
 0x329   :  { %2494 = vset.pattern.permute.xlu1 %v3859_v6 }
 0x32a   :  { %v426_v14 = vpop.f32.mrf.mxu3 }
 0x32b   :  { %v2923_v15 = vadd.f32 %v2532_v7, %v426_v14 }
 0x32d   :  { %790 = vrot.lane.b32.xlu0 %v2923_v15, %s2666_s21  ;;  %2403 = vmatmul.msk.f32.gmra.mxu1 %vm36_vm1, %v2923_v15 }
 0x32e   :  { %2419 = vmatmul.msk.f32.gmra.mxu3 %vm36_vm1, %v2923_v15 }
 0x32f   :  { %1909 = vperm.xlu2 %2493, %v2905_v12  }
 0x330   :  { %830 = vrot.lane.b32.xlu1 %v2923_v15, %s2664_s19 }
 0x332   :  { %v429_v16 = vpop.f32.mrf.mxu3 }
 0x333   :  { %v2934_v17 = vadd.f32 %v2532_v7, %v429_v16  ;;  %v982_v16 = vld [vmem:[%s3855_s4 + $0x68] sm:$0xff] }
 0x335   :  { %1913 = vperm.xlu0 %2495, %v2923_v15   ;;  %2404 = vmatmul.msk.f32.gmra.mxu1 %vm36_vm1, %v2934_v17 }
 0x336   :  { %2420 = vmatmul.msk.f32.gmra.mxu3 %vm36_vm1, %v2934_v17 }
 0x337   :  { %810 = vrot.lane.b32.xlu2 %v2923_v15, %s2665_s20 }
 0x338   :  { %1886 = vperm.xlu1 %2494, %v2923_v15   ;;  %2496 = vset.pattern.permute.xlu2 %v3859_v6 }
 0x33a   :  { %v432_v18 = vpop.f32.mrf.mxu3 }
 0x33b   :  { %v2945_v19 = vadd.f32 %v2532_v7, %v432_v18 }
 0x33d   :  { %2405 = vmatmul.msk.f32.gmra.mxu1 %vm36_vm1, %v2945_v19  ;;  %812 = vrot.lane.b32.xlu0 %v2934_v17, %s2665_s20 }
 0x33e   :  { %2421 = vmatmul.msk.f32.gmra.mxu3 %vm36_vm1, %v2945_v19 }
 0x33f   :  { %832 = vrot.lane.b32.xlu2 %v2934_v17, %s2664_s19 }
 0x340   :  { %792 = vrot.lane.b32.xlu1 %v2934_v17, %s2666_s21 }
 0x341   :  { %2497 = vset.pattern.permute.xlu1 %v3858_v5 }
 0x345   :  { %2422 = vmatmul.msk.f32.vlgmr.msra.gmra.mxu1 %vm271_vm3, %v2961_v20  ;;  %834 = vrot.lane.b32.xlu0 %v2945_v19, %s2664_s19 }
 0x347   :  { %1890 = vperm.xlu2 %2496, %v2934_v17  }
 0x348   :  { %1917 = vperm.xlu1 %2497, %v2934_v17  }
 0x34d   :  { %2424 = vmatmul.msk.f32.vlgmr.msrb.gmra.mxu1 %vm36_vm1, %v2888_v9 }
 0x34f   :  { %794 = vrot.lane.b32.xlu2 %v2945_v19, %s2666_s21 }
 0x350   :  { %814 = vrot.lane.b32.xlu1 %v2945_v19, %s2665_s20  ;;  %2498 = vset.pattern.permute.xlu2 %v3858_v5 }
 0x355   :  { %2425 = vmatmul.msk.f32.gmra.mxu1 %vm36_vm1, %v2905_v12 }
 0x35d   :  { %2426 = vmatmul.msk.f32.gmra.mxu1 %vm36_vm1, %v2923_v15 }
 0x365   :  { %2427 = vmatmul.msk.f32.gmra.mxu1 %vm36_vm1, %v2934_v17 }
 0x36d   :  { %2428 = vmatmul.msk.f32.gmra.mxu1 %vm36_vm1, %v2945_v19 }
 0x371   :  { %v827_v26 = vpop.permute.xlu2 %826 }
 0x379   :  { %v1879_v30 = vpop.permute.xlu2 %1878 }
 0x37a   :  { %v1898_v43 = vmul.f32 %v3003_v37, %v1879_v30 }
 0x381   :  { %v789_v35 = vpop.permute.xlu2 %788 }
 0x382   :  { %v802_v52 = vadd.f32 %v789_v35, %v2905_v12 }
 0x389   :  { %v807_v34 = vpop.permute.xlu0 %806  ;;  %v3022_v48 = vpop.permute.xlu2 %1909 }
 0x38a   :  { %v787_v31 = vpop.permute.xlu1 %786 }
 0x38b   :  { %v801_v32 = vadd.f32 %v787_v31, %v2888_v9 }
 0x38d   :  { %v821_v36 = vadd.f32 %v807_v34, %v801_v32 }
 0x38f   :  { %v3005_v38 = vadd.f32 %v827_v26, %v821_v36  ;;  %v980_v26 = vld [vmem:[%s3855_s4 + $0x58] sm:$0xff] }
 0x391   :  { %v811_v61 = vpop.permute.xlu2 %810 }
 0x392   :  { %v1906_v41 = vpop.permute.xlu1 %1905 }
 0x393   :  { %v1925_v44 = vmul.f32 %v3010_v40, %v1906_v41 }
 0x395   :  { %v3019_v45 = vadd.f32 %v1925_v44, %v1898_v43  ;;  %v473_v46 = vpop.f32.mrf.mxu1 }
 0x396   :  { %v474_v47 = vadd.f32 %v3015_v42, %v473_v46 }
 0x397   :  { %v829_v49 = vpop.permute.xlu0 %828 }
 0x398   :  { %v488_v50 = vmax.f32 %v474_v47, 0.0 }
 0x399   :  { %v833_v27 = vpop.permute.xlu2 %832 }
 0x39a   :  { %v809_v53 = vpop.permute.xlu1 %808  ;;  %2406 = vmatmul.msk.f32.vlgmr.msrb.gmra.mxu0 %vm220_vm2, %v488_v50 }
 0x39b   :  { %v822_v54 = vadd.f32 %v809_v53, %v802_v52  ;;  %1213 = vmatpush.msrb.mxu0 %v983_v11 }
 0x39c   :  { %v882_v51 = vpop.f32.mrf.mxu3 }
 0x39d   :  { %v3026_v57 = vadd.f32 %v829_v49, %v822_v54  ;;  %1214 = vmatpush.msrb.mxu0 %v982_v16 }
 0x39f   :  { %v791_v58 = vpop.permute.xlu0 %790  ;;  %1215 = vmatpush.msrb.mxu0 %v981_v23 }
 0x3a0   :  { %v803_v59 = vadd.f32 %v791_v58, %v2923_v15  ;;  %v554_v58 = vld [vmem:[%s3855_s4 + $0x40] sm:$0xff] }
 0x3a1   :  { %1216 = vmatpush.msrb.mxu0 %v980_v26  ;;  %v1891_v36 = vpop.permute.xlu2 %1890  ;;  %584 = vmatpush.msra.mxu2 %v554_v58 }
 0x3a2   :  { %v823_v62 = vadd.f32 %v811_v61, %v803_v59  ;;  %v831_v63 = vpop.permute.xlu1 %830  ;;  %v476_v0 = vpop.f32.mrf.mxu1  ;;  %v1901_v44 = vmul.f32 %v3003_v37, %v1891_v36 }
 0x3a3   :  { %v477_v1 = vadd.f32 %v3015_v42, %v476_v0 }
 0x3a4   :  { %v843_v3 = vadd.f32 %v831_v63, %v823_v62 }
 0x3a5   :  { %v489_v4 = vmax.f32 %v477_v1, 0.0 }
 0x3a6   :  { %v3033_v7 = vadd.f32 %v3030_v2, %v843_v3  ;;  %v553_v3 = vld [vmem:[%s3855_s4 + $0x38] sm:$0xff] }
 0x3a7   :  { %2407 = vmatmul.msk.f32.gmra.mxu0 %vm220_vm2, %v489_v4  ;;  %v1914_v10 = vpop.permute.xlu0 %1913  ;;  %585 = vmatpush.msra.mxu2 %v553_v3 }
 0x3a8   :  { %3871 = vst [vmem:[#allocation2_spill] sm:$0xff] %v3033_v7  ;;  %v1927_v18 = vmul.f32 %v3010_v40, %v1914_v10 }
 0x3a9   :  { %v885_v56 = vpop.f32.mrf.mxu3 }
 0x3aa   :  { %v1887_v13 = vpop.permute.xlu1 %1886  ;;  %v479_v14 = vpop.f32.mrf.mxu1 }
 0x3ab   :  { %v1900_v21 = vmul.f32 %v3003_v37, %v1887_v13  ;;  %v480_v22 = vadd.f32 %v3015_v42, %v479_v14  ;;  %v552_v14 = vld [vmem:[%s3855_s4 + $0x30] sm:$0xff] }
 0x3ac   :  { %586 = vmatpush.msra.mxu2 %v552_v14 }
 0x3ad   :  { %v3051_v24 = vadd.f32 %v1927_v18, %v1900_v21  ;;  %v490_v25 = vmax.f32 %v480_v22, 0.0  ;;  %v551_v22 = vld [vmem:[%s3855_s4 + $0x28] sm:$0xff] }
 0x3ae   :  { %587 = vmatpush.msra.mxu2 %v551_v22  ;;  %v3153_v22 = vld [vmem:[%s3856_s5 + $0x20] ss:$0 sm:$0xff] }
 0x3af   :  { %2408 = vmatmul.msk.f32.gmra.mxu0 %vm220_vm2, %v490_v25  ;;  %v813_v28 = vpop.permute.xlu0 %812 }
 0x3b1   :  { %v888_v59 = vpop.f32.mrf.mxu3 }
 0x3b2   :  { %v793_v29 = vpop.permute.xlu1 %792  ;;  %v482_v30 = vpop.f32.mrf.mxu1 }
 0x3b3   :  { %v804_v31 = vadd.f32 %v793_v29, %v2934_v17  ;;  %v483_v32 = vadd.f32 %v3015_v42, %v482_v30 }
 0x3b5   :  { %v491_v33 = vmax.f32 %v483_v32, 0.0  ;;  %v824_v34 = vadd.f32 %v813_v28, %v804_v31 }
 0x3b7   :  { %v844_v35 = vadd.f32 %v833_v27, %v824_v34  ;;  %2409 = vmatmul.msk.f32.gmra.mxu0 %vm220_vm2, %v491_v33 }
 0x3b9   :  { %v3061_v39 = vadd.f32 %v3030_v2, %v844_v35 }
 0x3ba   :  { %v1918_v41 = vpop.permute.xlu1 %1917  ;;  %v485_v43 = vpop.f32.mrf.mxu1 }
 0x3bb   :  { %3872 = vst [vmem:[#allocation3_spill] sm:$0xff] %v3061_v39  ;;  %v1928_v46 = vmul.f32 %v3010_v40, %v1918_v41  ;;  %v486_v47 = vadd.f32 %v3015_v42, %v485_v43  ;;  %v2537_v41 = vld [vmem:[%s3856_s5 + $0x8] ss:$0 sm:$0xff] }
 0x3bd   :  { %v3066_v49 = vadd.f32 %v1928_v46, %v1901_v44  ;;  %v492_v50 = vmax.f32 %v486_v47, 0.0 }
 0x3bf   :  { %2410 = vmatmul.msk.f32.gmra.mxu0 %vm220_vm2, %v492_v50 }
 0x3c2   :  { %v918_v52 = vpop.f32.mrf.mxu1 }
 0x3c3   :  { %v1168_v53 = vperm.slane %v918_v52, 0 }
 0x3c5   :  { %v1169_v54 = vadd.f32 %v1168_v53, %v882_v51  ;;  %v1170_v42 = vadd.f32 %v1168_v53, %v885_v56  ;;  %v1171_v62 = vadd.f32 %v1168_v53, %v888_v59 }
 0x3c7   :  { %2429 = vmatmul.msk.f32.vlgmr.msra.gmra.mxu0 %vm271_vm3, %v2961_v20  ;;  %v1175_v37 = vadd.f32 %v2536_v55, %v1169_v54  ;;  %v1176_v60 = vadd.f32 %v2536_v55, %v1170_v42  ;;  %v891_v20 = vpop.f32.mrf.mxu3  ;;  %v1177_v63 = vadd.f32 %v2536_v55, %v1171_v62  ;;  %v993_v54 = vld [vmem:[%s3855_s4 + $0xc0] sm:$0xff] }
 0x3c8   :  { %1504 = vmatpush.msra.mxu0 %v983_v11  ;;  %v1172_v0 = vadd.f32 %v1168_v53, %v891_v20  ;;  %1045 = vmatpush.msrb.mxu2 %v993_v54 }
 0x3c9   :  { %v1180_v40 = vmax.f32 %v1175_v37, 0.0  ;;  %v1181_v61 = vmax.f32 %v1176_v60, 0.0  ;;  %v1182_v1 = vmax.f32 %v1177_v63, 0.0  ;;  %v3115_v37 = vld [vmem:[%s3855_s4 + $0xb0] sm:$0xff]  ;;  %v987_v60 = vld [vmem:[%s3855_s4 + $0x88] sm:$0xff] }
 0x3ca   :  { %1505 = vmatpush.msra.mxu0 %v982_v16  ;;  %v1178_v8 = vadd.f32 %v2536_v55, %v1172_v0  ;;  %v1461_v16 = vperm.slane %v918_v52, 1  ;;  %v3100_v52 = vpop.f32.mrf.mxu1 }
 0x3cc   :  { %1506 = vmatpush.msra.mxu0 %v981_v23  ;;  %v1183_v11 = vmax.f32 %v1178_v8, 0.0  ;;  %v1462_v21 = vadd.f32 %v1461_v16, %v882_v51  ;;  %v1464_v29 = vadd.f32 %v1461_v16, %v888_v59  ;;  %v1465_v31 = vadd.f32 %v1461_v16, %v891_v20  ;;  %v985_v20 = vld [vmem:[%s3855_s4 + $0x78] sm:$0xff] }
 0x3ce   :  { %1507 = vmatpush.msra.mxu0 %v980_v26  ;;  %v1467_v23 = vadd.f32 %v2536_v55, %v1462_v21  ;;  %v1463_v26 = vadd.f32 %v1461_v16, %v885_v56  ;;  %v1469_v30 = vadd.f32 %v2536_v55, %v1464_v29  ;;  %v1470_v33 = vadd.f32 %v2536_v55, %v1465_v31  ;;  %v988_v56 = vld [vmem:[%s3855_s4 + $0x90] sm:$0xff] }
 0x3cf   :  { %2440 = vmatmul.msk.f32.vlgmr.msrb.gmra.mxu0 %vm220_vm2, %v1180_v40  ;;  %v894_v4 = vpop.f32.mrf.mxu3  ;;  %1266 = vmatpush.msra.mxu1 %v988_v56  ;;  %v3120_v40 = vld [vmem:[%s3855_s4 + $0xa8] sm:$0xff] }
 0x3d0   :  { %v1173_v10 = vadd.f32 %v1168_v53, %v894_v4  ;;  %v1472_v25 = vmax.f32 %v1467_v23, 0.0  ;;  %v1468_v27 = vadd.f32 %v2536_v55, %v1463_v26  ;;  %v1474_v32 = vmax.f32 %v1469_v30, 0.0 }
 0x3d1   :  { %v1475_v34 = vmax.f32 %v1470_v33, 0.0  ;;  %v1466_v35 = vadd.f32 %v1461_v16, %v894_v4  ;;  %1267 = vmatpush.msra.mxu1 %v987_v60  ;;  %v3147_v16 = vld [vmem:[%s3856_s5 + $0x30] ss:$0 sm:$0xff] }
 0x3d2   :  { %v1179_v13 = vadd.f32 %v2536_v55, %v1173_v10  ;;  %v1473_v28 = vmax.f32 %v1468_v27, 0.0  ;;  %v3130_v62 = vpop.f32.mrf.mxu1 }
 0x3d3   :  { %v1471_v36 = vadd.f32 %v2536_v55, %v1466_v35  ;;  %v992_v55 = vld [vmem:[%s3855_s4 + $0xb8] sm:$0xff] }
 0x3d4   :  { %v1184_v18 = vmax.f32 %v1179_v13, 0.0  ;;  %1046 = vmatpush.msrb.mxu2 %v992_v55 }
 0x3d5   :  { %v1476_v43 = vmax.f32 %v1471_v36, 0.0 }
 0x3d6   :  { %1047 = vmatpush.msrb.mxu2 %v3115_v37 }
 0x3d7   :  { %2441 = vmatmul.msk.f32.gmra.mxu0 %vm220_vm2, %v1181_v61  ;;  %v986_v61 = vld [vmem:[%s3855_s4 + $0x80] sm:$0xff] }
 0x3d8   :  { %1048 = vmatpush.msrb.mxu2 %v3120_v40  ;;  %1268 = vmatpush.msra.mxu1 %v986_v61 }
 0x3da   :  { %1269 = vmatpush.msra.mxu1 %v985_v20  ;;  %v3139_v3 = vpop.f32.mrf.mxu1 }
 0x3dc   :  { %1556 = vmatpush.msrb.mxu1 %v988_v56 }
 0x3de   :  { %1557 = vmatpush.msrb.mxu1 %v987_v60 }
 0x3df   :  { %2442 = vmatmul.msk.f32.gmra.mxu0 %vm220_vm2, %v1182_v1 }
 0x3e0   :  { %1558 = vmatpush.msrb.mxu1 %v986_v61 }
 0x3e2   :  { %1559 = vmatpush.msrb.mxu1 %v985_v20 }
 0x3e7   :  { %2443 = vmatmul.msk.f32.gmra.mxu0 %vm220_vm2, %v1183_v11  ;;  %v3142_v11 = vpop.f32.mrf.mxu1 }
 0x3ef   :  { %2444 = vmatmul.msk.f32.gmra.mxu0 %vm220_vm2, %v1184_v18  ;;  %v3160_v30 = vpop.f32.mrf.mxu1 }
 0x3f7   :  { %2460 = vmatmul.msk.f32.vlgmr.msra.gmra.mxu0 %vm220_vm2, %v1472_v25 }
 0x3ff   :  { %2461 = vmatmul.msk.f32.gmra.mxu0 %vm220_vm2, %v1473_v28 }
 0x407   :  { %2462 = vmatmul.msk.f32.gmra.mxu0 %vm220_vm2, %v1474_v32 }
 0x40f   :  { %2463 = vmatmul.msk.f32.gmra.mxu0 %vm220_vm2, %v1475_v34 }
 0x417   :  { %v531_v44 = vpop.f32.mrf.mxu0  ;;  %2464 = vmatmul.msk.f32.gmra.mxu0 %vm220_vm2, %v1476_v43 }
 0x418   :  { %v532_v46 = vadd.f32 %v2537_v41, %v531_v44 }
 0x41a   :  { %v546_v47 = vmax.f32 %v532_v46, 0.0 }
 0x41c   :  { %2411 = vmatmul.msk.f32.vlgmr.msra.gmra.mxu2 %vm220_vm2, %v546_v47 }
 0x41d   :  { %1339 = vmatpush.msra.mxu2 %v993_v54 }
 0x41f   :  { %1340 = vmatpush.msra.mxu2 %v992_v55 }
 0x421   :  { %1341 = vmatpush.msra.mxu2 %v3115_v37 }
 0x423   :  { %1342 = vmatpush.msra.mxu2 %v3120_v40 }
 0x424   :  { %v534_v50 = vpop.f32.mrf.mxu0 }
 0x425   :  { %v535_v51 = vadd.f32 %v2537_v41, %v534_v50 }
 0x427   :  { %v547_v53 = vmax.f32 %v535_v51, 0.0 }
 0x429   :  { %2412 = vmatmul.msk.f32.gmra.mxu2 %vm220_vm2, %v547_v53 }
 0x42c   :  { %v537_v42 = vpop.f32.mrf.mxu0 }
 0x42d   :  { %v538_v58 = vadd.f32 %v2537_v41, %v537_v42 }
 0x42f   :  { %v548_v59 = vmax.f32 %v538_v58, 0.0 }
 0x431   :  { %2413 = vmatmul.msk.f32.gmra.mxu2 %vm220_vm2, %v548_v59 }
 0x434   :  { %v540_v63 = vpop.f32.mrf.mxu0 }
 0x435   :  { %v541_v0 = vadd.f32 %v2537_v41, %v540_v63 }
 0x437   :  { %v549_v1 = vmax.f32 %v541_v0, 0.0 }
 0x439   :  { %2414 = vmatmul.msk.f32.gmra.mxu2 %vm220_vm2, %v549_v1 }
 0x43c   :  { %v543_v4 = vpop.f32.mrf.mxu0 }
 0x43d   :  { %v544_v8 = vadd.f32 %v2537_v41, %v543_v4 }
 0x43f   :  { %v550_v10 = vmax.f32 %v544_v8, 0.0 }
 0x441   :  { %2415 = vmatmul.msk.f32.gmra.mxu2 %vm220_vm2, %v550_v10 }
 0x444   :  { %v975_v13 = vpop.f32.mrf.mxu0 }
 0x445   :  { %v1000_v14 = vperm.slane %v975_v13, 0  ;;  %v1606_v18 = vperm.slane %v975_v13, 2  ;;  %v1296_v1 = vperm.slane %v975_v13, 1 }
 0x447   :  { %v1001_v21 = vadd.f32 %v1000_v14, %v3100_v52  ;;  %v1607_v25 = vadd.f32 %v1606_v18, %v3100_v52  ;;  %v1002_v27 = vadd.f32 %v1000_v14, %v3130_v62  ;;  %v1608_v32 = vadd.f32 %v1606_v18, %v3130_v62 }
 0x448   :  { %v1609_v33 = vadd.f32 %v1606_v18, %v3139_v3  ;;  %v1610_v34 = vadd.f32 %v1606_v18, %v3142_v11  ;;  %v1611_v41 = vadd.f32 %v1606_v18, %v3160_v30  ;;  %v1003_v51 = vadd.f32 %v1000_v14, %v3139_v3 }
 0x449   :  { %v1007_v23 = vadd.f32 %v3147_v16, %v1001_v21  ;;  %v3163_v31 = vadd.f32 %v3147_v16, %v1607_v25  ;;  %v1008_v36 = vadd.f32 %v3147_v16, %v1002_v27  ;;  %v3171_v43 = vadd.f32 %v3147_v16, %v1608_v32 }
 0x44a   :  { %v3174_v44 = vadd.f32 %v3147_v16, %v1609_v33  ;;  %v3177_v46 = vadd.f32 %v3147_v16, %v1610_v34  ;;  %v3181_v47 = vadd.f32 %v3147_v16, %v1611_v41  ;;  %v1009_v56 = vadd.f32 %v3147_v16, %v1003_v51 }
 0x44b   :  { %v1012_v26 = vmax.f32 %v1007_v23, 0.0  ;;  %v1013_v50 = vmax.f32 %v1008_v36, 0.0  ;;  %v1004_v58 = vadd.f32 %v1000_v14, %v3142_v11  ;;  %v1005_v20 = vadd.f32 %v1000_v14, %v3160_v30 }
 0x44c   :  { %v1218_v28 = vpop.f32.mrf.mxu0  ;;  %v1014_v42 = vmax.f32 %v1009_v56, 0.0  ;;  %v1297_v18 = vadd.f32 %v1296_v1, %v3100_v52  ;;  %v1298_v13 = vadd.f32 %v1296_v1, %v3130_v62  ;;  %v1299_v33 = vadd.f32 %v1296_v1, %v3139_v3 }
 0x44d   :  { %v1219_v29 = vadd.f32 %v3153_v22, %v1218_v28  ;;  %2430 = vmatmul.msk.f32.vlgmr.msrb.gmra.mxu2 %vm220_vm2, %v1012_v26  ;;  %v1011_v8 = vadd.f32 %v3147_v16, %v1005_v20  ;;  %v1301_v56 = vadd.f32 %v1296_v1, %v3160_v30  ;;  %v1617_v30 = vmax.f32 %v3163_v31, 0.0  ;;  %v2540_v20 = vld [vmem:[%s3856_s5 + $0x10] ss:$0 sm:$0xff]  ;;  %v998_v31 = vld [vmem:[%s3855_s4 + $0xe0] sm:$0xff] }
 0x44e   :  { %1649 = vmatpush.msrb.mxu2 %v993_v54  ;;  %v1302_v25 = vadd.f32 %v3147_v16, %v1297_v18  ;;  %v1303_v52 = vadd.f32 %v3147_v16, %v1298_v13  ;;  %v1304_v62 = vadd.f32 %v3147_v16, %v1299_v33  ;;  %1098 = vmatpush.msrb.mxu3 %v998_v31  ;;  %v996_v18 = vld [vmem:[%s3855_s4 + $0xd0] sm:$0xff] }
 0x44f   :  { %v1233_v35 = vmax.f32 %v1219_v29, 0.0  ;;  %v1016_v10 = vmax.f32 %v1011_v8, 0.0 }
 0x450   :  { %1650 = vmatpush.msrb.mxu2 %v992_v55  ;;  %v1307_v26 = vmax.f32 %v1302_v25, 0.0  ;;  %v1308_v32 = vmax.f32 %v1303_v52, 0.0  ;;  %v1309_v41 = vmax.f32 %v1304_v62, 0.0 }
 0x451   :  { %2445 = vmatmul.msk.f32.vlgmr.msra.gmra.mxu1 %vm220_vm2, %v1233_v35 }
 0x452   :  { %1651 = vmatpush.msrb.mxu2 %v3115_v37 }
 0x454   :  { %v1221_v53 = vpop.f32.mrf.mxu0  ;;  %1652 = vmatpush.msrb.mxu2 %v3120_v40  ;;  %v1010_v40 = vadd.f32 %v3147_v16, %v1004_v58 }
 0x455   :  { %v1222_v54 = vadd.f32 %v3153_v22, %v1221_v53  ;;  %2431 = vmatmul.msk.f32.gmra.mxu2 %vm220_vm2, %v1013_v50  ;;  %v1300_v50 = vadd.f32 %v1296_v1, %v3142_v11  ;;  %v1306_v11 = vadd.f32 %v3147_v16, %v1301_v56  ;;  %v1619_v1 = vmax.f32 %v3174_v44, 0.0 }
 0x456   :  { %v1015_v61 = vmax.f32 %v1010_v40, 0.0 }
 0x457   :  { %v1234_v55 = vmax.f32 %v1222_v54, 0.0  ;;  %v1305_v3 = vadd.f32 %v3147_v16, %v1300_v50 }
 0x459   :  { %2446 = vmatmul.msk.f32.gmra.mxu1 %vm220_vm2, %v1234_v55  ;;  %v1310_v55 = vmax.f32 %v1305_v3, 0.0 }
 0x45c   :  { %v1224_v59 = vpop.f32.mrf.mxu0 }
 0x45d   :  { %v1225_v37 = vadd.f32 %v3153_v22, %v1224_v59  ;;  %2432 = vmatmul.msk.f32.gmra.mxu2 %vm220_vm2, %v1014_v42 }
 0x45f   :  { %v1235_v60 = vmax.f32 %v1225_v37, 0.0  ;;  %v1311_v37 = vmax.f32 %v1306_v11, 0.0 }
 0x461   :  { %2447 = vmatmul.msk.f32.gmra.mxu1 %vm220_vm2, %v1235_v60 }
 0x464   :  { %v1227_v63 = vpop.f32.mrf.mxu0 }
 0x465   :  { %v1228_v0 = vadd.f32 %v3153_v22, %v1227_v63  ;;  %2433 = vmatmul.msk.f32.gmra.mxu2 %vm220_vm2, %v1015_v61 }
 0x467   :  { %v1236_v4 = vmax.f32 %v1228_v0, 0.0  ;;  %v3861_v0 = vmov 2  }
 0x468   :  { %2501 = vset.pattern.permute.xlu0 %v3861_v0  ;;  %2499 = vset.pattern.permute.xlu1 %v3861_v0 }
 0x469   :  { %2448 = vmatmul.msk.f32.gmra.mxu1 %vm220_vm2, %v1236_v4 }
 0x46c   :  { %v1230_v21 = vpop.f32.mrf.mxu0 }
 0x46d   :  { %v1231_v23 = vadd.f32 %v3153_v22, %v1230_v21  ;;  %2434 = vmatmul.msk.f32.gmra.mxu2 %vm220_vm2, %v1016_v10  ;;  %v997_v10 = vld [vmem:[%s3855_s4 + $0xd8] sm:$0xff] }
 0x46e   :  { %1099 = vmatpush.msrb.mxu3 %v997_v10 }
 0x46f   :  { %v1237_v14 = vmax.f32 %v1231_v23, 0.0  ;;  %v995_v23 = vld [vmem:[%s3855_s4 + $0xc8] sm:$0xff] }
 0x470   :  { %1100 = vmatpush.msrb.mxu3 %v996_v18 }
 0x471   :  { %2449 = vmatmul.msk.f32.gmra.mxu1 %vm220_vm2, %v1237_v14 }
 0x472   :  { %1101 = vmatpush.msrb.mxu3 %v995_v23 }
 0x474   :  { %v1509_v27 = vpop.f32.mrf.mxu0  ;;  %1391 = vmatpush.msra.mxu3 %v998_v31 }
 0x475   :  { %v1510_v28 = vadd.f32 %v3153_v22, %v1509_v27  ;;  %2450 = vmatmul.msk.f32.vlgmr.msra.gmra.mxu2 %vm220_vm2, %v1307_v26 }
 0x476   :  { %1392 = vmatpush.msra.mxu3 %v997_v10 }
 0x477   :  { %v1524_v29 = vmax.f32 %v1510_v28, 0.0 }
 0x478   :  { %1393 = vmatpush.msra.mxu3 %v996_v18 }
 0x479   :  { %2465 = vmatmul.msk.f32.vlgmr.msrb.gmra.mxu1 %vm220_vm2, %v1524_v29 }
 0x47a   :  { %1394 = vmatpush.msra.mxu3 %v995_v23 }
 0x47c   :  { %v1512_v34 = vpop.f32.mrf.mxu0 }
 0x47d   :  { %v1513_v35 = vadd.f32 %v3153_v22, %v1512_v34  ;;  %2451 = vmatmul.msk.f32.gmra.mxu2 %vm220_vm2, %v1308_v32  ;;  %v2668_v34 = vmov 3  }
 0x47f   :  { %v1525_v36 = vmax.f32 %v1513_v35, 0.0 }
 0x481   :  { %2466 = vmatmul.msk.f32.gmra.mxu1 %vm220_vm2, %v1525_v36 }
 0x484   :  { %v1515_v51 = vpop.f32.mrf.mxu0 }
 0x485   :  { %v1516_v53 = vadd.f32 %v3153_v22, %v1515_v51  ;;  %2452 = vmatmul.msk.f32.gmra.mxu2 %vm220_vm2, %v1309_v41 }
 0x487   :  { %v1526_v54 = vmax.f32 %v1516_v53, 0.0 }
 0x489   :  { %2467 = vmatmul.msk.f32.gmra.mxu1 %vm220_vm2, %v1526_v54 }
 0x48c   :  { %v1518_v42 = vpop.f32.mrf.mxu0 }
 0x48d   :  { %v1519_v58 = vadd.f32 %v3153_v22, %v1518_v42  ;;  %2453 = vmatmul.msk.f32.gmra.mxu2 %vm220_vm2, %v1310_v55 }
 0x48f   :  { %v1527_v59 = vmax.f32 %v1519_v58, 0.0 }
 0x491   :  { %2468 = vmatmul.msk.f32.gmra.mxu1 %vm220_vm2, %v1527_v59 }
 0x494   :  { %v1521_v60 = vpop.f32.mrf.mxu0 }
 0x495   :  { %v1522_v40 = vadd.f32 %v3153_v22, %v1521_v60  ;;  %2454 = vmatmul.msk.f32.gmra.mxu2 %vm220_vm2, %v1311_v37  ;;  %v1618_v22 = vmax.f32 %v3171_v43, 0.0  ;;  %v1620_v43 = vmax.f32 %v3177_v46, 0.0  ;;  %v1621_v46 = vmax.f32 %v3181_v47, 0.0  ;;  %v3288_v47 = vld [vmem:[%s3856_s5 + $0x38] ss:$0 sm:$0xff] }
 0x497   :  { %v1528_v61 = vmax.f32 %v1522_v40, 0.0  ;;  %v3317_v40 = vpop.permute.xlu0 %834 }
 0x498   :  { %3873 = vst [vmem:[#allocation4_spill] sm:$0xff] %v3317_v40 }
 0x499   :  { %2469 = vmatmul.msk.f32.gmra.mxu1 %vm220_vm2, %v1528_v61  ;;  %v3320_v61 = vpop.permute.xlu2 %794 }
 0x49d   :  { %2470 = vmatmul.msk.f32.vlgmr.msrb.gmra.mxu2 %vm220_vm2, %v1617_v30 }
 0x49f   :  { %v589_v16 = vpop.f32.mrf.mxu2 }
 0x4a0   :  { %v3233_v63 = vadd.f32 %v2540_v20, %v589_v16 }
 0x4a2   :  { %629 = vrot.lane.b32.xlu2 %v3233_v63, %s2665_s20  ;;  %609 = vrot.lane.b32.xlu0 %v3233_v63, %s2666_s21 }
 0x4a5   :  { %2471 = vmatmul.msk.f32.gmra.mxu2 %vm220_vm2, %v1618_v22 }
 0x4ac   :  { %v592_v4 = vpop.f32.mrf.mxu2 }
 0x4ad   :  { %v3247_v8 = vadd.f32 %v2540_v20, %v592_v4  ;;  %2472 = vmatmul.msk.f32.gmra.mxu2 %vm220_vm2, %v1619_v1 }
 0x4af   :  { %611 = vrot.lane.b32.xlu0 %v3247_v8, %s2666_s21 }
 0x4b4   :  { %v595_v21 = vpop.f32.mrf.mxu2 }
 0x4b5   :  { %v3259_v44 = vadd.f32 %v2540_v20, %v595_v21  ;;  %2473 = vmatmul.msk.f32.gmra.mxu2 %vm220_vm2, %v1620_v43 }
 0x4b7   :  { %613 = vrot.lane.b32.xlu1 %v3259_v44, %s2666_s21  ;;  %631 = vrot.lane.b32.xlu0 %v3247_v8, %s2665_s20 }
 0x4bc   :  { %v598_v14 = vpop.f32.mrf.mxu2 }
 0x4bd   :  { %v3270_v25 = vadd.f32 %v2540_v20, %v598_v14  ;;  %2474 = vmatmul.msk.f32.gmra.mxu2 %vm220_vm2, %v1621_v46 }
 0x4bf   :  { %633 = vrot.lane.b32.xlu1 %v3259_v44, %s2665_s20  ;;  %635 = vrot.lane.b32.xlu2 %v3270_v25, %s2665_s20 }
 0x4c4   :  { %v601_v26 = vpop.f32.mrf.mxu2 }
 0x4c5   :  { %v3277_v13 = vadd.f32 %v2540_v20, %v601_v26 }
 0x4c7   :  { %615 = vrot.lane.b32.xlu1 %v3270_v25, %s2666_s21  ;;  %617 = vrot.lane.b32.xlu2 %v3277_v13, %s2666_s21 }
 0x4c8   :  { %637 = vrot.lane.b32.xlu0 %v3277_v13, %s2665_s20 }
 0x4cf   :  { %1937 = vperm.xlu1 %2499, %v2888_v9   ;;  %1921 = vperm.xlu2 %2498, %v2945_v19  }
 0x4d0   :  { %1945 = vperm.xlu0 %2501, %v2923_v15   ;;  %v1050_v27 = vpop.f32.mrf.mxu2 }
 0x4d1   :  { %v1051_v28 = vadd.f32 %v3288_v47, %v1050_v27 }
 0x4d3   :  { %v1065_v29 = vmax.f32 %v1051_v28, 0.0 }
 0x4d5   :  { %2435 = vmatmul.msk.f32.vlgmr.msrb.gmra.mxu3 %vm220_vm2, %v1065_v29 }
 0x4d6   :  { %1701 = vmatpush.msrb.mxu3 %v998_v31 }
 0x4d7   :  { %1949 = vperm.xlu1 %2499, %v2934_v17   ;;  %2500 = vset.pattern.permute.xlu2 %v3861_v0 }
 0x4d8   :  { %v1053_v52 = vpop.f32.mrf.mxu2  ;;  %1941 = vperm.xlu2 %2500, %v2905_v12   ;;  %1702 = vmatpush.msrb.mxu3 %v997_v10 }
 0x4d9   :  { %v1054_v32 = vadd.f32 %v3288_v47, %v1053_v52  ;;  %2505 = vset.pattern.permute.xlu0 %v3859_v6 }
 0x4da   :  { %1703 = vmatpush.msrb.mxu3 %v996_v18 }
 0x4db   :  { %v1066_v33 = vmax.f32 %v1054_v32, 0.0 }
 0x4dc   :  { %1704 = vmatpush.msrb.mxu3 %v995_v23  ;;  %v3327_v23 = vpop.permute.xlu1 %814 }
 0x4dd   :  { %2436 = vmatmul.msk.f32.gmra.mxu3 %vm220_vm2, %v1066_v33 }
 0x4df   :  { %2502 = vset.pattern.permute.xlu1 %v2668_v34 }
 0x4e0   :  { %v1056_v35 = vpop.f32.mrf.mxu2  ;;  %1969 = vperm.xlu1 %2502, %v2888_v9   ;;  %1953 = vperm.xlu2 %2500, %v2945_v19  }
 0x4e1   :  { %v1057_v36 = vadd.f32 %v3288_v47, %v1056_v35 }
 0x4e3   :  { %v1067_v62 = vmax.f32 %v1057_v36, 0.0 }
 0x4e5   :  { %2437 = vmatmul.msk.f32.gmra.mxu3 %vm220_vm2, %v1067_v62 }
 0x4e8   :  { %v1059_v41 = vpop.f32.mrf.mxu2  ;;  %2503 = vset.pattern.permute.xlu1 %v3859_v6  ;;  %2504 = vset.pattern.permute.xlu2 %v3859_v6 }
 0x4e9   :  { %v1060_v50 = vadd.f32 %v3288_v47, %v1059_v41 }
 0x4eb   :  { %v1068_v51 = vmax.f32 %v1060_v50, 0.0 }
 0x4ed   :  { %2438 = vmatmul.msk.f32.gmra.mxu3 %vm220_vm2, %v1068_v51 }
 0x4f0   :  { %v1062_v53 = vpop.f32.mrf.mxu2 }
 0x4f1   :  { %v1063_v9 = vadd.f32 %v3288_v47, %v1062_v53 }
 0x4f3   :  { %v1069_v54 = vmax.f32 %v1063_v9, 0.0 }
 0x4f5   :  { %2439 = vmatmul.msk.f32.gmra.mxu3 %vm220_vm2, %v1069_v54  ;;  %v1271_v54 = vpop.f32.mrf.mxu1 }
 0x4f8   :  { %v1344_v3 = vpop.f32.mrf.mxu2 }
 0x4f9   :  { %v1345_v55 = vadd.f32 %v3288_v47, %v1344_v3 }
 0x4fb   :  { %v1359_v56 = vmax.f32 %v1345_v55, 0.0 }
 0x4fc   :  { %v630_v1 = vpop.permute.xlu2 %629 }
 0x4fd   :  { %2455 = vmatmul.msk.f32.vlgmr.msra.gmra.mxu3 %vm220_vm2, %v1359_v56 }
 0x500   :  { %v1347_v42 = vpop.f32.mrf.mxu2 }
 0x501   :  { %v1348_v58 = vadd.f32 %v3288_v47, %v1347_v42 }
 0x503   :  { %v1360_v59 = vmax.f32 %v1348_v58, 0.0 }
 0x505   :  { %2456 = vmatmul.msk.f32.gmra.mxu3 %vm220_vm2, %v1360_v59 }
 0x508   :  { %v1350_v11 = vpop.f32.mrf.mxu2 }
 0x509   :  { %v1351_v37 = vadd.f32 %v3288_v47, %v1350_v11 }
 0x50b   :  { %v1361_v60 = vmax.f32 %v1351_v37, 0.0 }
 0x50d   :  { %2457 = vmatmul.msk.f32.gmra.mxu3 %vm220_vm2, %v1361_v60 }
 0x510   :  { %v1353_v30 = vpop.f32.mrf.mxu2 }
 0x511   :  { %v1354_v20 = vadd.f32 %v3288_v47, %v1353_v30 }
 0x513   :  { %v1362_v16 = vmax.f32 %v1354_v20, 0.0  ;;  %v1274_v20 = vpop.f32.mrf.mxu1 }
 0x514   :  { %v610_v22 = vpop.permute.xlu0 %609 }
 0x515   :  { %v624_v31 = vmax.f32 %v3233_v63, %v610_v22  ;;  %2458 = vmatmul.msk.f32.gmra.mxu3 %vm220_vm2, %v1362_v16  ;;  %v3346_v16 = vld [vmem:[%s3851_s2 + $0xfa] ss:$0 sm:$0xff] }
 0x517   :  { %v644_v4 = vmax.f32 %v624_v31, %v630_v1 }
 0x518   :  { %v1356_v43 = vpop.f32.mrf.mxu2 }
 0x519   :  { %v1357_v10 = vadd.f32 %v3288_v47, %v1356_v43  ;;  %651 = vperm.xlu1 %2503, %v644_v4   ;;  %v636_v36 = vpop.permute.xlu2 %635 }
 0x51b   :  { %v1363_v18 = vmax.f32 %v1357_v10, 0.0 }
 0x51d   :  { %2459 = vmatmul.msk.f32.gmra.mxu3 %vm220_vm2, %v1363_v18 }
 0x520   :  { %v1654_v21 = vpop.f32.mrf.mxu2 }
 0x521   :  { %v1655_v46 = vadd.f32 %v3288_v47, %v1654_v21  ;;  %v612_v14 = vpop.permute.xlu0 %611  ;;  %v618_v3 = vpop.permute.xlu2 %617 }
 0x522   :  { %v625_v28 = vmax.f32 %v3247_v8, %v612_v14  ;;  %v628_v56 = vmax.f32 %v3277_v13, %v618_v3 }
 0x523   :  { %v1669_v26 = vmax.f32 %v1655_v46, 0.0  ;;  %v1277_v46 = vpop.f32.mrf.mxu1 }
 0x525   :  { %2475 = vmatmul.msk.f32.vlgmr.msrb.gmra.mxu3 %vm220_vm2, %v1669_v26 }
 0x528   :  { %v1657_v27 = vpop.f32.mrf.mxu2 }
 0x529   :  { %v1658_v29 = vadd.f32 %v3288_v47, %v1657_v27  ;;  %v614_v52 = vpop.permute.xlu1 %613  ;;  %v632_v32 = vpop.permute.xlu0 %631 }
 0x52a   :  { %v645_v35 = vmax.f32 %v625_v28, %v632_v32  ;;  %v626_v62 = vmax.f32 %v3259_v44, %v614_v52  ;;  %v1922_v32 = vpop.permute.xlu2 %1921 }
 0x52b   :  { %v1670_v33 = vmax.f32 %v1658_v29, 0.0  ;;  %v1280_v26 = vpop.f32.mrf.mxu1 }
 0x52c   :  { %656 = vperm.xlu2 %2504, %v645_v35  }
 0x52d   :  { %2476 = vmatmul.msk.f32.gmra.mxu3 %vm220_vm2, %v1670_v33 }
 0x530   :  { %v1660_v41 = vpop.f32.mrf.mxu2 }
 0x531   :  { %v1661_v50 = vadd.f32 %v3288_v47, %v1660_v41  ;;  %v634_v51 = vpop.permute.xlu1 %633 }
 0x532   :  { %v646_v53 = vmax.f32 %v626_v62, %v634_v51  ;;  %v1942_v33 = vpop.permute.xlu2 %1941 }
 0x533   :  { %v1671_v9 = vmax.f32 %v1661_v50, 0.0 }
 0x534   :  { %661 = vperm.xlu0 %2505, %v646_v53  }
 0x535   :  { %2477 = vmatmul.msk.f32.gmra.mxu3 %vm220_vm2, %v1671_v9 }
 0x538   :  { %v1663_v55 = vpop.f32.mrf.mxu2 }
 0x539   :  { %v1664_v42 = vadd.f32 %v3288_v47, %v1663_v55  ;;  %v616_v58 = vpop.permute.xlu1 %615 }
 0x53a   :  { %v627_v59 = vmax.f32 %v3270_v25, %v616_v58  ;;  %v638_v11 = vpop.permute.xlu0 %637  ;;  %v3399_v35 = vpop.permute.xlu2 %1953 }
 0x53b   :  { %v1672_v37 = vmax.f32 %v1664_v42, 0.0  ;;  %v648_v60 = vmax.f32 %v628_v56, %v638_v11 }
 0x53c   :  { %v647_v30 = vmax.f32 %v627_v59, %v636_v36  ;;  %2507 = vset.pattern.permute.xlu0 %v2668_v34 }
 0x53d   :  { %671 = vperm.xlu2 %2504, %v648_v60   ;;  %2478 = vmatmul.msk.f32.gmra.mxu3 %vm220_vm2, %v1672_v37 }
 0x53e   :  { %1977 = vperm.xlu0 %2507, %v2923_v15   ;;  %666 = vperm.xlu1 %2503, %v647_v30  }
 0x540   :  { %v1666_v22 = vpop.f32.mrf.mxu2 }
 0x541   :  { %v1667_v31 = vadd.f32 %v3288_v47, %v1666_v22  ;;  %v1938_v1 = vpop.permute.xlu1 %1937 }
 0x542   :  { %v1957_v4 = vmul.f32 %v3346_v16, %v1938_v1  ;;  %v1946_v43 = vpop.permute.xlu0 %1945 }
 0x543   :  { %v1673_v10 = vmax.f32 %v1667_v31, 0.0  ;;  %v1959_v18 = vmul.f32 %v3346_v16, %v1946_v43 }
 0x544   :  { %v1962_v21 = vadd.f32 %v1957_v4, %v3019_v45 }
 0x545   :  { %v3353_v15 = vadd.f32 %v1959_v18, %v3051_v24  ;;  %2506 = vset.pattern.permute.xlu2 %v2668_v34  ;;  %2479 = vmatmul.msk.f32.gmra.mxu3 %vm220_vm2, %v1673_v10  ;;  %v3366_v24 = vld [vmem:[%s3856_s5 + $0x28] ss:$0 sm:$0xff]  ;;  %v2661_v10 = vld [vmem:[%s3851_s2 + $0xf8] ss:$0 sm:$0xff] }
 0x546   :  { %2508 = vset.pattern.permute.xlu0 %v3859_v6  ;;  %1973 = vperm.xlu2 %2506, %v2905_v12   ;;  %v3385_v27 = vadd.f32 %v3366_v24, %v1274_v20  ;;  %v3388_v28 = vadd.f32 %v3366_v24, %v1277_v46  ;;  %v3394_v52 = vadd.f32 %v3366_v24, %v1280_v26 }
 0x547   :  { %1882 = vperm.xlu0 %2508, %v2905_v12   ;;  %2509 = vset.pattern.permute.xlu1 %v2668_v34  ;;  %v3373_v12 = vadd.f32 %v3366_v24, %v1271_v54  ;;  %v1958_v46 = vmul.f32 %v3346_v16, %v1942_v33 }
 0x548   :  { %1981 = vperm.xlu1 %2509, %v2934_v17   ;;  %v3379_v17 = vld [vmem:[%s3851_s2 + $0xfb] ss:$0 sm:$0xff]  ;;  %3874 = vst [vmem:[#allocation5_spill] sm:$0xff] %v3388_v28 }
 0x549   :  { %v1950_v47 = vpop.permute.xlu1 %1949  ;;  %3875 = vst [vmem:[#allocation6_spill] sm:$0xff] %v3394_v52 }
 0x54a   :  { %v1960_v45 = vmul.f32 %v3346_v16, %v1950_v47 }
 0x54c   :  { %v3369_v14 = vadd.f32 %v1960_v45, %v3066_v49 }
 0x54e   :  { %1985 = vperm.xlu2 %2506, %v2945_v19  }
 0x54f   :  { %1894 = vperm.xlu0 %2508, %v2945_v19  }
 0x550   :  { %2510 = vset.pattern.permute.xlu1 %v3859_v6 }
 0x551   :  { %2103 = vperm.xlu1 %2510, %v3373_v12  }
 0x552   :  { %v1970_v34 = vpop.permute.xlu1 %1969 }
 0x553   :  { %v1989_v49 = vmul.f32 %v3379_v17, %v1970_v34 }
 0x555   :  { %v3390_v29 = vadd.f32 %v1989_v49, %v1962_v21 }
 0x556   :  { %2511 = vset.pattern.permute.xlu2 %v3859_v6 }
 0x557   :  { %2113 = vperm.xlu0 %2508, %v3388_v28   ;;  %2108 = vperm.xlu2 %2511, %v3385_v27  }
 0x559   :  { %2118 = vperm.xlu1 %2510, %v3394_v52  }
 0x586   :  { %v657_v36 = vpop.permute.xlu2 %656 }
 0x587   :  { %v3402_v62 = vsub.f32 %v3247_v8, %v657_v36 }
 0x589   :  { %v681_v41 = vmul.f32 1.442695, %v3402_v62 }
 0x58b   :  { %v652_v50 = vpop.permute.xlu1 %651  ;;  %2560 = vpow2.f32 %v681_v41 }
 0x58c   :  { %v3406_v51 = vsub.f32 %v3233_v63, %v652_v50  ;;  %v1283_v63 = vpop.f32.mrf.mxu1 }
 0x58d   :  { %v3463_v26 = vadd.f32 %v3366_v24, %v1283_v63 }
 0x58e   :  { %v679_v53 = vmul.f32 1.442695, %v3406_v51 }
 0x58f   :  { %3876 = vst [vmem:[#allocation7_spill] sm:$0xff] %v3463_v26 }
 0x590   :  { %2562 = vpow2.f32 %v679_v53 }
 0x591   :  { %v3409_v9 = vpop.eup %2560 }
 0x592   :  { %696 = vrot.lane.b32.xlu2 %v3409_v9, %s2666_s21 }
 0x594   :  { %v1561_v58 = vpop.f32.mrf.mxu1 }
 0x596   :  { %v3413_v54 = vpop.eup %2562 }
 0x597   :  { %714 = vrot.lane.b32.xlu0 %v3413_v54, %s2665_s20  ;;  %694 = vrot.lane.b32.xlu1 %v3413_v54, %s2666_s21  ;;  %v672_v55 = vpop.permute.xlu2 %671 }
 0x598   :  { %v3426_v42 = vsub.f32 %v3277_v13, %v672_v55  ;;  %v1961_v55 = vmul.f32 %v3346_v16, %v3399_v35 }
 0x59a   :  { %v687_v59 = vmul.f32 1.442695, %v3426_v42 }
 0x59c   :  { %v1564_v22 = vpop.f32.mrf.mxu1 }
 0x59f   :  { %716 = vrot.lane.b32.xlu1 %v3409_v9, %s2665_s20 }
 0x5a0   :  { %v1974_v1 = vpop.permute.xlu2 %1973 }
 0x5a4   :  { %v1567_v36 = vpop.f32.mrf.mxu1 }
 0x5a6   :  { %v662_v8 = vpop.permute.xlu0 %661 }
 0x5a7   :  { %v3422_v3 = vsub.f32 %v3259_v44, %v662_v8 }
 0x5a8   :  { %v1986_v8 = vpop.permute.xlu2 %1985 }
 0x5a9   :  { %v683_v56 = vmul.f32 1.442695, %v3422_v3  ;;  %v1993_v63 = vmul.f32 %v3379_v17, %v1986_v8 }
 0x5ab   :  { %2564 = vpow2.f32 %v683_v56 }
 0x5ac   :  { %2566 = vpow2.f32 %v687_v59  ;;  %v1570_v52 = vpop.f32.mrf.mxu1 }
 0x5b0   :  { %v1978_v11 = vpop.permute.xlu0 %1977  ;;  %v667_v30 = vpop.permute.xlu1 %666 }
 0x5b1   :  { %v3429_v37 = vpop.eup %2564  ;;  %v1991_v60 = vmul.f32 %v3379_v17, %v1978_v11  ;;  %v3433_v20 = vsub.f32 %v3270_v25, %v667_v30  ;;  %v2660_v25 = vld [vmem:[%s3851_s2 + $0xf9] ss:$0 sm:$0xff] }
 0x5b2   :  { %718 = vrot.lane.b32.xlu2 %v3429_v37, %s2665_s20  ;;  %698 = vrot.lane.b32.xlu0 %v3429_v37, %s2666_s21  ;;  %v3443_v31 = vpop.eup %2566  ;;  %v1926_v43 = vmul.f32 %v2660_v25, %v3022_v48  ;;  %v1990_v48 = vmul.f32 %v3379_v17, %v1974_v1  ;;  %v1929_v53 = vmul.f32 %v2660_v25, %v1922_v32 }
 0x5b3   :  { %v3440_v44 = vadd.f32 %v1991_v60, %v3353_v15  ;;  %v685_v13 = vmul.f32 1.442695, %v3433_v20  ;;  %v3478_v32 = vadd.f32 %v3366_v24, %v1564_v22  ;;  %v3484_v60 = vadd.f32 %v3366_v24, %v1561_v58 }
 0x5b5   :  { %2568 = vpow2.f32 %v685_v13 }
 0x5b9   :  { %v1883_v4 = vpop.permute.xlu0 %1882 }
 0x5ba   :  { %v1899_v18 = vmul.f32 %v2661_v10, %v1883_v4  ;;  %v1982_v21 = vpop.permute.xlu1 %1981  ;;  %702 = vrot.lane.b32.xlu2 %v3443_v31, %s2666_s21 }
 0x5bb   :  { %v1992_v15 = vmul.f32 %v3379_v17, %v1982_v21  ;;  %v2569_v47 = vpop.eup %2568  ;;  %v3493_v17 = vpop.permute.xlu2 %2108 }
 0x5bc   :  { %v1931_v45 = vadd.f32 %v1926_v43, %v1899_v18  ;;  %700 = vrot.lane.b32.xlu1 %v2569_v47, %s2666_s21  ;;  %720 = vrot.lane.b32.xlu0 %v2569_v47, %s2665_s20 }
 0x5bd   :  { %v3457_v34 = vadd.f32 %v1992_v15, %v3369_v14  ;;  %v3469_v14 = vadd.f32 %v3366_v24, %v1567_v36 }
 0x5be   :  { %v1963_v49 = vadd.f32 %v1958_v46, %v1931_v45 }
 0x5bf   :  { %3877 = vst [vmem:[#allocation8_spill] sm:$0xff] %v3469_v14 }
 0x5c0   :  { %v3465_v41 = vadd.f32 %v1990_v48, %v1963_v49 }
 0x5c1   :  { %v1895_v50 = vpop.permute.xlu0 %1894 }
 0x5c2   :  { %v1902_v33 = vmul.f32 %v2661_v10, %v1895_v50  ;;  %2123 = vperm.xlu2 %2511, %v3463_v26  }
 0x5c3   :  { %v3487_v16 = vpop.permute.xlu1 %2103 }
 0x5c4   :  { %v1934_v56 = vadd.f32 %v1929_v53, %v1902_v33  ;;  %722 = vrot.lane.b32.xlu1 %v3443_v31, %s2665_s20  ;;  %2150 = vperm.xlu0 %2508, %v3469_v14  }
 0x5c6   :  { %v1966_v59 = vadd.f32 %v1961_v55, %v1934_v56 }
 0x5c8   :  { %v3480_v11 = vadd.f32 %v1993_v63, %v1966_v59  ;;  %v3499_v59 = vpop.f32.mrf.mxu3 }
 0x5c9   :  { %v3491_v30 = vpop.permute.xlu0 %2113 }
 0x5ca   :  { %2145 = vperm.xlu2 %2511, %v3478_v32  }
 0x5cb   :  { %v3489_v35 = vpop.permute.xlu1 %2118 }
 0x5cc   :  { %2140 = vperm.xlu1 %2510, %v3484_v60  }
 0x5ec   :  { %v697_v25 = vpop.permute.xlu2 %696 }
 0x5ed   :  { %v710_v58 = vadd.f32 %v3409_v9, %v697_v25  ;;  %v1106_v25 = vpop.f32.mrf.mxu3 }
 0x609   :  { %v695_v13 = vpop.permute.xlu1 %694  ;;  %v715_v1 = vpop.permute.xlu0 %714 }
 0x60a   :  { %v709_v22 = vadd.f32 %v3413_v54, %v695_v13 }
 0x60c   :  { %v729_v4 = vadd.f32 %v715_v1, %v709_v22  ;;  %v719_v49 = vpop.permute.xlu2 %718 }
 0x60e   :  { %2570 = vlog2.f32 %v729_v4 }
 0x611   :  { %v717_v43 = vpop.permute.xlu1 %716 }
 0x612   :  { %v730_v10 = vadd.f32 %v717_v43, %v710_v58 }
 0x614   :  { %v2571_v18 = vpop.eup %2570  ;;  %2572 = vlog2.f32 %v730_v10  ;;  %v703_v55 = vpop.permute.xlu2 %702 }
 0x615   :  { %v735_v21 = vmul.f32 0.6931472, %v2571_v18  ;;  %v713_v56 = vadd.f32 %v3443_v31, %v703_v55 }
 0x617   :  { %746 = vperm.xlu2 %2511, %v735_v21  }
 0x61a   :  { %v2573_v15 = vpop.eup %2572 }
 0x61b   :  { %v737_v46 = vmul.f32 0.6931472, %v2573_v15 }
 0x61c   :  { %v3503_v43 = vpop.permute.xlu2 %2123 }
 0x61d   :  { %751 = vperm.xlu0 %2508, %v737_v46  }
 0x624   :  { %v699_v45 = vpop.permute.xlu0 %698  ;;  %v3505_v18 = vpop.permute.xlu2 %2145 }
 0x625   :  { %v711_v48 = vadd.f32 %v3429_v37, %v699_v45  ;;  %3878 = vst [vmem:[#allocation9_spill] sm:$0xff] %v3505_v18 }
 0x627   :  { %v731_v54 = vadd.f32 %v719_v49, %v711_v48 }
 0x629   :  { %2574 = vlog2.f32 %v731_v54 }
 0x62e   :  { %v701_v50 = vpop.permute.xlu1 %700  ;;  %v721_v9 = vpop.permute.xlu0 %720 }
 0x62f   :  { %v2575_v36 = vpop.eup %2574  ;;  %v712_v53 = vadd.f32 %v2569_v47, %v701_v50  ;;  %v1109_v47 = vpop.f32.mrf.mxu3 }
 0x630   :  { %v739_v33 = vmul.f32 0.6931472, %v2575_v36 }
 0x631   :  { %v732_v8 = vadd.f32 %v721_v9, %v712_v53 }
 0x632   :  { %756 = vperm.xlu1 %2510, %v739_v33  }
 0x633   :  { %2576 = vlog2.f32 %v732_v8 }
 0x636   :  { %v723_v63 = vpop.permute.xlu1 %722  ;;  %v3516_v36 = vpop.permute.xlu0 %2150 }
 0x637   :  { %v733_v13 = vadd.f32 %v723_v63, %v713_v56  ;;  %v3501_v58 = vpop.f32.mrf.mxu3  ;;  %3879 = vst [vmem:[#allocation10_spill] sm:$0xff] %v3516_v36 }
 0x639   :  { %v2577_v22 = vpop.eup %2576  ;;  %2578 = vlog2.f32 %v733_v13 }
 0x63a   :  { %v741_v37 = vmul.f32 0.6931472, %v2577_v22 }
 0x63c   :  { %761 = vperm.xlu2 %2511, %v741_v37  }
 0x63e   :  { %v3530_v63 = vpop.permute.xlu1 %2140 }
 0x63f   :  { %v2579_v1 = vpop.eup %2578  ;;  %v1115_v10 = vpop.f32.mrf.mxu3  ;;  %3880 = vst [vmem:[#allocation11_spill] sm:$0xff] %v3530_v63 }
 0x640   :  { %v743_v4 = vmul.f32 0.6931472, %v2579_v1 }
 0x642   :  { %766 = vperm.xlu0 %2508, %v743_v4  }
 0x647   :  { %v1396_v31 = vpop.f32.mrf.mxu3 }
 0x64f   :  { %v3508_v46 = vpop.f32.mrf.mxu3 }
 0x657   :  { %v1402_v54 = vpop.f32.mrf.mxu3 }
 0x671   :  { %v747_v21 = vpop.permute.xlu2 %746 }
 0x672   :  { %v769_v15 = vsub.f32 %v3406_v51, %v747_v21  ;;  %v3518_v51 = vpop.f32.mrf.mxu3 }
 0x674   :  { %v774_v45 = vmul.f32 1.442695, %v769_v15  ;;  %2002 = vperm.xlu1 %2510, %v769_v15  }
 0x676   :  { %2580 = vpow2.f32 %v774_v45 }
 0x67a   :  { %v3524_v33 = vpop.f32.mrf.mxu3 }
 0x67c   :  { %v3510_v48 = vpop.eup %2580  ;;  %2512 = vset.pattern.permute.xlu1 %v3858_v5 }
 0x67d   :  { %2038 = vperm.xlu1 %2512, %v769_v15   ;;  %v1771_v49 = vmax.f32 %v3510_v48, 1e-10 }
 0x67f   :  { %1786 = vrot.lane.b32.xlu0 %v1771_v49, %s2665_s20 }
 0x682   :  { %v1706_v56 = vpop.f32.mrf.mxu3 }
 0x685   :  { %2513 = vset.pattern.permute.xlu1 %v3861_v0 }
 0x686   :  { %2070 = vperm.xlu1 %2513, %v769_v15  }
 0x68a   :  { %v3545_v15 = vpop.f32.mrf.mxu3 }
 0x68e   :  { %1581 = vrot.lane.b32.xlu1 %v3510_v48, %s2666_s21 }
 0x68f   :  { %v752_v50 = vpop.permute.xlu0 %751  ;;  %2518 = vset.pattern.permute.xlu1 %v3859_v6 }
 0x690   :  { %v770_v53 = vsub.f32 %v3402_v62, %v752_v50  ;;  %v3536_v62 = vld [vmem:[%s3856_s5 + $0x40] ss:$0 sm:$0xff] }
 0x691   :  { %v3539_v13 = vadd.f32 %v3536_v62, %v1106_v25  ;;  %v3548_v45 = vadd.f32 %v3536_v62, %v1109_v47  ;;  %v3551_v50 = vadd.f32 %v3536_v62, %v1115_v10  ;;  %v3562_v10 = vadd.f32 %v3536_v62, %v1396_v31 }
 0x692   :  { %v776_v9 = vmul.f32 1.442695, %v770_v53  ;;  %2007 = vperm.xlu2 %2511, %v770_v53   ;;  %v3621_v39 = vadd.f32 %v3536_v62, %v3508_v46 }
 0x693   :  { %v1124_v1 = vand.u32 2147483647, %v3539_v13  ;;  %v1416_v31 = vand.u32 2147483647, %v3562_v10  ;;  %v1119_v26 = vmax.f32 %v3539_v13, 0.0 }
 0x694   :  { %2582 = vpow2.f32 %v776_v9  ;;  %v1417_v40 = vand.u32 2147483647, %v3621_v39 }
 0x695   :  { %v1129_v25 = vsub.f32 0.0, %v1124_v1 }
 0x696   :  { %v762_v22 = vpop.permute.xlu2 %761  ;;  %v1422_v13 = vsub.f32 0.0, %v1417_v40 }
 0x697   :  { %v772_v37 = vsub.f32 %v3433_v20, %v762_v22  ;;  %v1125_v20 = vand.u32 2147483647, %v3548_v45  ;;  %v1135_v9 = vmul.f32 1.442695, %v1129_v25 }
 0x69a   :  { %v3526_v8 = vpop.eup %2582  ;;  %2514 = vset.pattern.permute.xlu2 %v3858_v5 }
 0x69b   :  { %2042 = vperm.xlu2 %2514, %v770_v53   ;;  %v1772_v55 = vmax.f32 %v3526_v8, 1e-10 }
 0x69d   :  { %1788 = vrot.lane.b32.xlu1 %v1772_v55, %s2665_s20  ;;  %v3565_v55 = vpop.f32.mrf.mxu3 }
 0x6a3   :  { %2515 = vset.pattern.permute.xlu2 %v3861_v0 }
 0x6a4   :  { %2074 = vperm.xlu2 %2515, %v770_v53   ;;  %v757_v4 = vpop.permute.xlu1 %756  ;;  %v1130_v53 = vsub.f32 0.0, %v1125_v20  ;;  %v780_v20 = vmul.f32 1.442695, %v772_v37 }
 0x6a5   :  { %v771_v21 = vsub.f32 %v3422_v3, %v757_v4  ;;  %2017 = vperm.xlu1 %2518, %v772_v37   ;;  %v1127_v3 = vand.u32 2147483647, %v3551_v50  ;;  %v3569_v4 = vadd.f32 %v3536_v62, %v1402_v54  ;;  %v3882_v54 = vmov 2  }
 0x6a6   :  { %v1137_v25 = vmul.f32 1.442695, %v1130_v53  ;;  %v3585_v53 = vadd.f32 %v3536_v62, %v3518_v51 }
 0x6a7   :  { %v778_v49 = vmul.f32 1.442695, %v771_v21  ;;  %2012 = vperm.xlu0 %2508, %v771_v21   ;;  %v1132_v1 = vsub.f32 0.0, %v1127_v3 }
 0x6a9   :  { %2584 = vpow2.f32 %v778_v49  ;;  %v3573_v49 = vadd.f32 %v3536_v62, %v3499_v59  ;;  %v1421_v59 = vsub.f32 0.0, %v1416_v31  ;;  %v1715_v31 = vpop.f32.mrf.mxu3 }
 0x6aa   :  { %2586 = vpow2.f32 %v1135_v9  ;;  %v1141_v9 = vmul.f32 1.442695, %v1132_v1 }
 0x6ab   :  { %v1123_v36 = vand.u32 2147483647, %v3573_v49  ;;  %2588 = vpow2.f32 %v1137_v25  ;;  %v3594_v25 = vadd.f32 %v3536_v62, %v3501_v58  ;;  %v1426_v18 = vmul.f32 1.442695, %v1421_v59 }
 0x6ac   :  { %1583 = vrot.lane.b32.xlu2 %v3526_v8, %s2666_s21  ;;  %2590 = vpow2.f32 %v780_v20 }
 0x6ad   :  { %2519 = vset.pattern.permute.xlu1 %v3858_v5  ;;  %2521 = vset.pattern.permute.xlu2 %v3859_v6  ;;  %2592 = vpow2.f32 %v1141_v9  ;;  %v1128_v51 = vsub.f32 0.0, %v1123_v36  ;;  %v3604_v36 = vadd.f32 %v3536_v62, %v3545_v15 }
 0x6ae   :  { %2050 = vperm.xlu1 %2519, %v772_v37  }
 0x6af   :  { %v3559_v47 = vpop.eup %2584  ;;  %2516 = vset.pattern.permute.xlu0 %v3858_v5  ;;  %v1418_v5 = vand.u32 2147483647, %v3569_v4  ;;  %v1133_v58 = vmul.f32 1.442695, %v1128_v51 }
 0x6b0   :  { %3881 = vst [vmem:[#allocation12_spill] sm:$0xff] %v3559_v47  ;;  %2046 = vperm.xlu0 %2516, %v771_v21   ;;  %v1773_v22 = vmax.f32 %v3559_v47, 1e-10  ;;  %v2587_v0 = vpop.eup %2586 }
 0x6b1   :  { %v1144_v1 = vadd.f32 1.0, %v2587_v0  ;;  %v2589_v20 = vpop.eup %2588 }
 0x6b2   :  { %v1145_v59 = vadd.f32 1.0, %v2589_v20  ;;  %v1727_v20 = vand.u32 2147483647, %v3604_v36 }
 0x6b4   :  { %1790 = vrot.lane.b32.xlu2 %v1773_v22, %s2665_s20  ;;  %v767_v6 = vpop.permute.xlu0 %766 }
 0x6b5   :  { %v3579_v3 = vsub.f32 %v3426_v42, %v767_v6  ;;  %v1423_v6 = vsub.f32 0.0, %v1418_v5  ;;  %v3590_v42 = vadd.f32 %v3536_v62, %v1706_v56  ;;  %v3599_v56 = vpop.eup %2590 }
 0x6b6   :  { %2520 = vset.pattern.permute.xlu1 %v3882_v54  ;;  %3883 = vst [vmem:[#allocation13_spill] sm:$0xff] %v3599_v56  ;;  %v2593_v9 = vpop.eup %2592  ;;  %v1774_v46 = vmax.f32 %v3599_v56, 1e-10 }
 0x6b7   :  { %2082 = vperm.xlu1 %2520, %v772_v37   ;;  %v782_v22 = vmul.f32 1.442695, %v3579_v3  ;;  %v1419_v37 = vand.u32 2147483647, %v3585_v53  ;;  %v1430_v0 = vmul.f32 1.442695, %v1423_v6  ;;  %v3610_v6 = vadd.f32 %v3536_v62, %v1715_v31 }
 0x6b8   :  { %2517 = vset.pattern.permute.xlu0 %v3882_v54  ;;  %v1726_v5 = vand.u32 2147483647, %v3590_v42 }
 0x6b9   :  { %2078 = vperm.xlu0 %2517, %v771_v21   ;;  %2594 = vpow2.f32 %v782_v22  ;;  %v1126_v21 = vand.u32 2147483647, %v3594_v25  ;;  %v1424_v63 = vsub.f32 0.0, %v1419_v37  ;;  %v3884_v22 = vmov 0  }
 0x6ba   :  { %2596 = vlog2.f32 %v1144_v1  ;;  %v1731_v1 = vsub.f32 0.0, %v1726_v5  ;;  %v1147_v37 = vadd.f32 1.0, %v2593_v9  ;;  %v3885_v5 = vmov 1  }
 0x6bb   :  { %2598 = vpow2.f32 %v1426_v18  ;;  %v1131_v51 = vsub.f32 0.0, %v1126_v21  ;;  %v1432_v7 = vmul.f32 1.442695, %v1424_v63  ;;  %v1729_v21 = vand.u32 2147483647, %v3610_v6 }
 0x6bc   :  { %2022 = vperm.xlu2 %2521, %v3579_v3   ;;  %2600 = vpow2.f32 %v1430_v0  ;;  %v1718_v0 = vpop.f32.mrf.mxu3  ;;  %v1736_v14 = vmul.f32 1.442695, %v1731_v1 }
 0x6bd   :  { %2602 = vpow2.f32 %v1133_v58  ;;  %v1139_v58 = vmul.f32 1.442695, %v1131_v51  ;;  %v1734_v51 = vsub.f32 0.0, %v1729_v21 }
 0x6be   :  { %2604 = vlog2.f32 %v1145_v59  ;;  %v1732_v59 = vsub.f32 0.0, %v1727_v20 }
 0x6bf   :  { %1587 = vrot.lane.b32.xlu1 %v3599_v56, %s2666_s21  ;;  %v3614_v18 = vpop.eup %2594  ;;  %2606 = vlog2.f32 %v1147_v37  ;;  %v1742_v21 = vmul.f32 1.442695, %v1734_v51  ;;  %v1428_v51 = vmul.f32 1.442695, %v1422_v13  ;;  %v3650_v13 = vadd.f32 %v3536_v62, %v3565_v55 }
 0x6c0   :  { %2524 = vset.pattern.permute.xlu1 %v3884_v22  ;;  %v2597_v15 = vpop.eup %2596  ;;  %v1775_v9 = vmax.f32 %v3614_v18, 1e-10  ;;  %2608 = vpow2.f32 %v1432_v7 }
 0x6c1   :  { %1585 = vrot.lane.b32.xlu0 %v3559_v47, %s2666_s21  ;;  %v2599_v31 = vpop.eup %2598  ;;  %v1151_v63 = vmul.f32 0.6931472, %v2597_v15  ;;  %2610 = vpow2.f32 %v1736_v14  ;;  %v1738_v15 = vmul.f32 1.442695, %v1732_v59  ;;  %v3640_v14 = vadd.f32 %v3536_v62, %v3524_v33 }
 0x6c2   :  { %2526 = vset.pattern.permute.xlu0 %v3884_v22  ;;  %v2601_v47 = vpop.eup %2600  ;;  %v1436_v1 = vadd.f32 1.0, %v2599_v31  ;;  %2612 = vpow2.f32 %v1139_v58  ;;  %v3636_v31 = vadd.f32 %v3366_v24, %v1570_v52  ;;  %v1120_v59 = vmax.f32 %v3548_v45, 0.0 }
 0x6c3   :  { %v2603_v28 = vpop.eup %2602  ;;  %v1438_v37 = vadd.f32 1.0, %v2601_v47  ;;  %v1122_v33 = vmax.f32 %v3551_v50, 0.0 }
 0x6c4   :  { %2522 = vset.pattern.permute.xlu2 %v3885_v5  ;;  %v3627_v5 = vadd.f32 %v3536_v62, %v1718_v0  ;;  %v2605_v7 = vpop.eup %2604  ;;  %v1159_v0 = vadd.f32 %v1151_v63, %v1119_v26  ;;  %2614 = vlog2.f32 %v1436_v1  ;;  %v1143_v58 = vadd.f32 1.0, %v2603_v28 }
 0x6c5   :  { %2054 = vperm.xlu2 %2522, %v3579_v3   ;;  %v1153_v47 = vmul.f32 0.6931472, %v2605_v7  ;;  %2616 = vlog2.f32 %v1438_v37 }
 0x6c6   :  { %v1730_v20 = vand.u32 2147483647, %v3627_v5  ;;  %2618 = vpow2.f32 %v1738_v15  ;;  %v1164_v40 = vadd.f32 1e-10, %v1159_v0 }
 0x6c7   :  { %1794 = vrot.lane.b32.xlu1 %v1775_v9, %s2665_s20  ;;  %v2607_v9 = vpop.eup %2606  ;;  %2620 = vpow2.f32 %v1742_v21  ;;  %v1160_v28 = vadd.f32 %v1153_v47, %v1120_v59  ;;  %v1411_v47 = vmax.f32 %v3562_v10, 0.0 }
 0x6c8   :  { %v2609_v56 = vpop.eup %2608  ;;  %v1735_v52 = vsub.f32 0.0, %v1730_v20  ;;  %v1157_v63 = vmul.f32 0.6931472, %v2607_v9  ;;  %2622 = vlog2.f32 %v1143_v58 }
 0x6c9   :  { %1792 = vrot.lane.b32.xlu0 %v1774_v46, %s2665_s20  ;;  %v2611_v26 = vpop.eup %2610  ;;  %v1439_v46 = vadd.f32 1.0, %v2609_v56  ;;  %v1165_v9 = vadd.f32 1e-10, %v1160_v28 }
 0x6ca   :  { %v2613_v1 = vpop.eup %2612  ;;  %v1746_v7 = vadd.f32 1.0, %v2611_v26  ;;  %v1162_v37 = vadd.f32 %v1157_v63, %v1122_v33  ;;  %v1413_v63 = vmax.f32 %v3569_v4, 0.0 }
 0x6cb   :  { %v2615_v45 = vpop.eup %2614  ;;  %2624 = vlog2.f32 %v1439_v46  ;;  %v1146_v56 = vadd.f32 1.0, %v2613_v1  ;;  %v1728_v46 = vand.u32 2147483647, %v3650_v13 }
 0x6cc   :  { %v2617_v15 = vpop.eup %2616  ;;  %2626 = vpow2.f32 %v1428_v51  ;;  %v1442_v50 = vmul.f32 0.6931472, %v2615_v45  ;;  %v1167_v58 = vadd.f32 1e-10, %v1162_v37 }
 0x6cd   :  { %2523 = vset.pattern.permute.xlu2 %v3882_v54  ;;  %v1420_v54 = vand.u32 2147483647, %v3640_v14  ;;  %v2619_v20 = vpop.eup %2618  ;;  %2628 = vlog2.f32 %v1746_v7  ;;  %v1446_v59 = vmul.f32 0.6931472, %v2617_v15  ;;  %v1733_v37 = vsub.f32 0.0, %v1728_v46 }
 0x6ce   :  { %2086 = vperm.xlu2 %2523, %v3579_v3   ;;  %v1744_v3 = vmul.f32 1.442695, %v1735_v52  ;;  %v2621_v21 = vpop.eup %2620  ;;  %v1747_v26 = vadd.f32 1.0, %v2619_v20  ;;  %v1451_v62 = vadd.f32 %v1442_v50, %v1411_v47  ;;  %v1414_v20 = vmax.f32 %v3585_v53, 0.0 }
 0x6cf   :  { %2155 = vperm.xlu1 %2524, %v3636_v31   ;;  %v1425_v0 = vsub.f32 0.0, %v1420_v54  ;;  %v2623_v52 = vpop.eup %2622  ;;  %v1749_v1 = vadd.f32 1.0, %v2621_v21  ;;  %v1453_v10 = vadd.f32 %v1446_v59, %v1413_v63  ;;  %v1721_v21 = vmax.f32 %v3590_v42, 0.0 }
 0x6d0   :  { %2630 = vpow2.f32 %v1744_v3  ;;  %v1456_v7 = vadd.f32 1e-10, %v1451_v62  ;;  %v1118_v3 = vmax.f32 %v3573_v49, 0.0  ;;  %v1740_v59 = vmul.f32 1.442695, %v1733_v37 }
 0x6d1   :  { %2219 = vperm.xlu0 %2526, %v1164_v40   ;;  %v1573_v40 = vpop.f32.mrf.mxu1  ;;  %v1434_v33 = vmul.f32 1.442695, %v1425_v0  ;;  %v2625_v55 = vpop.eup %2624  ;;  %2632 = vlog2.f32 %v1146_v56  ;;  %v1458_v0 = vadd.f32 1e-10, %v1453_v10  ;;  %v1121_v42 = vmax.f32 %v3594_v25, 0.0 }
 0x6d2   :  { %v2627_v51 = vpop.eup %2626  ;;  %v3659_v28 = vadd.f32 %v3366_v24, %v1573_v40  ;;  %2634 = vlog2.f32 %v1747_v26  ;;  %v1448_v4 = vmul.f32 0.6931472, %v2625_v55  ;;  %v3668_v26 = vld [vmem:[%s3851_s2 + $0xfc] ss:$0 sm:$0xff] }
 0x6d3   :  { %v2629_v54 = vpop.eup %2628  ;;  %2636 = vpow2.f32 %v1434_v33  ;;  %v1437_v15 = vadd.f32 1.0, %v2627_v51 }
 0x6d4   :  { %2638 = vlog2.f32 %v1749_v1  ;;  %v1454_v47 = vadd.f32 %v1448_v4, %v1414_v20  ;;  %v1722_v1 = vmax.f32 %v3604_v36, 0.0  ;;  %v3678_v36 = vld [vmem:[%s3851_s2 + $0xfd] ss:$0 sm:$0xff] }
 0x6d5   :  { %2640 = vlog2.f32 %v1437_v15 }
 0x6d6   :  { %1589 = vrot.lane.b32.xlu2 %v3614_v18, %s2666_s21  ;;  %v2631_v45 = vpop.eup %2630  ;;  %v1459_v33 = vadd.f32 1e-10, %v1454_v47 }
 0x6d7   :  { %2224 = vperm.xlu1 %2524, %v1165_v9   ;;  %2525 = vset.pattern.permute.xlu2 %v3884_v22  ;;  %v1149_v22 = vmul.f32 0.6931472, %v2623_v52  ;;  %v1752_v9 = vmul.f32 0.6931472, %v2629_v54  ;;  %v1750_v24 = vadd.f32 1.0, %v2631_v45  ;;  %v2633_v56 = vpop.eup %2632 }
 0x6d8   :  { %v1155_v63 = vmul.f32 0.6931472, %v2633_v56 }
 0x6d9   :  { %2234 = vperm.xlu0 %2526, %v1167_v58   ;;  %v1158_v50 = vadd.f32 %v1149_v22, %v1118_v3  ;;  %v2635_v58 = vpop.eup %2634  ;;  %v1761_v53 = vadd.f32 %v1752_v9, %v1721_v21  ;;  %2642 = vlog2.f32 %v1750_v24  ;;  %v1725_v21 = vmax.f32 %v3627_v5, 0.0 }
 0x6da   :  { %v2637_v49 = vpop.eup %2636  ;;  %v1754_v62 = vmul.f32 0.6931472, %v2635_v58  ;;  %2644 = vpow2.f32 %v1740_v59  ;;  %v1161_v22 = vadd.f32 %v1155_v63, %v1121_v42  ;;  %v1415_v5 = vmax.f32 %v3640_v14, 0.0 }
 0x6db   :  { %v2639_v52 = vpop.eup %2638  ;;  %v1163_v40 = vadd.f32 1e-10, %v1158_v50  ;;  %v1440_v55 = vadd.f32 1.0, %v2637_v49  ;;  %v1766_v10 = vadd.f32 1e-10, %v1761_v53 }
 0x6dc   :  { %v1758_v54 = vmul.f32 0.6931472, %v2639_v52  ;;  %v2641_v45 = vpop.eup %2640  ;;  %v1762_v3 = vadd.f32 %v1754_v62, %v1722_v1  ;;  %v3694_v1 = vadd.f32 %v3030_v2, %v3026_v57 }
 0x6dd   :  { %2646 = vlog2.f32 %v1440_v55  ;;  %v1444_v9 = vmul.f32 0.6931472, %v2641_v45 }
 0x6de   :  { %2160 = vperm.xlu2 %2525, %v3659_v28   ;;  %v1767_v50 = vadd.f32 1e-10, %v1762_v3 }
 0x6df   :  { %2251 = vperm.xlu1 %2524, %v1456_v7   ;;  %v1724_v7 = vmax.f32 %v3610_v6, 0.0  ;;  %v2643_v25 = vpop.eup %2642 }
 0x6e0   :  { %v2645_v15 = vpop.eup %2644  ;;  %v1760_v6 = vmul.f32 0.6931472, %v2643_v25 }
 0x6e1   :  { %2261 = vperm.xlu0 %2526, %v1458_v0   ;;  %v1764_v37 = vadd.f32 %v1758_v54, %v1724_v7  ;;  %v1166_v0 = vadd.f32 1e-10, %v1161_v22  ;;  %v1748_v56 = vadd.f32 1.0, %v2645_v15  ;;  %v3699_v7 = vld [vmem:[%s3851_s2 + $0xff] ss:$0 sm:$0xff] }
 0x6e2   :  { %v1765_v63 = vadd.f32 %v1760_v6, %v1725_v21  ;;  %v2127_v3 = vmul.f32 %v3699_v7, %v3487_v16  ;;  %v1286_v16 = vmul.f32 %v3510_v48, %v3373_v12 }
 0x6e3   :  { %v1769_v59 = vadd.f32 1e-10, %v1764_v37  ;;  %v2647_v52 = vpop.eup %2646 }
 0x6e4   :  { %v1450_v62 = vmul.f32 0.6931472, %v2647_v52  ;;  %v1770_v55 = vadd.f32 1e-10, %v1765_v63 }
 0x6e6   :  { %v2003_v46 = vpop.permute.xlu1 %2002  ;;  %2214 = vperm.xlu2 %2525, %v1163_v40   ;;  %v1455_v22 = vadd.f32 %v1450_v62, %v1415_v5  ;;  %v1287_v62 = vmul.f32 %v3526_v8, %v3385_v27 }
 0x6e7   :  { %v2026_v51 = vmul.f32 %v3668_v26, %v2003_v46  ;;  %2266 = vperm.xlu1 %2524, %v1459_v33  }
 0x6e8   :  { %v1460_v37 = vadd.f32 1e-10, %v1455_v22 }
 0x6e9   :  { %v2031_v4 = vadd.f32 %v2026_v51, %v3390_v29  ;;  %2288 = vperm.xlu0 %2526, %v1766_v10   ;;  %v1412_v29 = vmax.f32 %v3621_v39, 0.0 }
 0x6eb   :  { %v1452_v53 = vadd.f32 %v1444_v9, %v1412_v29  ;;  %v1723_v9 = vmax.f32 %v3650_v13, 0.0  ;;  %v2128_v29 = vmul.f32 %v3699_v7, %v3493_v17 }
 0x6ec   :  { %v2008_v20 = vpop.permute.xlu2 %2007 }
 0x6ed   :  { %v2027_v24 = vmul.f32 %v3668_v26, %v2008_v20  ;;  %v1457_v39 = vadd.f32 1e-10, %v1452_v53  ;;  %v856_v53 = vadd.f32 %v3030_v2, %v3005_v38 }
 0x6ee   :  { %2229 = vperm.xlu2 %2525, %v1166_v0  }
 0x6ef   :  { %v2032_v47 = vadd.f32 %v2027_v24, %v3465_v41  ;;  %v2039_v58 = vpop.permute.xlu1 %2038  ;;  %2293 = vperm.xlu1 %2524, %v1767_v50   ;;  %v3688_v41 = vld [vmem:[%s3851_s2 + $0xfe] ss:$0 sm:$0xff] }
 0x6f0   :  { %v2058_v49 = vmul.f32 %v3678_v36, %v2039_v58 }
 0x6f1   :  { %v1787_v40 = vpop.permute.xlu0 %1786  ;;  %2303 = vperm.xlu0 %2526, %v1769_v59  }
 0x6f2   :  { %v2063_v33 = vadd.f32 %v2058_v49, %v2031_v4  ;;  %2648 = vrcp.f32 %v1787_v40  ;;  %vm1806_vm5 = vweird.f32 %v1787_v40  ;;  %v1810_v13 = vand.u32 2147483647, %v1787_v40 }
 0x6f3   :  { %2650 = vlog2.f32 %v1748_v56  ;;  %v1812_v56 = vand.u32 2147483648, %v1787_v40 }
 0x6f4   :  { %vm1811_vm7 = vcmp.eq.f32.partialorder %v1810_v13, 8.507059e+37 }
 0x6f5   :  { %v2043_v42 = vpop.permute.xlu2 %2042  ;;  %v1813_v17 = vor.u32 1.1754944e-38, %v1812_v56 }
 0x6f6   :  { %v2059_v46 = vmul.f32 %v3678_v36, %v2043_v42  ;;  %2256 = vperm.xlu2 %2525, %v1457_v39  }
 0x6f7   :  { %2308 = vperm.xlu1 %2524, %v1770_v55  }
 0x6f8   :  { %v2649_v51 = vpop.eup %2648  ;;  %v2064_v10 = vadd.f32 %v2059_v46, %v2032_v47  ;;  %v2071_v54 = vpop.permute.xlu1 %2070 }
 0x6f9   :  { %v2651_v45 = vpop.eup %2650  ;;  %v1802_v4 = vmul.f32 %v2649_v51, %v1787_v40  ;;  %v2090_v14 = vmul.f32 %v3688_v41, %v2071_v54  ;;  %2330 = vperm.xlu0 %2526, %v3694_v1   ;;  %vm1807_vm4 = vweird.f32 %v2649_v51 }
 0x6fa   :  { %v1756_v15 = vmul.f32 0.6931472, %v2651_v45  ;;  %vm1808_vm6 = vmor %vm1806_vm5, %vm1807_vm4 }
 0x6fb   :  { %v1803_v57 = vsub.f32 1.0, %v1802_v4  ;;  %v2095_v25 = vadd.f32 %v2090_v14, %v2063_v33 }
 0x6fc   :  { %v1763_v47 = vadd.f32 %v1756_v15, %v1723_v9 }
 0x6fd   :  { %v1804_v20 = vmul.f32 %v2649_v51, %v1803_v57  ;;  %v3705_v0 = vadd.f32 %v2127_v3, %v2095_v25 }
 0x6fe   :  { %v2075_v24 = vpop.permute.xlu2 %2074  ;;  %2271 = vperm.xlu2 %2525, %v1460_v37   ;;  %v1768_v33 = vadd.f32 1e-10, %v1763_v47 }
 0x6ff   :  { %v2091_v50 = vmul.f32 %v3688_v41, %v2075_v24  ;;  %v1805_v6 = vadd.f32 %v2649_v51, %v1804_v20 }
 0x700   :  { %v1582_v21 = vpop.permute.xlu1 %1581 }
 0x701   :  { %v2096_v58 = vadd.f32 %v2091_v50, %v2064_v10  ;;  %v1596_v59 = vmul.f32 %v1582_v21, %v3484_v60  ;;  %v1809_v63 = vsel %vm1808_vm6, %v2649_v51, %v1805_v6 }
 0x702   :  { %v1814_v48 = vsel %vm1811_vm7, %v1813_v17, %v1809_v63 }
 0x703   :  { %v3714_v49 = vadd.f32 %v2128_v29, %v2096_v58  ;;  %v1601_v52 = vadd.f32 %v1596_v59, %v1286_v16  ;;  %v805_v59 = vadd.f32 %v3320_v61, %v2945_v19  ;;  %v2129_v61 = vmul.f32 %v3699_v7, %v3491_v30 }
 0x705   :  { %v1776_v39 = vsub.f32 %v856_v53, %v1601_v52  ;;  %v825_v17 = vadd.f32 %v3327_v23, %v805_v59 }
 0x706   :  { %v1584_v12 = vpop.permute.xlu2 %1583  ;;  %2298 = vperm.xlu2 %2525, %v1768_v33   ;;  %v2131_v33 = vmul.f32 %v3699_v7, %v3503_v43 }
 0x707   :  { %v1597_v60 = vmul.f32 %v1584_v12, %v3478_v32  ;;  %v1815_v40 = vmul.f32 %v1814_v48, %v1776_v39  ;;  %v2130_v12 = vmul.f32 %v3699_v7, %v3489_v35 }
 0x709   :  { %v1602_v42 = vadd.f32 %v1597_v60, %v1287_v62  ;;  %2177 = vperm.xlu0 %2526, %v1815_v40  }
 0x70b   :  { %v1777_v55 = vsub.f32 %v3694_v1, %v1602_v42 }
 0x70e   :  { %v3722_v38 = vpop.permute.xlu2 %1790  ;;  %2325 = vperm.xlu2 %2525, %v856_v53  }
 0x70f   :  { %v1789_v5 = vpop.permute.xlu1 %1788  ;;  %vm1836_vm13 = vweird.f32 %v3722_v38 }
 0x710   :  { %2652 = vrcp.f32 %v1789_v5  ;;  %v1827_v4 = vand.u32 2147483648, %v1789_v5  ;;  %v1825_v57 = vand.u32 2147483647, %v1789_v5  ;;  %vm1821_vm9 = vweird.f32 %v1789_v5 }
 0x711   :  { %2654 = vrcp.f32 %v3722_v38 }
 0x712   :  { %v1828_v15 = vor.u32 1.1754944e-38, %v1827_v4  ;;  %vm1826_vm11 = vcmp.eq.f32.partialorder %v1825_v57, 8.507059e+37  ;;  %v3891_v4 = vld [vmem:[#allocation12_spill] sm:$0xff] }
 0x716   :  { %v2653_v46 = vpop.eup %2652  ;;  %v2023_v51 = vpop.permute.xlu2 %2022 }
 0x717   :  { %v1817_v10 = vmul.f32 %v2653_v46, %v1789_v5  ;;  %v2030_v54 = vmul.f32 %v3668_v26, %v2023_v51  ;;  %v2018_v22 = vpop.permute.xlu1 %2017  ;;  %vm1822_vm8 = vweird.f32 %v2653_v46  ;;  %v2655_v56 = vpop.eup %2654 }
 0x718   :  { %v2029_v27 = vmul.f32 %v3668_v26, %v2018_v22  ;;  %vm1823_vm10 = vmor %vm1821_vm9, %vm1822_vm8  ;;  %v1832_v47 = vmul.f32 %v2655_v56, %v3722_v38  ;;  %vm1837_vm12 = vweird.f32 %v2655_v56 }
 0x719   :  { %v1818_v8 = vsub.f32 1.0, %v1817_v10  ;;  %v2035_v32 = vadd.f32 %v2030_v54, %v3480_v11  ;;  %v2013_v45 = vpop.permute.xlu0 %2012  ;;  %v3888_v54 = vld [vmem:[#allocation6_spill] sm:$0xff]  ;;  %vm1838_vm14 = vmor %vm1836_vm13, %vm1837_vm12 }
 0x71a   :  { %v2034_v1 = vadd.f32 %v2029_v27, %v3457_v34  ;;  %v2028_v14 = vmul.f32 %v3668_v26, %v2013_v45  ;;  %v1833_v52 = vsub.f32 1.0, %v1832_v47  ;;  %v3890_v45 = vld [vmem:[#allocation5_spill] sm:$0xff] }
 0x71b   :  { %v1819_v3 = vmul.f32 %v2653_v46, %v1818_v8  ;;  %v1842_v8 = vand.u32 2147483648, %v3722_v38 }
 0x71c   :  { %v2033_v25 = vadd.f32 %v2028_v14, %v3440_v44  ;;  %v1834_v60 = vmul.f32 %v2655_v56, %v1833_v52  ;;  %v3892_v14 = vld [vmem:[#allocation8_spill] sm:$0xff] }
 0x71d   :  { %v1820_v37 = vadd.f32 %v2653_v46, %v1819_v3 }
 0x71e   :  { %v1835_v30 = vadd.f32 %v2655_v56, %v1834_v60 }
 0x71f   :  { %v2055_v20 = vpop.permute.xlu2 %2054  ;;  %v1824_v9 = vsel %vm1823_vm10, %v2653_v46, %v1820_v37  ;;  %v3887_v46 = vld [vmem:[#allocation7_spill] sm:$0xff] }
 0x720   :  { %v2062_v11 = vmul.f32 %v3678_v36, %v2055_v20  ;;  %v2051_v24 = vpop.permute.xlu1 %2050  ;;  %v1829_v34 = vsel %vm1826_vm11, %v1828_v15, %v1824_v9  ;;  %v1290_v51 = vmul.f32 %v3614_v18, %v3887_v46  ;;  %v1288_v18 = vmul.f32 %v3891_v4, %v3890_v45  ;;  %v3893_v37 = vld [vmem:[#allocation3_spill] sm:$0xff]  ;;  %v3776_v20 = vld [vmem:[%s3851_s2 + $0x100] ss:$0 sm:$0xff]  ;;  %v2552_v45 = vld [vmem:[%s3851_s2 + $0x103] ss:$0 sm:$0xff] }
 0x721   :  { %v2061_v26 = vmul.f32 %v3678_v36, %v2051_v24  ;;  %v1830_v50 = vmul.f32 %v1829_v34, %v1777_v55  ;;  %v3886_v55 = vld [vmem:[#allocation4_spill] sm:$0xff]  ;;  %v1843_v9 = vor.u32 1.1754944e-38, %v1842_v8 }
 0x722   :  { %v2067_v6 = vadd.f32 %v2062_v11, %v2035_v32  ;;  %v2047_v29 = vpop.permute.xlu0 %2046  ;;  %v845_v23 = vadd.f32 %v3886_v55, %v825_v17  ;;  %v3894_v11 = vld [vmem:[#allocation2_spill] sm:$0xff] }
 0x723   :  { %v2066_v44 = vadd.f32 %v2061_v26, %v2034_v1  ;;  %2182 = vperm.xlu1 %2524, %v1830_v50   ;;  %v2060_v16 = vmul.f32 %v3678_v36, %v2047_v29 }
 0x724   :  { %v3757_v7 = vadd.f32 %v3030_v2, %v845_v23 }
 0x725   :  { %v2065_v21 = vadd.f32 %v2060_v16, %v2033_v25  ;;  %v1839_v25 = vsel %vm1838_vm14, %v2655_v56, %v1835_v30 }
 0x728   :  { %v2087_v58 = vpop.permute.xlu2 %2086 }
 0x729   :  { %v2094_v13 = vmul.f32 %v3688_v41, %v2087_v58  ;;  %v2083_v53 = vpop.permute.xlu1 %2082 }
 0x72a   :  { %v2093_v63 = vmul.f32 %v3688_v41, %v2083_v53 }
 0x72b   :  { %v2099_v39 = vadd.f32 %v2094_v13, %v2067_v6  ;;  %v2079_v36 = vpop.permute.xlu0 %2078 }
 0x72c   :  { %v2098_v48 = vadd.f32 %v2093_v63, %v2066_v44  ;;  %v2092_v62 = vmul.f32 %v3688_v41, %v2079_v36  ;;  %v3889_v41 = vld [vmem:[#allocation13_spill] sm:$0xff] }
 0x72d   :  { %v2136_v19 = vadd.f32 %v2131_v33, %v2099_v39  ;;  %v1289_v22 = vmul.f32 %v3889_v41, %v3888_v54 }
 0x72e   :  { %v2097_v40 = vadd.f32 %v2092_v62, %v2065_v21  ;;  %v2135_v42 = vadd.f32 %v2130_v12, %v2098_v48  ;;  %v3793_v62 = vld [vmem:[%s3851_s2 + $0x102] ss:$0 sm:$0xff] }
 0x730   :  { %v3748_v5 = vadd.f32 %v2129_v61, %v2097_v40  ;;  %v1590_v43 = vpop.permute.xlu2 %1589 }
 0x731   :  { %v1600_v35 = vmul.f32 %v1590_v43, %v3659_v28  ;;  %v1588_v10 = vpop.permute.xlu1 %1587 }
 0x732   :  { %v1599_v27 = vmul.f32 %v1588_v10, %v3636_v31  ;;  %v1840_v31 = vand.u32 2147483647, %v3722_v38 }
 0x733   :  { %v3760_v32 = vadd.f32 %v1600_v35, %v1290_v51  ;;  %v1586_v1 = vpop.permute.xlu0 %1585 }
 0x734   :  { %v3765_v28 = vadd.f32 %v1599_v27, %v1289_v22  ;;  %v1598_v3 = vmul.f32 %v1586_v1, %v3892_v14  ;;  %vm1841_vm15 = vcmp.eq.f32.partialorder %v1840_v31, 8.507059e+37 }
 0x735   :  { %v1780_v2 = vsub.f32 %v3757_v7, %v3760_v32  ;;  %v1844_v50 = vsel %vm1841_vm15, %v1843_v9, %v1839_v25 }
 0x736   :  { %v1603_v57 = vadd.f32 %v1598_v3, %v1288_v18  ;;  %v1779_v15 = vsub.f32 %v3893_v37, %v3765_v28 }
 0x738   :  { %v1778_v24 = vsub.f32 %v3894_v11, %v1603_v57  ;;  %v2161_v34 = vpop.permute.xlu2 %2160 }
 0x739   :  { %v2168_v38 = vmul.f32 %v3776_v20, %v2161_v34  ;;  %v1795_v26 = vpop.permute.xlu1 %1794 }
 0x73a   :  { %2656 = vrcp.f32 %v1795_v26  ;;  %v1845_v6 = vmul.f32 %v1844_v50, %v1778_v24  ;;  %v1872_v63 = vand.u32 2147483648, %v1795_v26  ;;  %v1870_v36 = vand.u32 2147483647, %v1795_v26  ;;  %v3895_v24 = vld [vmem:[#allocation11_spill] sm:$0xff] }
 0x73b   :  { %v3780_v29 = vadd.f32 %v2168_v38, %v2136_v19  ;;  %v1793_v56 = vpop.permute.xlu0 %1792  ;;  %vm1866_vm1 = vweird.f32 %v1795_v26 }
 0x73c   :  { %2658 = vrcp.f32 %v1793_v56  ;;  %2187 = vperm.xlu2 %2525, %v1845_v6   ;;  %v1857_v12 = vand.u32 2147483648, %v1793_v56  ;;  %v1855_v61 = vand.u32 2147483647, %v1793_v56  ;;  %v1873_v60 = vor.u32 1.1754944e-38, %v1872_v63 }
 0x73d   :  { %vm1851_vm3 = vweird.f32 %v1793_v56  ;;  %vm1871_vm5 = vcmp.eq.f32.partialorder %v1870_v36, 8.507059e+37  ;;  %v3897_v36 = vld [vmem:[#allocation10_spill] sm:$0xff] }
 0x73e   :  { %v1858_v46 = vor.u32 1.1754944e-38, %v1857_v12  ;;  %vm1856_vm7 = vcmp.eq.f32.partialorder %v1855_v61, 8.507059e+37  ;;  %v2166_v12 = vmul.f32 %v3776_v20, %v3897_v36 }
 0x740   :  { %v2657_v44 = vpop.eup %2656  ;;  %v3782_v16 = vpop.permute.xlu2 %2214 }
 0x741   :  { %v1862_v21 = vmul.f32 %v2657_v44, %v1795_v26  ;;  %v2156_v47 = vpop.permute.xlu1 %2155  ;;  %vm1867_vm0 = vweird.f32 %v2657_v44  ;;  %v2238_v50 = vmul.f32 %v3793_v62, %v3782_v16  ;;  %v3896_v16 = vld [vmem:[#allocation9_spill] sm:$0xff] }
 0x742   :  { %v2659_v58 = vpop.eup %2658  ;;  %v2167_v59 = vmul.f32 %v3776_v20, %v2156_v47  ;;  %vm1868_vm4 = vmor %vm1866_vm1, %vm1867_vm0 }
 0x743   :  { %v1863_v13 = vsub.f32 1.0, %v1862_v21  ;;  %v1847_v53 = vmul.f32 %v2659_v58, %v1793_v56  ;;  %v3785_v52 = vpop.permute.xlu0 %2219  ;;  %vm1852_vm2 = vweird.f32 %v2659_v58 }
 0x744   :  { %v3787_v17 = vadd.f32 %v2167_v59, %v2135_v42  ;;  %2340 = vperm.xlu2 %2525, %v3893_v37   ;;  %vm1853_vm6 = vmor %vm1851_vm3, %vm1852_vm2 }
 0x745   :  { %v1864_v33 = vmul.f32 %v2657_v44, %v1863_v13  ;;  %v1848_v39 = vsub.f32 1.0, %v1847_v53 }
 0x747   :  { %v1849_v48 = vmul.f32 %v2659_v58, %v1848_v39  ;;  %v1865_v19 = vadd.f32 %v2657_v44, %v1864_v33  ;;  %v2165_v39 = vmul.f32 %v3776_v20, %v3896_v16 }
 0x748   :  { %v2230_v40 = vpop.permute.xlu2 %2229 }
 0x749   :  { %v3796_v42 = vmul.f32 %v3793_v62, %v2230_v40  ;;  %v2225_v55 = vpop.permute.xlu1 %2224  ;;  %v1869_v23 = vsel %vm1868_vm4, %v2657_v44, %v1865_v19  ;;  %v1850_v43 = vadd.f32 %v2659_v58, %v1849_v48  ;;  %v2554_v44 = vld [vmem:[%s3851_s2 + $0x105] ss:$0 sm:$0xff]  ;;  %v2170_v19 = vadd.f32 %v2165_v39, %v3714_v49 }
 0x74a   :  { %v3799_v51 = vmul.f32 %v3793_v62, %v2225_v55  ;;  %v1874_v35 = vsel %vm1871_vm5, %v1873_v60, %v1869_v23  ;;  %v2171_v40 = vadd.f32 %v2166_v12, %v3748_v5  ;;  %v2239_v23 = vmul.f32 %v3793_v62, %v3785_v52 }
 0x74b   :  { %v2235_v10 = vpop.permute.xlu0 %2234  ;;  %v1875_v54 = vmul.f32 %v1874_v35, %v1780_v2  ;;  %v1854_v41 = vsel %vm1853_vm6, %v2659_v58, %v1850_v43  ;;  %v2553_v2 = vld [vmem:[%s3851_s2 + $0x104] ss:$0 sm:$0xff] }
 0x74c   :  { %v3802_v22 = vmul.f32 %v3793_v62, %v2235_v10  ;;  %v1859_v27 = vsel %vm1856_vm7, %v1858_v46, %v1854_v41 }
 0x74d   :  { %2197 = vperm.xlu1 %2524, %v1875_v54   ;;  %v1860_v30 = vmul.f32 %v1859_v27, %v1779_v15 }
 0x74f   :  { %2192 = vperm.xlu0 %2526, %v1860_v30  }
 0x750   :  { %v2257_v8 = vpop.permute.xlu2 %2256 }
 0x751   :  { %v2252_v32 = vpop.permute.xlu1 %2251  ;;  %v2276_v35 = vmul.f32 %v2552_v45, %v2257_v8 }
 0x752   :  { %v2275_v56 = vmul.f32 %v2552_v45, %v2252_v32 }
 0x753   :  { %v2262_v4 = vpop.permute.xlu0 %2261 }
 0x754   :  { %v2277_v18 = vmul.f32 %v2552_v45, %v2262_v4 }
 0x755   :  { %2335 = vperm.xlu1 %2524, %v3894_v11   ;;  %v2555_v11 = vld [vmem:[%s3851_s2 + $0x101] ss:$0 sm:$0xff] }
 0x757   :  { %2345 = vperm.xlu0 %2526, %v3757_v7   ;;  %v2164_v7 = vmul.f32 %v3776_v20, %v3895_v24 }
 0x758   :  { %v2272_v1 = vpop.permute.xlu2 %2271 }
 0x759   :  { %v2279_v28 = vmul.f32 %v2552_v45, %v2272_v1  ;;  %v2267_v14 = vpop.permute.xlu1 %2266  ;;  %v2169_v38 = vadd.f32 %v2164_v7, %v3705_v0 }
 0x75a   :  { %v2278_v3 = vmul.f32 %v2552_v45, %v2267_v14 }
 0x75b   :  { %v2289_v31 = vpop.permute.xlu0 %2288 }
 0x75c   :  { %v2312_v58 = vmul.f32 %v2553_v2, %v2289_v31 }
 0x760   :  { %v2299_v57 = vpop.permute.xlu2 %2298 }
 0x761   :  { %v2314_v25 = vmul.f32 %v2553_v2, %v2299_v57  ;;  %v2294_v13 = vpop.permute.xlu1 %2293 }
 0x762   :  { %v2313_v41 = vmul.f32 %v2553_v2, %v2294_v13 }
 0x763   :  { %v2304_v37 = vpop.permute.xlu0 %2303 }
 0x764   :  { %v2315_v15 = vmul.f32 %v2553_v2, %v2304_v37 }
 0x768   :  { %v2326_v47 = vpop.permute.xlu2 %2325 }
 0x769   :  { %v2349_v53 = vmul.f32 %v2554_v44, %v2326_v47  ;;  %v2309_v0 = vpop.permute.xlu1 %2308 }
 0x76a   :  { %v2316_v14 = vmul.f32 %v2553_v2, %v2309_v0 }
 0x76b   :  { %v2331_v9 = vpop.permute.xlu0 %2330 }
 0x76c   :  { %v2350_v30 = vmul.f32 %v2554_v44, %v2331_v9 }
 0x77b   :  { %v2178_v34 = vpop.permute.xlu0 %2177 }
 0x77c   :  { %v2201_v26 = vmul.f32 %v2555_v11, %v2178_v34 }
 0x77e   :  { %v2206_v6 = vadd.f32 %v2201_v26, %v2169_v38 }
 0x780   :  { %v2243_v21 = vadd.f32 %v2238_v50, %v2206_v6 }
 0x782   :  { %v2280_v59 = vadd.f32 %v2275_v56, %v2243_v21 }
 0x784   :  { %v2317_v63 = vadd.f32 %v2312_v58, %v2280_v59 }
 0x786   :  { %v2354_v33 = vadd.f32 %v2349_v53, %v2317_v63 }
 0x788   :  { %2359 = vst [vmem:[%s3857_s6] sm:$0xff] %v2354_v33 }
 0x795   :  { %v2183_v48 = vpop.permute.xlu1 %2182 }
 0x796   :  { %v2202_v61 = vmul.f32 %v2555_v11, %v2183_v48  ;;  %v2188_v60 = vpop.permute.xlu2 %2187 }
 0x797   :  { %v2203_v55 = vmul.f32 %v2555_v11, %v2188_v60 }
 0x798   :  { %v2207_v43 = vadd.f32 %v2202_v61, %v2170_v19 }
 0x799   :  { %v2208_v46 = vadd.f32 %v2203_v55, %v2171_v40 }
 0x79a   :  { %v2244_v10 = vadd.f32 %v2239_v23, %v2207_v43 }
 0x79b   :  { %v2245_v54 = vadd.f32 %v3799_v51, %v2208_v46 }
 0x79c   :  { %v2281_v27 = vadd.f32 %v2276_v35, %v2244_v10 }
 0x79d   :  { %v2282_v20 = vadd.f32 %v2277_v18, %v2245_v54 }
 0x79e   :  { %v2318_v32 = vadd.f32 %v2313_v41, %v2281_v27  ;;  %v2341_v57 = vpop.permute.xlu2 %2340 }
 0x79f   :  { %v2319_v49 = vadd.f32 %v2314_v25, %v2282_v20  ;;  %v2352_v34 = vmul.f32 %v2554_v44, %v2341_v57 }
 0x7a0   :  { %v2355_v4 = vadd.f32 %v2350_v30, %v2318_v32 }
 0x7a2   :  { %2360 = vst [vmem:[%s3857_s6 + $0x8] sm:$0xff] %v2355_v4 }
 0x7bf   :  { %v2198_v5 = vpop.permute.xlu1 %2197 }
 0x7c0   :  { %v2205_v1 = vmul.f32 %v2555_v11, %v2198_v5 }
 0x7c1   :  { %v2193_v52 = vpop.permute.xlu0 %2192 }
 0x7c2   :  { %v2210_v62 = vadd.f32 %v2205_v1, %v3780_v29  ;;  %v2204_v8 = vmul.f32 %v2555_v11, %v2193_v52 }
 0x7c4   :  { %v2247_v45 = vadd.f32 %v3802_v22, %v2210_v62  ;;  %v2209_v51 = vadd.f32 %v2204_v8, %v3787_v17 }
 0x7c6   :  { %v2246_v18 = vadd.f32 %v3796_v42, %v2209_v51  ;;  %v2284_v31 = vadd.f32 %v2279_v28, %v2247_v45 }
 0x7c7   :  { %v2336_v25 = vpop.permute.xlu1 %2335 }
 0x7c8   :  { %v2283_v37 = vadd.f32 %v2278_v3, %v2246_v18  ;;  %v2351_v9 = vmul.f32 %v2554_v44, %v2336_v25  ;;  %v2321_v24 = vadd.f32 %v2316_v14, %v2284_v31 }
 0x7c9   :  { %v2346_v7 = vpop.permute.xlu0 %2345 }
 0x7ca   :  { %v2320_v38 = vadd.f32 %v2315_v15, %v2283_v37  ;;  %v2356_v26 = vadd.f32 %v2351_v9, %v2319_v49  ;;  %v2353_v50 = vmul.f32 %v2554_v44, %v2346_v7 }
 0x7cc   :  { %v2357_v29 = vadd.f32 %v2352_v34, %v2320_v38  ;;  %2361 = vst [vmem:[%s3857_s6 + $0x10] sm:$0xff] %v2356_v26  ;;  %v2358_v17 = vadd.f32 %v2353_v50, %v2321_v24 }
 0x7ce   :  { %2362 = vst [vmem:[%s3857_s6 + $0x18] sm:$0xff] %v2357_v29 }
 0x7cf   :  { %2363 = vst [vmem:[%s3857_s6 + $0x20] sm:$0xff] %v2358_v17 }

</bundles_post_ra>
